<compile_context>
chip_gen: v7x
topology: tpu7x:2x2x1
jax: 0.10.0
libtpu: 0.0.40
codegen_flags: <defaults>
</compile_context>

<pallas_src>
import functools

import jax
import jax.numpy as jnp
from jax import lax
from jax.experimental import pallas as pl
from jax.experimental.pallas import tpu as pltpu

SEQ_WIDTH = 8
INPUT_SIZE = SEQ_WIDTH + 1            # 9
HIDDEN = 200
OUTPUT_SIZE = 8
OUT_TOTAL = OUTPUT_SIZE + 2 * HIDDEN  # 408
NUM_LAYERS = 1

# Lane/sublane-padded sizes.
IN_PAD = 16
H_PAD = 256
G_PAD = 4 * H_PAD                     # 1024
OUT_PAD = 512

# PyTorch LSTM gate order is (i, f, g, o); we repack to (i, f, o, g) so the three
# sigmoid gates are contiguous in the lane dimension.
GATE_PERM = (0, 1, 3, 2)


def dni_copy_kernel(x_ref, w_ih_ref, b_ref, b_lin_ref, w_hh_hbm, w_lin_hbm,
                    out_ref, h_out_ref, c_out_ref,
                    xw_scr, h_seq_scr, w_hh_vmem, w_lin_vmem, dma_sems,
                    *, T, BP):
    # 0) Kick off the big weight DMAs immediately; they are hidden behind the
    #    input projection (W_hh) and the whole recurrence (W_lin).
    w_hh_cp = pltpu.make_async_copy(w_hh_hbm, w_hh_vmem, dma_sems.at[0])
    w_lin_cp = pltpu.make_async_copy(w_lin_hbm, w_lin_vmem, dma_sems.at[1])
    w_hh_cp.start()
    w_lin_cp.start()

    # 1) Input projection for all timesteps at once (off the serial path).
    #    (T*BP, IN_PAD) @ (IN_PAD, 4*H_PAD) + (1, 4*H_PAD)
    xw_scr[...] = (jnp.dot(x_ref[...], w_ih_ref[...],
                           preferred_element_type=jnp.float32)
                   + b_ref[...])

    # 2) Serial recurrence, fully unrolled. Only one wide matmul per step.
    w_hh_cp.wait()
    w_hh = w_hh_vmem[...]          # hoisted: same stationary RHS every step
    h = jnp.zeros((BP, H_PAD), jnp.float32)
    c = jnp.zeros((BP, H_PAD), jnp.float32)
    for t in range(T):
        gates = (xw_scr[t * BP:(t + 1) * BP, :]
                 + jnp.dot(h, w_hh, preferred_element_type=jnp.float32))
        # Gate order in lanes: (i, f, o, g) -> one contiguous sigmoid slab + one tanh.
        sig = jax.nn.sigmoid(gates[:, 0:3 * H_PAD])
        i_g = sig[:, 0:H_PAD]
        f_g = sig[:, H_PAD:2 * H_PAD]
        o_g = sig[:, 2 * H_PAD:3 * H_PAD]
        g_g = jnp.tanh(gates[:, 3 * H_PAD:4 * H_PAD])
        c = f_g * c + i_g * g_g
        h = o_g * jnp.tanh(c)
        h_seq_scr[t * BP:(t + 1) * BP, :] = h

    # 3) Final LSTM state, written exactly once.
    h_out_ref[...] = h
    c_out_ref[...] = c

    # 4) Output Linear batched over all timesteps (off the serial path).
    #    (T*BP, H_PAD) @ (H_PAD, OUT_PAD) + (1, OUT_PAD)
    w_lin_cp.wait()
    out_ref[...] = (jnp.dot(h_seq_scr[...], w_lin_vmem[...],
                            preferred_element_type=jnp.float32)
                    + b_lin_ref[...])


def dni_copy_forward(x_btf, w_ih, w_hh, b_ih, b_hh, w_lin, b_lin):
    """x_btf: (B, T, INPUT_SIZE) float32.  Returns (output, (h_n, c_n)) like PyTorch."""
    B, T, _ = x_btf.shape
    B_PAD = max(8, ((B + 7) // 8) * 8)
    perm = jnp.array(GATE_PERM)

    # ---- repack + zero-pad parameters (exact padding; padded lanes contribute 0) ----
    # PyTorch: weight_ih (4H, IN), weight_hh (4H, H), gate order (i, f, g, o).
    w_ih_g = w_ih.reshape(4, HIDDEN, INPUT_SIZE)[perm].transpose(0, 2, 1)   # (4, IN, H)
    w_ih_g = jnp.pad(w_ih_g, ((0, 0), (0, IN_PAD - INPUT_SIZE), (0, H_PAD - HIDDEN)))
    w_ih_all = w_ih_g.transpose(1, 0, 2).reshape(IN_PAD, G_PAD)             # (16, 1024)

    w_hh_g = w_hh.reshape(4, HIDDEN, HIDDEN)[perm].transpose(0, 2, 1)       # (4, H, H)
    w_hh_g = jnp.pad(w_hh_g, ((0, 0), (0, H_PAD - HIDDEN), (0, H_PAD - HIDDEN)))
    w_hh_all = w_hh_g.transpose(1, 0, 2).reshape(H_PAD, G_PAD)              # (256, 1024)

    b_g = (b_ih + b_hh).reshape(4, HIDDEN)[perm]
    b_g = jnp.pad(b_g, ((0, 0), (0, H_PAD - HIDDEN)))
    b_all = b_g.reshape(1, G_PAD)                                           # (1, 1024)

    w_lin_p = jnp.pad(w_lin.T, ((0, H_PAD - HIDDEN), (0, OUT_PAD - OUT_TOTAL)))  # (256, 512)
    b_lin_p = jnp.pad(b_lin, (0, OUT_PAD - OUT_TOTAL)).reshape(1, OUT_PAD)       # (1, 512)

    # ---- input: time-major, batch/feature padded, flattened to (T*B_PAD, IN_PAD) ----
    x_tbf = jnp.transpose(x_btf, (1, 0, 2)).astype(jnp.float32)             # (T, B, 9)
    x_p = jnp.pad(x_tbf, ((0, 0), (0, B_PAD - B), (0, IN_PAD - INPUT_SIZE)))
    x_flat = x_p.reshape(T * B_PAD, IN_PAD)

    out_shapes = (
        jax.ShapeDtypeStruct((T * B_PAD, OUT_PAD), jnp.float32),   # output (flat, lane-dense)
        jax.ShapeDtypeStruct((B_PAD, H_PAD), jnp.float32),         # h_n
        jax.ShapeDtypeStruct((B_PAD, H_PAD), jnp.float32),         # c_n
    )

    grid_spec = pltpu.PrefetchScalarGridSpec(
        num_scalar_prefetch=0,
        grid=(1,),
        in_specs=[
            pl.BlockSpec((T * B_PAD, IN_PAD), lambda i: (0, 0)),   # x (all steps)
            pl.BlockSpec((IN_PAD, G_PAD), lambda i: (0, 0)),       # W_ih_all
            pl.BlockSpec((1, G_PAD), lambda i: (0, 0)),            # b_ih + b_hh
            pl.BlockSpec((1, OUT_PAD), lambda i: (0, 0)),          # linear b
            pl.BlockSpec(memory_space=pl.ANY),                     # W_hh_all (manual DMA)
            pl.BlockSpec(memory_space=pl.ANY),                     # linear W^T (manual DMA)
        ],
        out_specs=[
            pl.BlockSpec((T * B_PAD, OUT_PAD), lambda i: (0, 0)),
            pl.BlockSpec((B_PAD, H_PAD), lambda i: (0, 0)),
            pl.BlockSpec((B_PAD, H_PAD), lambda i: (0, 0)),
        ],
        scratch_shapes=[
            pltpu.VMEM((T * B_PAD, G_PAD), jnp.float32),   # precomputed x @ W_ih + b
            pltpu.VMEM((T * B_PAD, H_PAD), jnp.float32),   # hidden sequence
            pltpu.VMEM((H_PAD, G_PAD), jnp.float32),       # W_hh landing buffer
            pltpu.VMEM((H_PAD, OUT_PAD), jnp.float32),     # W_lin landing buffer
            pltpu.SemaphoreType.DMA((2,)),                 # [w_hh, w_lin] copy sems
        ],
    )

    out_flat, h_p, c_p = pl.pallas_call(
        functools.partial(dni_copy_kernel, T=T, BP=B_PAD),
        out_shape=out_shapes,
        grid_spec=grid_spec,
        compiler_params=pltpu.CompilerParams(dimension_semantics=("arbitrary",)),
    )(x_flat, w_ih_all, b_all, b_lin_p, w_hh_all, w_lin_p)

    # ---- slice padding away and restore PyTorch conventions ----
    out_p = out_flat.reshape(T, B_PAD, OUT_PAD)
    out_btf = jnp.transpose(out_p[:, :B, :OUT_TOTAL], (1, 0, 2))   # (B, T, 408)
    h_n = h_p[:B, :HIDDEN][None]                                   # (1, B, 200)
    c_n = c_p[:B, :HIDDEN][None]
    return out_btf, (h_n, c_n)


def dni_copy_reference(x, w_ih, w_hh, b_ih, b_hh, w_lin, b_lin):
    """Pure-JAX reference matching torch.nn.LSTM(batch_first=True) + Linear."""
    B, T, _ = x.shape

    def cell(carry, x_t):
        h, c = carry
        gates = x_t @ w_ih.T + b_ih + h @ w_hh.T + b_hh
        i, f, g, o = jnp.split(gates, 4, axis=-1)
        i = jax.nn.sigmoid(i)
        f = jax.nn.sigmoid(f)
        g = jnp.tanh(g)
        o = jax.nn.sigmoid(o)
        c = f * c + i * g
        h = o * jnp.tanh(c)
        return (h, c), h

    h0 = jnp.zeros((B, HIDDEN), jnp.float32)
    c0 = jnp.zeros((B, HIDDEN), jnp.float32)
    (hT, cT), hs = lax.scan(cell, (h0, c0), jnp.transpose(x, (1, 0, 2)))
    out = jnp.transpose(hs, (1, 0, 2)) @ w_lin.T + b_lin
    return out, (hT[None], cT[None])


def init_params(key):
    """Deterministic init mirroring DNICopy.__init__ / init_weights."""
    k = 1.0 / jnp.sqrt(HIDDEN)  # PyTorch default LSTM init range
    ks = jax.random.split(key, 5)
    w_ih = jax.random.uniform(ks[0], (4 * HIDDEN, INPUT_SIZE), jnp.float32, -k, k)
    w_hh = jax.random.uniform(ks[1], (4 * HIDDEN, HIDDEN), jnp.float32, -k, k)
    b_ih = jax.random.uniform(ks[2], (4 * HIDDEN,), jnp.float32, -k, k)
    b_hh = jax.random.uniform(ks[3], (4 * HIDDEN,), jnp.float32, -k, k)
    # init_weights(): zero the forget-gate slice [n//4 : n//2] of every LSTM bias
    b_ih = b_ih.at[HIDDEN:2 * HIDDEN].set(0.0)
    b_hh = b_hh.at[HIDDEN:2 * HIDDEN].set(0.0)
    # linear: weight ~ U(-0.1, 0.1), bias = 0
    w_lin = jax.random.uniform(ks[4], (OUT_TOTAL, HIDDEN), jnp.float32, -0.1, 0.1)
    b_lin = jnp.zeros((OUT_TOTAL,), jnp.float32)
    return w_ih, w_hh, b_ih, b_hh, w_lin, b_lin


if __name__ == "__main__":
    key = jax.random.PRNGKey(0)
    k_in, k_par = jax.random.split(key)

    B, T = 2, 8
    x = jax.random.normal(k_in, (B, T, INPUT_SIZE), jnp.float32)  # batch_first input

    params = init_params(k_par)

    out, (h_n, c_n) = dni_copy_forward(x, *params)
    jax.block_until_ready((out, h_n, c_n))

    out_ref, (h_ref, c_ref) = dni_copy_reference(x, *params)
    assert out.shape == (B, T, OUT_TOTAL)
    assert h_n.shape == (NUM_LAYERS, B, HIDDEN) and c_n.shape == (NUM_LAYERS, B, HIDDEN)
    assert jnp.allclose(out, out_ref, rtol=1e-4, atol=1e-4)
    assert jnp.allclose(h_n, h_ref, rtol=1e-4, atol=1e-4)
    assert jnp.allclose(c_n, c_ref, rtol=1e-4, atol=1e-4)

    print("KERNEL_OK")
</pallas_src>

<mosaic_0001>
module attributes {stable_mosaic.version = 11 : i64} {
  func.func @dni_copy_kernel(%arg0: i32, %arg1: memref<64x16xf32, #tpu.memory_space<vmem>>, %arg2: memref<16x1024xf32, #tpu.memory_space<vmem>>, %arg3: memref<1x1024xf32, #tpu.memory_space<vmem>>, %arg4: memref<1x512xf32, #tpu.memory_space<vmem>>, %arg5: memref<256x1024xf32, #tpu.memory_space<any>>, %arg6: memref<256x512xf32, #tpu.memory_space<any>>, %arg7: memref<64x512xf32, #tpu.memory_space<vmem>>, %arg8: memref<8x256xf32, #tpu.memory_space<vmem>>, %arg9: memref<8x256xf32, #tpu.memory_space<vmem>>, %arg10: memref<64x1024xf32, #tpu.memory_space<vmem>>, %arg11: memref<64x256xf32, #tpu.memory_space<vmem>>, %arg12: memref<256x1024xf32, #tpu.memory_space<vmem>>, %arg13: memref<256x512xf32, #tpu.memory_space<vmem>>, %arg14: memref<2x!tpu.dma_semaphore, #tpu.memory_space<semaphore_mem>>) attributes {dimension_semantics = [#tpu.dimension_semantics<arbitrary>], iteration_bounds = array<i64: 1>, scalar_prefetch = 0 : i64, scratch_operands = 5 : i64, tpu.core_type = #tpu.core_type<tc>, window_params = [{pipeline_mode = #tpu.pipeline_mode<synchronous>, transform_indices = @transform_0, window_bounds = array<i64: 64, 16>}, {pipeline_mode = #tpu.pipeline_mode<synchronous>, transform_indices = @transform_1, window_bounds = array<i64: 16, 1024>}, {pipeline_mode = #tpu.pipeline_mode<synchronous>, transform_indices = @transform_2, window_bounds = array<i64: 1, 1024>}, {pipeline_mode = #tpu.pipeline_mode<synchronous>, transform_indices = @transform_3, window_bounds = array<i64: 1, 512>}, {}, {}, {pipeline_mode = #tpu.pipeline_mode<synchronous>, transform_indices = @transform_6, window_bounds = array<i64: 64, 512>}, {pipeline_mode = #tpu.pipeline_mode<synchronous>, transform_indices = @transform_7, window_bounds = array<i64: 8, 256>}, {pipeline_mode = #tpu.pipeline_mode<synchronous>, transform_indices = @transform_8, window_bounds = array<i64: 8, 256>}]} {
    %c0_i32 = arith.constant 0 : i32
    %0 = tpu.memref_slice %arg14[%c0_i32] : memref<2x!tpu.dma_semaphore, #tpu.memory_space<semaphore_mem>> -> memref<1x!tpu.dma_semaphore, #tpu.memory_space<semaphore_mem>>
    %1 = tpu.memref_squeeze %0 : memref<1x!tpu.dma_semaphore, #tpu.memory_space<semaphore_mem>> -> memref<!tpu.dma_semaphore, #tpu.memory_space<semaphore_mem>>
    tpu.enqueue_dma source(%arg5 : memref<256x1024xf32, #tpu.memory_space<any>>) target(%arg12 : memref<256x1024xf32, #tpu.memory_space<vmem>>) target_semaphore(%1 : memref<!tpu.dma_semaphore, #tpu.memory_space<semaphore_mem>>)
    %c1_i32 = arith.constant 1 : i32
    %2 = tpu.memref_slice %arg14[%c1_i32] : memref<2x!tpu.dma_semaphore, #tpu.memory_space<semaphore_mem>> -> memref<1x!tpu.dma_semaphore, #tpu.memory_space<semaphore_mem>>
    %3 = tpu.memref_squeeze %2 : memref<1x!tpu.dma_semaphore, #tpu.memory_space<semaphore_mem>> -> memref<!tpu.dma_semaphore, #tpu.memory_space<semaphore_mem>>
    tpu.enqueue_dma source(%arg6 : memref<256x512xf32, #tpu.memory_space<any>>) target(%arg13 : memref<256x512xf32, #tpu.memory_space<vmem>>) target_semaphore(%3 : memref<!tpu.dma_semaphore, #tpu.memory_space<semaphore_mem>>)
    %c0 = arith.constant 0 : index
    %c0_0 = arith.constant 0 : index
    %4 = vector.load %arg1[%c0, %c0_0] : memref<64x16xf32, #tpu.memory_space<vmem>>, vector<64x16xf32>
    %c0_1 = arith.constant 0 : index
    %c0_2 = arith.constant 0 : index
    %5 = vector.load %arg2[%c0_1, %c0_2] : memref<16x1024xf32, #tpu.memory_space<vmem>>, vector<16x1024xf32>
    %cst = arith.constant dense<0.000000e+00> : vector<64x1024xf32>
    %6 = tpu.matmul %4, %5, %cst {dimension_numbers = #tpu.dot_dimension_numbers<[1], [0], [0], [1], [0, 0, 1, 1], [], []>} : vector<64x16xf32>, vector<16x1024xf32>, vector<64x1024xf32> -> vector<64x1024xf32>
    %c0_3 = arith.constant 0 : index
    %c0_4 = arith.constant 0 : index
    %7 = vector.load %arg3[%c0_3, %c0_4] : memref<1x1024xf32, #tpu.memory_space<vmem>>, vector<1x1024xf32>
    %8 = vector.broadcast %7 : vector<1x1024xf32> to vector<64x1024xf32>
    %9 = arith.addf %6, %8 : vector<64x1024xf32>
    %c0_5 = arith.constant 0 : index
    %c0_6 = arith.constant 0 : index
    %10 = vector.load %arg10[%c0_5, %c0_6] : memref<64x1024xf32, #tpu.memory_space<vmem>>, vector<64x1024xf32>
    tpu.vector_store %arg10[%c0_5, %c0_6], %9 {strides = array<i32>} : memref<64x1024xf32, #tpu.memory_space<vmem>>, vector<64x1024xf32>,
    %c0_i32_7 = arith.constant 0 : i32
    %11 = tpu.memref_slice %arg14[%c0_i32_7] : memref<2x!tpu.dma_semaphore, #tpu.memory_space<semaphore_mem>> -> memref<1x!tpu.dma_semaphore, #tpu.memory_space<semaphore_mem>>
    %12 = tpu.memref_squeeze %11 : memref<1x!tpu.dma_semaphore, #tpu.memory_space<semaphore_mem>> -> memref<!tpu.dma_semaphore, #tpu.memory_space<semaphore_mem>>
    tpu.wait_dma2 semaphore(%12 : memref<!tpu.dma_semaphore, #tpu.memory_space<semaphore_mem>>) src(%arg5 : memref<256x1024xf32, #tpu.memory_space<any>>) dst(%arg12 : memref<256x1024xf32, #tpu.memory_space<vmem>>)
    %c0_8 = arith.constant 0 : index
    %c0_9 = arith.constant 0 : index
    %13 = vector.load %arg12[%c0_8, %c0_9] : memref<256x1024xf32, #tpu.memory_space<vmem>>, vector<256x1024xf32>
    %cst_10 = arith.constant 0.000000e+00 : f32
    %14 = vector.broadcast %cst_10 : f32 to vector<8x256xf32>
    %cst_11 = arith.constant 0.000000e+00 : f32
    %15 = vector.broadcast %cst_11 : f32 to vector<8x256xf32>
    %c0_12 = arith.constant 0 : index
    %c0_13 = arith.constant 0 : index
    %16 = vector.load %arg10[%c0_12, %c0_13] : memref<64x1024xf32, #tpu.memory_space<vmem>>, vector<8x1024xf32>
    %cst_14 = arith.constant dense<0.000000e+00> : vector<8x1024xf32>
    %17 = tpu.matmul %14, %13, %cst_14 {dimension_numbers = #tpu.dot_dimension_numbers<[1], [0], [0], [1], [0, 0, 1, 1], [], []>} : vector<8x256xf32>, vector<256x1024xf32>, vector<8x1024xf32> -> vector<8x1024xf32>
    %18 = arith.addf %16, %17 : vector<8x1024xf32>
    %19 = vector.extract_strided_slice %18 {offsets = [0, 0], sizes = [8, 768], strides = [1, 1]} : vector<8x1024xf32> to vector<8x768xf32>
    %20 = arith.negf %19 : vector<8x768xf32>
    %21 = math.exp %20 : vector<8x768xf32>
    %cst_15 = arith.constant 1.000000e+00 : f32
    %22 = vector.broadcast %cst_15 : f32 to vector<8x768xf32>
    %23 = arith.addf %22, %21 : vector<8x768xf32>
    %24 = arith.divf %22, %23 : vector<8x768xf32>
    %25 = vector.extract_strided_slice %24 {offsets = [0, 0], sizes = [8, 256], strides = [1, 1]} : vector<8x768xf32> to vector<8x256xf32>
    %26 = vector.extract_strided_slice %24 {offsets = [0, 256], sizes = [8, 256], strides = [1, 1]} : vector<8x768xf32> to vector<8x256xf32>
    %27 = vector.extract_strided_slice %24 {offsets = [0, 512], sizes = [8, 256], strides = [1, 1]} : vector<8x768xf32> to vector<8x256xf32>
    %28 = vector.extract_strided_slice %18 {offsets = [0, 768], sizes = [8, 256], strides = [1, 1]} : vector<8x1024xf32> to vector<8x256xf32>
    %29 = math.tanh %28 : vector<8x256xf32>
    %30 = arith.mulf %26, %15 : vector<8x256xf32>
    %31 = arith.mulf %25, %29 : vector<8x256xf32>
    %32 = arith.addf %30, %31 : vector<8x256xf32>
    %33 = math.tanh %32 : vector<8x256xf32>
    %34 = arith.mulf %27, %33 : vector<8x256xf32>
    %c0_16 = arith.constant 0 : index
    %c0_17 = arith.constant 0 : index
    %35 = vector.load %arg11[%c0_16, %c0_17] : memref<64x256xf32, #tpu.memory_space<vmem>>, vector<8x256xf32>
    tpu.vector_store %arg11[%c0_16, %c0_17], %34 {strides = array<i32>} : memref<64x256xf32, #tpu.memory_space<vmem>>, vector<8x256xf32>,
    %c8 = arith.constant 8 : index
    %c0_18 = arith.constant 0 : index
    %36 = vector.load %arg10[%c8, %c0_18] : memref<64x1024xf32, #tpu.memory_space<vmem>>, vector<8x1024xf32>
    %cst_19 = arith.constant dense<0.000000e+00> : vector<8x1024xf32>
    %37 = tpu.matmul %34, %13, %cst_19 {dimension_numbers = #tpu.dot_dimension_numbers<[1], [0], [0], [1], [0, 0, 1, 1], [], []>} : vector<8x256xf32>, vector<256x1024xf32>, vector<8x1024xf32> -> vector<8x1024xf32>
    %38 = arith.addf %36, %37 : vector<8x1024xf32>
    %39 = vector.extract_strided_slice %38 {offsets = [0, 0], sizes = [8, 768], strides = [1, 1]} : vector<8x1024xf32> to vector<8x768xf32>
    %40 = arith.negf %39 : vector<8x768xf32>
    %41 = math.exp %40 : vector<8x768xf32>
    %cst_20 = arith.constant 1.000000e+00 : f32
    %42 = vector.broadcast %cst_20 : f32 to vector<8x768xf32>
    %43 = arith.addf %42, %41 : vector<8x768xf32>
    %44 = arith.divf %42, %43 : vector<8x768xf32>
    %45 = vector.extract_strided_slice %44 {offsets = [0, 0], sizes = [8, 256], strides = [1, 1]} : vector<8x768xf32> to vector<8x256xf32>
    %46 = vector.extract_strided_slice %44 {offsets = [0, 256], sizes = [8, 256], strides = [1, 1]} : vector<8x768xf32> to vector<8x256xf32>
    %47 = vector.extract_strided_slice %44 {offsets = [0, 512], sizes = [8, 256], strides = [1, 1]} : vector<8x768xf32> to vector<8x256xf32>
    %48 = vector.extract_strided_slice %38 {offsets = [0, 768], sizes = [8, 256], strides = [1, 1]} : vector<8x1024xf32> to vector<8x256xf32>
    %49 = math.tanh %48 : vector<8x256xf32>
    %50 = arith.mulf %46, %32 : vector<8x256xf32>
    %51 = arith.mulf %45, %49 : vector<8x256xf32>
    %52 = arith.addf %50, %51 : vector<8x256xf32>
    %53 = math.tanh %52 : vector<8x256xf32>
    %54 = arith.mulf %47, %53 : vector<8x256xf32>
    %c8_21 = arith.constant 8 : index
    %c0_22 = arith.constant 0 : index
    %55 = vector.load %arg11[%c8_21, %c0_22] : memref<64x256xf32, #tpu.memory_space<vmem>>, vector<8x256xf32>
    tpu.vector_store %arg11[%c8_21, %c0_22], %54 {strides = array<i32>} : memref<64x256xf32, #tpu.memory_space<vmem>>, vector<8x256xf32>,
    %c16 = arith.constant 16 : index
    %c0_23 = arith.constant 0 : index
    %56 = vector.load %arg10[%c16, %c0_23] : memref<64x1024xf32, #tpu.memory_space<vmem>>, vector<8x1024xf32>
    %cst_24 = arith.constant dense<0.000000e+00> : vector<8x1024xf32>
    %57 = tpu.matmul %54, %13, %cst_24 {dimension_numbers = #tpu.dot_dimension_numbers<[1], [0], [0], [1], [0, 0, 1, 1], [], []>} : vector<8x256xf32>, vector<256x1024xf32>, vector<8x1024xf32> -> vector<8x1024xf32>
    %58 = arith.addf %56, %57 : vector<8x1024xf32>
    %59 = vector.extract_strided_slice %58 {offsets = [0, 0], sizes = [8, 768], strides = [1, 1]} : vector<8x1024xf32> to vector<8x768xf32>
    %60 = arith.negf %59 : vector<8x768xf32>
    %61 = math.exp %60 : vector<8x768xf32>
    %cst_25 = arith.constant 1.000000e+00 : f32
    %62 = vector.broadcast %cst_25 : f32 to vector<8x768xf32>
    %63 = arith.addf %62, %61 : vector<8x768xf32>
    %64 = arith.divf %62, %63 : vector<8x768xf32>
    %65 = vector.extract_strided_slice %64 {offsets = [0, 0], sizes = [8, 256], strides = [1, 1]} : vector<8x768xf32> to vector<8x256xf32>
    %66 = vector.extract_strided_slice %64 {offsets = [0, 256], sizes = [8, 256], strides = [1, 1]} : vector<8x768xf32> to vector<8x256xf32>
    %67 = vector.extract_strided_slice %64 {offsets = [0, 512], sizes = [8, 256], strides = [1, 1]} : vector<8x768xf32> to vector<8x256xf32>
    %68 = vector.extract_strided_slice %58 {offsets = [0, 768], sizes = [8, 256], strides = [1, 1]} : vector<8x1024xf32> to vector<8x256xf32>
    %69 = math.tanh %68 : vector<8x256xf32>
    %70 = arith.mulf %66, %52 : vector<8x256xf32>
    %71 = arith.mulf %65, %69 : vector<8x256xf32>
    %72 = arith.addf %70, %71 : vector<8x256xf32>
    %73 = math.tanh %72 : vector<8x256xf32>
    %74 = arith.mulf %67, %73 : vector<8x256xf32>
    %c16_26 = arith.constant 16 : index
    %c0_27 = arith.constant 0 : index
    %75 = vector.load %arg11[%c16_26, %c0_27] : memref<64x256xf32, #tpu.memory_space<vmem>>, vector<8x256xf32>
    tpu.vector_store %arg11[%c16_26, %c0_27], %74 {strides = array<i32>} : memref<64x256xf32, #tpu.memory_space<vmem>>, vector<8x256xf32>,
    %c24 = arith.constant 24 : index
    %c0_28 = arith.constant 0 : index
    %76 = vector.load %arg10[%c24, %c0_28] : memref<64x1024xf32, #tpu.memory_space<vmem>>, vector<8x1024xf32>
    %cst_29 = arith.constant dense<0.000000e+00> : vector<8x1024xf32>
    %77 = tpu.matmul %74, %13, %cst_29 {dimension_numbers = #tpu.dot_dimension_numbers<[1], [0], [0], [1], [0, 0, 1, 1], [], []>} : vector<8x256xf32>, vector<256x1024xf32>, vector<8x1024xf32> -> vector<8x1024xf32>
    %78 = arith.addf %76, %77 : vector<8x1024xf32>
    %79 = vector.extract_strided_slice %78 {offsets = [0, 0], sizes = [8, 768], strides = [1, 1]} : vector<8x1024xf32> to vector<8x768xf32>
    %80 = arith.negf %79 : vector<8x768xf32>
    %81 = math.exp %80 : vector<8x768xf32>
    %cst_30 = arith.constant 1.000000e+00 : f32
    %82 = vector.broadcast %cst_30 : f32 to vector<8x768xf32>
    %83 = arith.addf %82, %81 : vector<8x768xf32>
    %84 = arith.divf %82, %83 : vector<8x768xf32>
    %85 = vector.extract_strided_slice %84 {offsets = [0, 0], sizes = [8, 256], strides = [1, 1]} : vector<8x768xf32> to vector<8x256xf32>
    %86 = vector.extract_strided_slice %84 {offsets = [0, 256], sizes = [8, 256], strides = [1, 1]} : vector<8x768xf32> to vector<8x256xf32>
    %87 = vector.extract_strided_slice %84 {offsets = [0, 512], sizes = [8, 256], strides = [1, 1]} : vector<8x768xf32> to vector<8x256xf32>
    %88 = vector.extract_strided_slice %78 {offsets = [0, 768], sizes = [8, 256], strides = [1, 1]} : vector<8x1024xf32> to vector<8x256xf32>
    %89 = math.tanh %88 : vector<8x256xf32>
    %90 = arith.mulf %86, %72 : vector<8x256xf32>
    %91 = arith.mulf %85, %89 : vector<8x256xf32>
    %92 = arith.addf %90, %91 : vector<8x256xf32>
    %93 = math.tanh %92 : vector<8x256xf32>
    %94 = arith.mulf %87, %93 : vector<8x256xf32>
    %c24_31 = arith.constant 24 : index
    %c0_32 = arith.constant 0 : index
    %95 = vector.load %arg11[%c24_31, %c0_32] : memref<64x256xf32, #tpu.memory_space<vmem>>, vector<8x256xf32>
    tpu.vector_store %arg11[%c24_31, %c0_32], %94 {strides = array<i32>} : memref<64x256xf32, #tpu.memory_space<vmem>>, vector<8x256xf32>,
    %c32 = arith.constant 32 : index
    %c0_33 = arith.constant 0 : index
    %96 = vector.load %arg10[%c32, %c0_33] : memref<64x1024xf32, #tpu.memory_space<vmem>>, vector<8x1024xf32>
    %cst_34 = arith.constant dense<0.000000e+00> : vector<8x1024xf32>
    %97 = tpu.matmul %94, %13, %cst_34 {dimension_numbers = #tpu.dot_dimension_numbers<[1], [0], [0], [1], [0, 0, 1, 1], [], []>} : vector<8x256xf32>, vector<256x1024xf32>, vector<8x1024xf32> -> vector<8x1024xf32>
    %98 = arith.addf %96, %97 : vector<8x1024xf32>
    %99 = vector.extract_strided_slice %98 {offsets = [0, 0], sizes = [8, 768], strides = [1, 1]} : vector<8x1024xf32> to vector<8x768xf32>
    %100 = arith.negf %99 : vector<8x768xf32>
    %101 = math.exp %100 : vector<8x768xf32>
    %cst_35 = arith.constant 1.000000e+00 : f32
    %102 = vector.broadcast %cst_35 : f32 to vector<8x768xf32>
    %103 = arith.addf %102, %101 : vector<8x768xf32>
    %104 = arith.divf %102, %103 : vector<8x768xf32>
    %105 = vector.extract_strided_slice %104 {offsets = [0, 0], sizes = [8, 256], strides = [1, 1]} : vector<8x768xf32> to vector<8x256xf32>
    %106 = vector.extract_strided_slice %104 {offsets = [0, 256], sizes = [8, 256], strides = [1, 1]} : vector<8x768xf32> to vector<8x256xf32>
    %107 = vector.extract_strided_slice %104 {offsets = [0, 512], sizes = [8, 256], strides = [1, 1]} : vector<8x768xf32> to vector<8x256xf32>
    %108 = vector.extract_strided_slice %98 {offsets = [0, 768], sizes = [8, 256], strides = [1, 1]} : vector<8x1024xf32> to vector<8x256xf32>
    %109 = math.tanh %108 : vector<8x256xf32>
    %110 = arith.mulf %106, %92 : vector<8x256xf32>
    %111 = arith.mulf %105, %109 : vector<8x256xf32>
    %112 = arith.addf %110, %111 : vector<8x256xf32>
    %113 = math.tanh %112 : vector<8x256xf32>
    %114 = arith.mulf %107, %113 : vector<8x256xf32>
    %c32_36 = arith.constant 32 : index
    %c0_37 = arith.constant 0 : index
    %115 = vector.load %arg11[%c32_36, %c0_37] : memref<64x256xf32, #tpu.memory_space<vmem>>, vector<8x256xf32>
    tpu.vector_store %arg11[%c32_36, %c0_37], %114 {strides = array<i32>} : memref<64x256xf32, #tpu.memory_space<vmem>>, vector<8x256xf32>,
    %c40 = arith.constant 40 : index
    %c0_38 = arith.constant 0 : index
    %116 = vector.load %arg10[%c40, %c0_38] : memref<64x1024xf32, #tpu.memory_space<vmem>>, vector<8x1024xf32>
    %cst_39 = arith.constant dense<0.000000e+00> : vector<8x1024xf32>
    %117 = tpu.matmul %114, %13, %cst_39 {dimension_numbers = #tpu.dot_dimension_numbers<[1], [0], [0], [1], [0, 0, 1, 1], [], []>} : vector<8x256xf32>, vector<256x1024xf32>, vector<8x1024xf32> -> vector<8x1024xf32>
    %118 = arith.addf %116, %117 : vector<8x1024xf32>
    %119 = vector.extract_strided_slice %118 {offsets = [0, 0], sizes = [8, 768], strides = [1, 1]} : vector<8x1024xf32> to vector<8x768xf32>
    %120 = arith.negf %119 : vector<8x768xf32>
    %121 = math.exp %120 : vector<8x768xf32>
    %cst_40 = arith.constant 1.000000e+00 : f32
    %122 = vector.broadcast %cst_40 : f32 to vector<8x768xf32>
    %123 = arith.addf %122, %121 : vector<8x768xf32>
    %124 = arith.divf %122, %123 : vector<8x768xf32>
    %125 = vector.extract_strided_slice %124 {offsets = [0, 0], sizes = [8, 256], strides = [1, 1]} : vector<8x768xf32> to vector<8x256xf32>
    %126 = vector.extract_strided_slice %124 {offsets = [0, 256], sizes = [8, 256], strides = [1, 1]} : vector<8x768xf32> to vector<8x256xf32>
    %127 = vector.extract_strided_slice %124 {offsets = [0, 512], sizes = [8, 256], strides = [1, 1]} : vector<8x768xf32> to vector<8x256xf32>
    %128 = vector.extract_strided_slice %118 {offsets = [0, 768], sizes = [8, 256], strides = [1, 1]} : vector<8x1024xf32> to vector<8x256xf32>
    %129 = math.tanh %128 : vector<8x256xf32>
    %130 = arith.mulf %126, %112 : vector<8x256xf32>
    %131 = arith.mulf %125, %129 : vector<8x256xf32>
    %132 = arith.addf %130, %131 : vector<8x256xf32>
    %133 = math.tanh %132 : vector<8x256xf32>
    %134 = arith.mulf %127, %133 : vector<8x256xf32>
    %c40_41 = arith.constant 40 : index
    %c0_42 = arith.constant 0 : index
    %135 = vector.load %arg11[%c40_41, %c0_42] : memref<64x256xf32, #tpu.memory_space<vmem>>, vector<8x256xf32>
    tpu.vector_store %arg11[%c40_41, %c0_42], %134 {strides = array<i32>} : memref<64x256xf32, #tpu.memory_space<vmem>>, vector<8x256xf32>,
    %c48 = arith.constant 48 : index
    %c0_43 = arith.constant 0 : index
    %136 = vector.load %arg10[%c48, %c0_43] : memref<64x1024xf32, #tpu.memory_space<vmem>>, vector<8x1024xf32>
    %cst_44 = arith.constant dense<0.000000e+00> : vector<8x1024xf32>
    %137 = tpu.matmul %134, %13, %cst_44 {dimension_numbers = #tpu.dot_dimension_numbers<[1], [0], [0], [1], [0, 0, 1, 1], [], []>} : vector<8x256xf32>, vector<256x1024xf32>, vector<8x1024xf32> -> vector<8x1024xf32>
    %138 = arith.addf %136, %137 : vector<8x1024xf32>
    %139 = vector.extract_strided_slice %138 {offsets = [0, 0], sizes = [8, 768], strides = [1, 1]} : vector<8x1024xf32> to vector<8x768xf32>
    %140 = arith.negf %139 : vector<8x768xf32>
    %141 = math.exp %140 : vector<8x768xf32>
    %cst_45 = arith.constant 1.000000e+00 : f32
    %142 = vector.broadcast %cst_45 : f32 to vector<8x768xf32>
    %143 = arith.addf %142, %141 : vector<8x768xf32>
    %144 = arith.divf %142, %143 : vector<8x768xf32>
    %145 = vector.extract_strided_slice %144 {offsets = [0, 0], sizes = [8, 256], strides = [1, 1]} : vector<8x768xf32> to vector<8x256xf32>
    %146 = vector.extract_strided_slice %144 {offsets = [0, 256], sizes = [8, 256], strides = [1, 1]} : vector<8x768xf32> to vector<8x256xf32>
    %147 = vector.extract_strided_slice %144 {offsets = [0, 512], sizes = [8, 256], strides = [1, 1]} : vector<8x768xf32> to vector<8x256xf32>
    %148 = vector.extract_strided_slice %138 {offsets = [0, 768], sizes = [8, 256], strides = [1, 1]} : vector<8x1024xf32> to vector<8x256xf32>
    %149 = math.tanh %148 : vector<8x256xf32>
    %150 = arith.mulf %146, %132 : vector<8x256xf32>
    %151 = arith.mulf %145, %149 : vector<8x256xf32>
    %152 = arith.addf %150, %151 : vector<8x256xf32>
    %153 = math.tanh %152 : vector<8x256xf32>
    %154 = arith.mulf %147, %153 : vector<8x256xf32>
    %c48_46 = arith.constant 48 : index
    %c0_47 = arith.constant 0 : index
    %155 = vector.load %arg11[%c48_46, %c0_47] : memref<64x256xf32, #tpu.memory_space<vmem>>, vector<8x256xf32>
    tpu.vector_store %arg11[%c48_46, %c0_47], %154 {strides = array<i32>} : memref<64x256xf32, #tpu.memory_space<vmem>>, vector<8x256xf32>,
    %c56 = arith.constant 56 : index
    %c0_48 = arith.constant 0 : index
    %156 = vector.load %arg10[%c56, %c0_48] : memref<64x1024xf32, #tpu.memory_space<vmem>>, vector<8x1024xf32>
    %cst_49 = arith.constant dense<0.000000e+00> : vector<8x1024xf32>
    %157 = tpu.matmul %154, %13, %cst_49 {dimension_numbers = #tpu.dot_dimension_numbers<[1], [0], [0], [1], [0, 0, 1, 1], [], []>} : vector<8x256xf32>, vector<256x1024xf32>, vector<8x1024xf32> -> vector<8x1024xf32>
    %158 = arith.addf %156, %157 : vector<8x1024xf32>
    %159 = vector.extract_strided_slice %158 {offsets = [0, 0], sizes = [8, 768], strides = [1, 1]} : vector<8x1024xf32> to vector<8x768xf32>
    %160 = arith.negf %159 : vector<8x768xf32>
    %161 = math.exp %160 : vector<8x768xf32>
    %cst_50 = arith.constant 1.000000e+00 : f32
    %162 = vector.broadcast %cst_50 : f32 to vector<8x768xf32>
    %163 = arith.addf %162, %161 : vector<8x768xf32>
    %164 = arith.divf %162, %163 : vector<8x768xf32>
    %165 = vector.extract_strided_slice %164 {offsets = [0, 0], sizes = [8, 256], strides = [1, 1]} : vector<8x768xf32> to vector<8x256xf32>
    %166 = vector.extract_strided_slice %164 {offsets = [0, 256], sizes = [8, 256], strides = [1, 1]} : vector<8x768xf32> to vector<8x256xf32>
    %167 = vector.extract_strided_slice %164 {offsets = [0, 512], sizes = [8, 256], strides = [1, 1]} : vector<8x768xf32> to vector<8x256xf32>
    %168 = vector.extract_strided_slice %158 {offsets = [0, 768], sizes = [8, 256], strides = [1, 1]} : vector<8x1024xf32> to vector<8x256xf32>
    %169 = math.tanh %168 : vector<8x256xf32>
    %170 = arith.mulf %166, %152 : vector<8x256xf32>
    %171 = arith.mulf %165, %169 : vector<8x256xf32>
    %172 = arith.addf %170, %171 : vector<8x256xf32>
    %173 = math.tanh %172 : vector<8x256xf32>
    %174 = arith.mulf %167, %173 : vector<8x256xf32>
    %c56_51 = arith.constant 56 : index
    %c0_52 = arith.constant 0 : index
    %175 = vector.load %arg11[%c56_51, %c0_52] : memref<64x256xf32, #tpu.memory_space<vmem>>, vector<8x256xf32>
    tpu.vector_store %arg11[%c56_51, %c0_52], %174 {strides = array<i32>} : memref<64x256xf32, #tpu.memory_space<vmem>>, vector<8x256xf32>,
    %c0_53 = arith.constant 0 : index
    %c0_54 = arith.constant 0 : index
    %176 = vector.load %arg8[%c0_53, %c0_54] : memref<8x256xf32, #tpu.memory_space<vmem>>, vector<8x256xf32>
    tpu.vector_store %arg8[%c0_53, %c0_54], %174 {strides = array<i32>} : memref<8x256xf32, #tpu.memory_space<vmem>>, vector<8x256xf32>,
    %c0_55 = arith.constant 0 : index
    %c0_56 = arith.constant 0 : index
    %177 = vector.load %arg9[%c0_55, %c0_56] : memref<8x256xf32, #tpu.memory_space<vmem>>, vector<8x256xf32>
    tpu.vector_store %arg9[%c0_55, %c0_56], %172 {strides = array<i32>} : memref<8x256xf32, #tpu.memory_space<vmem>>, vector<8x256xf32>,
    %c1_i32_57 = arith.constant 1 : i32
    %178 = tpu.memref_slice %arg14[%c1_i32_57] : memref<2x!tpu.dma_semaphore, #tpu.memory_space<semaphore_mem>> -> memref<1x!tpu.dma_semaphore, #tpu.memory_space<semaphore_mem>>
    %179 = tpu.memref_squeeze %178 : memref<1x!tpu.dma_semaphore, #tpu.memory_space<semaphore_mem>> -> memref<!tpu.dma_semaphore, #tpu.memory_space<semaphore_mem>>
    tpu.wait_dma2 semaphore(%179 : memref<!tpu.dma_semaphore, #tpu.memory_space<semaphore_mem>>) src(%arg6 : memref<256x512xf32, #tpu.memory_space<any>>) dst(%arg13 : memref<256x512xf32, #tpu.memory_space<vmem>>)
    %c0_58 = arith.constant 0 : index
    %c0_59 = arith.constant 0 : index
    %180 = vector.load %arg11[%c0_58, %c0_59] : memref<64x256xf32, #tpu.memory_space<vmem>>, vector<64x256xf32>
    %c0_60 = arith.constant 0 : index
    %c0_61 = arith.constant 0 : index
    %181 = vector.load %arg13[%c0_60, %c0_61] : memref<256x512xf32, #tpu.memory_space<vmem>>, vector<256x512xf32>
    %cst_62 = arith.constant dense<0.000000e+00> : vector<64x512xf32>
    %182 = tpu.matmul %180, %181, %cst_62 {dimension_numbers = #tpu.dot_dimension_numbers<[1], [0], [0], [1], [0, 0, 1, 1], [], []>} : vector<64x256xf32>, vector<256x512xf32>, vector<64x512xf32> -> vector<64x512xf32>
    %c0_63 = arith.constant 0 : index
    %c0_64 = arith.constant 0 : index
    %183 = vector.load %arg4[%c0_63, %c0_64] : memref<1x512xf32, #tpu.memory_space<vmem>>, vector<1x512xf32>
    %184 = vector.broadcast %183 : vector<1x512xf32> to vector<64x512xf32>
    %185 = arith.addf %182, %184 : vector<64x512xf32>
    %c0_65 = arith.constant 0 : index
    %c0_66 = arith.constant 0 : index
    %186 = vector.load %arg7[%c0_65, %c0_66] : memref<64x512xf32, #tpu.memory_space<vmem>>, vector<64x512xf32>
    tpu.vector_store %arg7[%c0_65, %c0_66], %185 {strides = array<i32>} : memref<64x512xf32, #tpu.memory_space<vmem>>, vector<64x512xf32>,
    return
  }
  func.func @transform_0(%arg0: i32) -> (i32, i32) {
    %c0_i32 = arith.constant 0 : i32
    %c0_i32_0 = arith.constant 0 : i32
    %c0_i32_1 = arith.constant 0 : i32
    return %c0_i32, %c0_i32_0 : i32, i32
  }
  func.func @transform_1(%arg0: i32) -> (i32, i32) {
    %c0_i32 = arith.constant 0 : i32
    %c0_i32_0 = arith.constant 0 : i32
    %c0_i32_1 = arith.constant 0 : i32
    return %c0_i32, %c0_i32_0 : i32, i32
  }
  func.func @transform_2(%arg0: i32) -> (i32, i32) {
    %c0_i32 = arith.constant 0 : i32
    %c0_i32_0 = arith.constant 0 : i32
    %c0_i32_1 = arith.constant 0 : i32
    return %c0_i32, %c0_i32_0 : i32, i32
  }
  func.func @transform_3(%arg0: i32) -> (i32, i32) {
    %c0_i32 = arith.constant 0 : i32
    %c0_i32_0 = arith.constant 0 : i32
    %c0_i32_1 = arith.constant 0 : i32
    return %c0_i32, %c0_i32_0 : i32, i32
  }
  func.func @transform_6(%arg0: i32) -> (i32, i32) {
    %c0_i32 = arith.constant 0 : i32
    %c0_i32_0 = arith.constant 0 : i32
    %c0_i32_1 = arith.constant 0 : i32
    return %c0_i32, %c0_i32_0 : i32, i32
  }
  func.func @transform_7(%arg0: i32) -> (i32, i32) {
    %c0_i32 = arith.constant 0 : i32
    %c0_i32_0 = arith.constant 0 : i32
    %c0_i32_1 = arith.constant 0 : i32
    return %c0_i32, %c0_i32_0 : i32, i32
  }
  func.func @transform_8(%arg0: i32) -> (i32, i32) {
    %c0_i32 = arith.constant 0 : i32
    %c0_i32_0 = arith.constant 0 : i32
    %c0_i32_1 = arith.constant 0 : i32
    return %c0_i32, %c0_i32_0 : i32, i32
  }
}

</mosaic_0001>

<bundles_post_ra>
// kernel: tpu_custom_call.1
= control target key start
LH: loop header
LB: loop body
LE: loop exit
PB: predicated region body
PF: predicated region fallthrough
CT: control target
= control target key end

     0   :  { %14 = vsyncpa [#allocation8], 0  ;;  %s8868_s0 = inlined_call_operand.vmem [shape: f32[64,16], index: 0, kind: input, shape index: {}]   ;;  %s8869_s1 = inlined_call_operand.hbm [shape: f32[16,1024], index: 1, kind: input, shape index: {}]   ;;  %s8870_s2 = inlined_call_operand.vmem [shape: f32[1,1024], index: 2, kind: input, shape index: {}]   ;;  %s8871_s3 = inlined_call_operand.vmem [shape: f32[1,512], index: 3, kind: input, shape index: {}]   ;;  %s8872_s4 = inlined_call_operand.hbm [shape: f32[256,1024], index: 4, kind: input, shape index: {}]   ;;  %s8873_s5 = inlined_call_operand.hbm [shape: f32[256,512], index: 5, kind: input, shape index: {}]   ;;  %s8874_s6 = inlined_call_operand.hbm [shape: f32[64,512], index: 6, kind: output, shape index: {0}]   ;;  %s8875_s7 = inlined_call_operand.hbm [shape: f32[8,256], index: 7, kind: output, shape index: {1}]   ;;  %s8876_s8 = inlined_call_operand.hbm [shape: f32[8,256], index: 8, kind: output, shape index: {2}]  }
   0x1   :  { %15 = vsyncpa [#allocation9], 0 }
   0x2   :  { %16 = vsyncpa [#allocation12], 0  ;;  %s7027_s27 = smov [#allocation7]   ;;  %s6885_s9 = scalar_lea.hbm %s8869_s1, 2048 }
   0x3   :  { %s24_s28 = sshll.u32 %s7027_s27, 4  ;;  %p6886_p0 = scmp.ne.s32.totalorder %s8869_s1, %s6885_s9  ;;  %s25_s28 = int_to_ptr.vmem [resolvable:$true] %s24_s28 }
   0x4   :  { %p6889_p1 = scmp.lt.u32.totalorder %s6885_s9, %s8869_s1 }
   0x6   :  { %p6891_p2 = pnand %p6889_p1, %p6886_p0 }
   0x8   :  { %6894 = shalt.err (!%p6891_p2)
}
   0x9   :  { %s6895_s14 = scalar_lea.vmem %s25_s28, 2048  ;;  %p6900_p4 = scmp.lt.s32.totalorder %s25_s28, %s25_s28 }
   0xa   :  { %p6896_p3 = scmp.ne.s32.totalorder %s25_s28, %s6895_s14  ;;  %p6901_p5 = scmp.lt.s32.totalorder %s6895_s14, %s6895_s14 }
   0xc   :  { %p6902_p6 = por %p6901_p5, %p6900_p4 }
   0xe   :  { %p6903_p7 = pnand %p6902_p6, %p6896_p3 }
  0x10   :  { %6906 = shalt.err (!%p6903_p7)
}
  0x11   :  { %s7028_s15 = smov 1024   ;;  %s7029_s16 = smov 64  }
  0x12   :  { %30 = dma.hbm_to_vmem [thread:$0]  %s8869_s1, 2048, %s25_s28, [#allocation8], %s7028_s15, %s7028_s15, %s7029_s16  }
  0x13   :  { %7017 = dma.done.wait [#allocation8], 2048  }
  0x14   :  { %7018 = vsyncadd [#allocation8], 4294965248  ;;  %v87_v0 = vlaneseq  ;;  %v8881_v1 = vmov 0.0   ;;  %s7031_s19 = smov [#allocation4]   ;;  %s7032_s21 = smov [#allocation5]  }
  0x15   :  { %216 = vmatprep.mubr.f32.mxu0 %v8881_v1  ;;  %329 = vmatprep.mubr.f32.mxu1 %v8881_v1  ;;  %s45_s20 = sshll.u32 %s7031_s19, 4  ;;  %s57_s22 = sshll.u32 %s7032_s21, 4  ;;  %s46_s20 = int_to_ptr.vmem [resolvable:$true] %s45_s20  ;;  %s7099_s22 = int_to_ptr.vmem [resolvable:$true] %s57_s22 }
  0x16   :  { %v7097_v2 = vshrl.u32 %v87_v0, 7  ;;  %s6907_s1 = scalar_lea.hbm %s8872_s4, 32768 }
  0x17   :  { %p6908_p8 = scmp.ne.s32.totalorder %s8872_s4, %s6907_s1  ;;  %p6911_p9 = scmp.lt.u32.totalorder %s6907_s1, %s8872_s4 }
  0x18   :  { %9185 = vst [vmem:[#allocation25_spill] sm:$0xff] %v7097_v2 }
  0x19   :  { %p6913_p10 = pnand %p6911_p9, %p6908_p8 }
  0x1b   :  { %6916 = shalt.err (!%p6913_p10)  }
  0x1c   :  { %s6917_s29 = scalar_lea.vmem %s46_s20, 32768  ;;  %p6922_p12 = scmp.lt.s32.totalorder %s46_s20, %s46_s20 }
  0x1d   :  { %p6918_p11 = scmp.ne.s32.totalorder %s46_s20, %s6917_s29  ;;  %p6923_p13 = scmp.lt.s32.totalorder %s6917_s29, %s6917_s29 }
  0x1f   :  { %p6924_p0 = por %p6923_p13, %p6922_p12 }
  0x21   :  { %p6925_p1 = pnand %p6924_p0, %p6918_p11 }
  0x23   :  { %6928 = shalt.err (!%p6925_p1)  }
  0x24   :  { %48 = dma.hbm_to_vmem [thread:$0]  %s8872_s4, 32768, %s46_s20, [#allocation6]  ;;  %v8880_v3 = vsub.s32 0, %v7097_v2  ;;  %v8878_v4 = vsub.s32 1, %v7097_v2  ;;  %v8879_v5 = vsub.s32 2, %v7097_v2  ;;  %v8877_v6 = vsub.s32 3, %v7097_v2 }
  0x25   :  { %s6929_s12 = scalar_lea.hbm %s8873_s5, 16384 }
  0x26   :  { %p6930_p2 = scmp.ne.s32.totalorder %s8873_s5, %s6929_s12  ;;  %p6933_p3 = scmp.lt.u32.totalorder %s6929_s12, %s8873_s5 }
  0x28   :  { %p6935_p4 = pnand %p6933_p3, %p6930_p2 }
  0x2a   :  { %6938 = shalt.err (!%p6935_p4)  }
  0x2b   :  { %s6939_s4 = scalar_lea.vmem %s7099_s22, 16384  ;;  %p6944_p6 = scmp.lt.s32.totalorder %s7099_s22, %s7099_s22 }
  0x2c   :  { %p6940_p5 = scmp.ne.s32.totalorder %s7099_s22, %s6939_s4  ;;  %p6945_p7 = scmp.lt.s32.totalorder %s6939_s4, %s6939_s4 }
  0x2e   :  { %p6946_p8 = por %p6945_p7, %p6944_p6 }
  0x30   :  { %p6947_p9 = pnand %p6946_p8, %p6940_p5 }
  0x32   :  { %6950 = shalt.err (!%p6947_p9)  }
  0x33   :  { %60 = dma.hbm_to_vmem [thread:$0]  %s8873_s5, 16384, %s7099_s22, [#allocation6 + $0x1]  ;;  %v105_v7 = vsub.s32 4, %v7097_v2  ;;  %v109_v8 = vsub.s32 5, %v7097_v2  ;;  %v113_v9 = vsub.s32 6, %v7097_v2  ;;  %v117_v10 = vsub.s32 7, %v7097_v2 }
  0x34   :  { %v85_v11 = vld [vmem:[%s8870_s2] sm:$0xff]  ;;  %v70_v12 = vld [vmem:[#allocation7 + $0x8] sm:$0xff]  ;;  %v72_v18 = vld [vmem:[#allocation7 + $0x18] sm:$0xff]  ;;  %vm127_vm0 = vcmask 130048  }
  0x35   :  { %v78_v13 = vld [vmem:[#allocation7 + $0x48] sm:$0xff]  ;;  %v7143_v14 = vrot.slane %v85_v11, %v8880_v3  ;;  %v7147_v15 = vrot.slane %v85_v11, %v8878_v4  ;;  %v7151_v16 = vrot.slane %v85_v11, %v8879_v5  ;;  %v7155_v17 = vrot.slane %v85_v11, %v8877_v6  ;;  %v80_v19 = vld [vmem:[#allocation7 + $0x58] sm:$0xff]  ;;  %v69_v20 = vld [vmem:[#allocation7] sm:$0xff] }
  0x36   :  { %v7157_v21 = vrot.slane %v85_v11, %v105_v7  ;;  %v7159_v22 = vrot.slane %v85_v11, %v109_v8  ;;  %v7161_v23 = vrot.slane %v85_v11, %v113_v9  ;;  %v7163_v24 = vrot.slane %v85_v11, %v117_v10  ;;  %v77_v25 = vld [vmem:[#allocation7 + $0x40] sm:$0xff]  ;;  %v71_v26 = vld [vmem:[#allocation7 + $0x10] sm:$0xff]  ;;  %v74_v32 = vld [vmem:[#allocation7 + $0x28] sm:$0xff] }
  0x37   :  { %9186 = vst [vmem:[#allocation26_spill] sm:$0xff] %v7143_v14  ;;  %9187 = vst [vmem:[#allocation27_spill] sm:$0xff] %v7147_v15  ;;  %v79_v27 = vld [vmem:[#allocation7 + $0x50] sm:$0xff]  ;;  %v4298_v28 = vpack.c.bf16 %v78_v13, %v70_v12  ;;  %v4302_v29 = vpack.c.bf16 %v80_v19, %v72_v18  ;;  %v4300_v30 = vpack.c.bf16 %v77_v25, %v69_v20  ;;  %v82_v33 = vld [vmem:[#allocation7 + $0x68] sm:$0xff] }
  0x38   :  { %9188 = vst [vmem:[#allocation28_spill] sm:$0xff] %v7151_v16  ;;  %9189 = vst [vmem:[#allocation29_spill] sm:$0xff] %v7155_v17  ;;  %v4304_v31 = vpack.c.bf16 %v79_v27, %v71_v26  ;;  %v76_v34 = vld [vmem:[#allocation7 + $0x38] sm:$0xff]  ;;  %v4306_v35 = vpack.c.bf16 %v82_v33, %v74_v32  ;;  %v73_v37 = vld [vmem:[#allocation7 + $0x20] sm:$0xff] }
  0x39   :  { %9190 = vst [vmem:[#allocation30_spill] sm:$0xff] %v7157_v21  ;;  %9191 = vst [vmem:[#allocation31_spill] sm:$0xff] %v7159_v22  ;;  %v84_v36 = vld [vmem:[#allocation7 + $0x78] sm:$0xff]  ;;  %4299 = vmatprep.subr.bf16.mxu0 %v4298_v28  ;;  %4303 = vmatprep.subr.bf16.mxu1 %v4302_v29  ;;  %v81_v39 = vld [vmem:[#allocation7 + $0x60] sm:$0xff] }
  0x3a   :  { %9192 = vst [vmem:[#allocation32_spill] sm:$0xff] %v7161_v23  ;;  %9193 = vst [vmem:[#allocation33_spill] sm:$0xff] %v7163_v24  ;;  %v4310_v38 = vpack.c.bf16 %v84_v36, %v76_v34  ;;  %v75_v40 = vld [vmem:[#allocation7 + $0x30] sm:$0xff]  ;;  %4301 = vmatpush1.bf16.msra.mxu0 %v4300_v30  ;;  %4305 = vmatpush1.bf16.msra.mxu1 %v4304_v31  ;;  %v61_v42 = vld [vmem:[%s8868_s0] sm:$0xff]  ;;  %v4308_v43 = vpack.c.bf16 %v81_v39, %v73_v37 }
  0x3b   :  { %v83_v41 = vld [vmem:[#allocation7 + $0x70] sm:$0xff]  ;;  %4307 = vmatprep.subr.bf16.mxu0 %v4306_v35  ;;  %v62_v45 = vld [vmem:[%s8868_s0 + $0x8] sm:$0xff]  ;;  %v64_v47 = vld [vmem:[%s8868_s0 + $0x18] sm:$0xff] }
  0x3c   :  { %v4312_v44 = vpack.c.bf16 %v83_v41, %v75_v40  ;;  %4311 = vmatprep.subr.bf16.mxu1 %v4310_v38  ;;  %v63_v46 = vld [vmem:[%s8868_s0 + $0x10] sm:$0xff]  ;;  %v65_v48 = vld [vmem:[%s8868_s0 + $0x20] sm:$0xff]  ;;  %v66_v49 = vld [vmem:[%s8868_s0 + $0x28] sm:$0xff] }
  0x3d   :  { %4216 = vmatmul.mubr.msk.f32.vlgmr.msra.gmra.mrb[0].mxu0 %vm127_vm0, %v61_v42  ;;  %4224 = vmatmul.mubr.msk.f32.vlgmr.msra.gmra.mrb[0].mxu1 %vm127_vm0, %v61_v42  ;;  %v67_v50 = vld [vmem:[%s8868_s0 + $0x30] sm:$0xff]  ;;  %v68_v51 = vld [vmem:[%s8868_s0 + $0x38] sm:$0xff] }
  0x3e   :  { %4309 = vmatpush1.bf16.msra.mxu0 %v4308_v43  ;;  %4313 = vmatpush1.bf16.msra.mxu1 %v4312_v44 }
  0x3f   :  { %222 = vmatprep.mubr.f32.mxu0 %v8881_v1  ;;  %335 = vmatprep.mubr.f32.mxu1 %v8881_v1 }
  0x41   :  { %4217 = vmatmul.mubr.msk.f32.gmra.mrb[2].mxu0 %vm127_vm0, %v62_v45  ;;  %4225 = vmatmul.mubr.msk.f32.gmra.mrb[2].mxu1 %vm127_vm0, %v62_v45 }
  0x42   :  { %228 = vmatprep.mubr.f32.mxu0 %v8881_v1  ;;  %341 = vmatprep.mubr.f32.mxu1 %v8881_v1 }
  0x45   :  { %4218 = vmatmul.mubr.msk.f32.gmra.mrb[4].mxu0 %vm127_vm0, %v63_v46  ;;  %4226 = vmatmul.mubr.msk.f32.gmra.mrb[4].mxu1 %vm127_vm0, %v63_v46 }
  0x46   :  { %234 = vmatprep.mubr.f32.mxu0 %v8881_v1  ;;  %347 = vmatprep.mubr.f32.mxu1 %v8881_v1 }
  0x49   :  { %4219 = vmatmul.mubr.msk.f32.gmra.mrb[6].mxu0 %vm127_vm0, %v64_v47  ;;  %4227 = vmatmul.mubr.msk.f32.gmra.mrb[6].mxu1 %vm127_vm0, %v64_v47 }
  0x4a   :  { %240 = vmatprep.mubr.f32.mxu0 %v8881_v1  ;;  %353 = vmatprep.mubr.f32.mxu1 %v8881_v1 }
  0x4d   :  { %4220 = vmatmul.mubr.msk.f32.gmra.mrb[8].mxu0 %vm127_vm0, %v65_v48  ;;  %4228 = vmatmul.mubr.msk.f32.gmra.mrb[8].mxu1 %vm127_vm0, %v65_v48 }
  0x4e   :  { %246 = vmatprep.mubr.f32.mxu0 %v8881_v1  ;;  %359 = vmatprep.mubr.f32.mxu1 %v8881_v1 }
  0x51   :  { %4221 = vmatmul.mubr.msk.f32.gmra.mrb[10].mxu0 %vm127_vm0, %v66_v49  ;;  %4229 = vmatmul.mubr.msk.f32.gmra.mrb[10].mxu1 %vm127_vm0, %v66_v49 }
  0x52   :  { %252 = vmatprep.mubr.f32.mxu0 %v8881_v1  ;;  %365 = vmatprep.mubr.f32.mxu1 %v8881_v1 }
  0x55   :  { %4222 = vmatmul.mubr.msk.f32.gmra.mrb[12].mxu0 %vm127_vm0, %v67_v50  ;;  %4230 = vmatmul.mubr.msk.f32.gmra.mrb[12].mxu1 %vm127_vm0, %v67_v50 }
  0x56   :  { %258 = vmatprep.mubr.f32.mxu0 %v8881_v1  ;;  %371 = vmatprep.mubr.f32.mxu1 %v8881_v1 }
  0x59   :  { %4223 = vmatmul.mubr.msk.f32.gmra.mrb[14].mxu0 %vm127_vm0, %v68_v51  ;;  %4231 = vmatmul.mubr.msk.f32.gmra.mrb[14].mxu1 %vm127_vm0, %v68_v51 }
  0x5a   :  { %442 = vmatprep.mubr.f32.mxu0 %v8881_v1  ;;  %555 = vmatprep.mubr.f32.mxu1 %v8881_v1 }
  0x5d   :  { %4232 = vmatmul.mubr.msk.f32.vlgmr.msra.gmra.mrb[16].mxu0 %vm127_vm0, %v61_v42  ;;  %4240 = vmatmul.mubr.msk.f32.vlgmr.msra.gmra.mrb[16].mxu1 %vm127_vm0, %v61_v42 }
  0x5e   :  { %448 = vmatprep.mubr.f32.mxu0 %v8881_v1  ;;  %561 = vmatprep.mubr.f32.mxu1 %v8881_v1 }
  0x61   :  { %4233 = vmatmul.mubr.msk.f32.gmra.mrb[18].mxu0 %vm127_vm0, %v62_v45  ;;  %4241 = vmatmul.mubr.msk.f32.gmra.mrb[18].mxu1 %vm127_vm0, %v62_v45 }
  0x62   :  { %454 = vmatprep.mubr.f32.mxu0 %v8881_v1  ;;  %567 = vmatprep.mubr.f32.mxu1 %v8881_v1 }
  0x65   :  { %4234 = vmatmul.mubr.msk.f32.gmra.mrb[20].mxu0 %vm127_vm0, %v63_v46  ;;  %4242 = vmatmul.mubr.msk.f32.gmra.mrb[20].mxu1 %vm127_vm0, %v63_v46 }
  0x66   :  { %460 = vmatprep.mubr.f32.mxu0 %v8881_v1  ;;  %573 = vmatprep.mubr.f32.mxu1 %v8881_v1 }
  0x69   :  { %4235 = vmatmul.mubr.msk.f32.gmra.mrb[22].mxu0 %vm127_vm0, %v64_v47  ;;  %4243 = vmatmul.mubr.msk.f32.gmra.mrb[22].mxu1 %vm127_vm0, %v64_v47 }
  0x6a   :  { %466 = vmatprep.mubr.f32.mxu0 %v8881_v1  ;;  %579 = vmatprep.mubr.f32.mxu1 %v8881_v1 }
  0x6d   :  { %4236 = vmatmul.mubr.msk.f32.gmra.mrb[24].mxu0 %vm127_vm0, %v65_v48  ;;  %4244 = vmatmul.mubr.msk.f32.gmra.mrb[24].mxu1 %vm127_vm0, %v65_v48 }
  0x6e   :  { %472 = vmatprep.mubr.f32.mxu0 %v8881_v1  ;;  %585 = vmatprep.mubr.f32.mxu1 %v8881_v1 }
  0x71   :  { %4237 = vmatmul.mubr.msk.f32.gmra.mrb[26].mxu0 %vm127_vm0, %v66_v49  ;;  %4245 = vmatmul.mubr.msk.f32.gmra.mrb[26].mxu1 %vm127_vm0, %v66_v49 }
  0x72   :  { %478 = vmatprep.mubr.f32.mxu0 %v8881_v1  ;;  %591 = vmatprep.mubr.f32.mxu1 %v8881_v1 }
  0x75   :  { %4238 = vmatmul.mubr.msk.f32.gmra.mrb[28].mxu0 %vm127_vm0, %v67_v50  ;;  %4246 = vmatmul.mubr.msk.f32.gmra.mrb[28].mxu1 %vm127_vm0, %v67_v50 }
  0x76   :  { %484 = vmatprep.mubr.f32.mxu0 %v8881_v1  ;;  %597 = vmatprep.mubr.f32.mxu1 %v8881_v1 }
  0x79   :  { %4239 = vmatmul.mubr.msk.f32.gmra.mrb[30].mxu0 %vm127_vm0, %v68_v51  ;;  %4247 = vmatmul.mubr.msk.f32.gmra.mrb[30].mxu1 %vm127_vm0, %v68_v51 }
  0x7a   :  { %7019 = dma.done.wait [#allocation6], 32768 }
  0x7b   :  { %7020 = vsyncadd [#allocation6], 4294934528  ;;  %1000 = vmatprep.mubr.f32.mxu0 %v8881_v1  ;;  %1071 = vmatprep.mubr.f32.mxu1 %v8881_v1  ;;  %v673_v52 = vld [vmem:[#allocation4 + $0x8] sm:$0xff]  ;;  %v675_v54 = vld [vmem:[#allocation4 + $0x18] sm:$0xff] }
  0x7c   :  { %v681_v53 = vld [vmem:[#allocation4 + $0x48] sm:$0xff]  ;;  %v683_v56 = vld [vmem:[#allocation4 + $0x58] sm:$0xff]  ;;  %v672_v57 = vld [vmem:[#allocation4] sm:$0xff] }
  0x7d   :  { %v7253_v55 = vpack.c.bf16 %v681_v53, %v673_v52  ;;  %v680_v58 = vld [vmem:[#allocation4 + $0x40] sm:$0xff]  ;;  %v7255_v59 = vpack.c.bf16 %v683_v56, %v675_v54  ;;  %v674_v61 = vld [vmem:[#allocation4 + $0x10] sm:$0xff]  ;;  %v689_v63 = vld [vmem:[#allocation4 + $0x88] sm:$0xff] }
  0x7e   :  { %v7257_v60 = vpack.c.bf16 %v680_v58, %v672_v57  ;;  %v682_v62 = vld [vmem:[#allocation4 + $0x50] sm:$0xff]  ;;  %v697_v7 = vld [vmem:[#allocation4 + $0xc8] sm:$0xff]  ;;  %v691_v8 = vld [vmem:[#allocation4 + $0x98] sm:$0xff] }
  0x7f   :  { %9194 = vst [vmem:[#allocation34_spill] sm:$0xff] %v7253_v55  ;;  %9195 = vst [vmem:[#allocation35_spill] sm:$0xff] %v7255_v59  ;;  %4315 = vmatprep.subr.bf16.mxu0 %v7253_v55  ;;  %v7260_v0 = vpack.c.bf16 %v682_v62, %v674_v61  ;;  %v699_v9 = vld [vmem:[#allocation4 + $0xd8] sm:$0xff]  ;;  %4379 = vmatprep.subr.bf16.mxu1 %v7255_v59  ;;  %v7264_v10 = vpack.c.bf16 %v697_v7, %v689_v63  ;;  %v688_v12 = vld [vmem:[#allocation4 + $0x80] sm:$0xff] }
  0x80   :  { %9196 = vst [vmem:[#allocation36_spill] sm:$0xff] %v7257_v60  ;;  %4317 = vmatpush1.bf16.msra.mxu0 %v7257_v60  ;;  %v7266_v11 = vpack.c.bf16 %v699_v9, %v691_v8  ;;  %v696_v13 = vld [vmem:[#allocation4 + $0xc0] sm:$0xff]  ;;  %v690_v18 = vld [vmem:[#allocation4 + $0x90] sm:$0xff]  ;;  %v705_v25 = vld [vmem:[#allocation4 + $0x108] sm:$0xff] }
  0x81   :  { %9197 = vst [vmem:[#allocation37_spill] sm:$0xff] %v7260_v0  ;;  %9198 = vst [vmem:[#allocation38_spill] sm:$0xff] %v7264_v10  ;;  %4381 = vmatpush1.bf16.msra.mxu1 %v7260_v0  ;;  %v7269_v19 = vpack.c.bf16 %v696_v13, %v688_v12  ;;  %v698_v20 = vld [vmem:[#allocation4 + $0xd0] sm:$0xff]  ;;  %v713_v26 = vld [vmem:[#allocation4 + $0x148] sm:$0xff]  ;;  %4319 = vmatprep.subr.bf16.mxu0 %v7264_v10 }
  0x82   :  { %9199 = vst [vmem:[#allocation39_spill] sm:$0xff] %v7266_v11  ;;  %4383 = vmatprep.subr.bf16.mxu1 %v7266_v11  ;;  %v7273_v27 = vpack.c.bf16 %v698_v20, %v690_v18  ;;  %v7275_v28 = vpack.c.bf16 %v713_v26, %v705_v25  ;;  %v707_v29 = vld [vmem:[#allocation4 + $0x118] sm:$0xff]  ;;  %v704_v31 = vld [vmem:[#allocation4 + $0x100] sm:$0xff]  ;;  %v706_v34 = vld [vmem:[#allocation4 + $0x110] sm:$0xff] }
  0x83   :  { %9200 = vst [vmem:[#allocation40_spill] sm:$0xff] %v7269_v19  ;;  %v715_v30 = vld [vmem:[#allocation4 + $0x158] sm:$0xff]  ;;  %v712_v33 = vld [vmem:[#allocation4 + $0x140] sm:$0xff]  ;;  %v714_v35 = vld [vmem:[#allocation4 + $0x150] sm:$0xff] }
  0x84   :  { %9201 = vst [vmem:[#allocation41_spill] sm:$0xff] %v7273_v27  ;;  %9202 = vst [vmem:[#allocation42_spill] sm:$0xff] %v7275_v28  ;;  %v7277_v32 = vpack.c.bf16 %v715_v30, %v707_v29  ;;  %4321 = vmatpush1.bf16.msra.mxu0 %v7269_v19  ;;  %v7280_v36 = vpack.c.bf16 %v712_v33, %v704_v31  ;;  %v721_v37 = vld [vmem:[#allocation4 + $0x188] sm:$0xff]  ;;  %v723_v39 = vld [vmem:[#allocation4 + $0x198] sm:$0xff]  ;;  %v7284_v40 = vpack.c.bf16 %v714_v35, %v706_v34 }
  0x85   :  { %v729_v38 = vld [vmem:[#allocation4 + $0x1c8] sm:$0xff]  ;;  %4385 = vmatpush1.bf16.msra.mxu1 %v7273_v27  ;;  %4323 = vmatprep.subr.bf16.mxu0 %v7275_v28  ;;  %v731_v42 = vld [vmem:[#allocation4 + $0x1d8] sm:$0xff]  ;;  %v720_v43 = vld [vmem:[#allocation4 + $0x180] sm:$0xff] }
  0x86   :  { %9203 = vst [vmem:[#allocation43_spill] sm:$0xff] %v7277_v32  ;;  %9204 = vst [vmem:[#allocation44_spill] sm:$0xff] %v7280_v36  ;;  %v7286_v41 = vpack.c.bf16 %v729_v38, %v721_v37  ;;  %v728_v44 = vld [vmem:[#allocation4 + $0x1c0] sm:$0xff]  ;;  %4387 = vmatprep.subr.bf16.mxu1 %v7277_v32  ;;  %v7289_v45 = vpack.c.bf16 %v731_v42, %v723_v39  ;;  %v722_v46 = vld [vmem:[#allocation4 + $0x190] sm:$0xff] }
  0x87   :  { %9205 = vst [vmem:[#allocation45_spill] sm:$0xff] %v7284_v40  ;;  %v730_v47 = vld [vmem:[#allocation4 + $0x1d0] sm:$0xff]  ;;  %v737_v48 = vld [vmem:[#allocation4 + $0x208] sm:$0xff]  ;;  %v739_v50 = vld [vmem:[#allocation4 + $0x218] sm:$0xff]  ;;  %v7292_v52 = vpack.c.bf16 %v728_v44, %v720_v43 }
  0x88   :  { %9206 = vst [vmem:[#allocation46_spill] sm:$0xff] %v7286_v41  ;;  %9207 = vst [vmem:[#allocation47_spill] sm:$0xff] %v7289_v45  ;;  %v745_v49 = vld [vmem:[#allocation4 + $0x248] sm:$0xff]  ;;  %v747_v51 = vld [vmem:[#allocation4 + $0x258] sm:$0xff]  ;;  %4325 = vmatpush1.bf16.msra.mxu0 %v7280_v36  ;;  %v7296_v53 = vpack.c.bf16 %v730_v47, %v722_v46 }
  0x89   :  { %9208 = vst [vmem:[#allocation48_spill] sm:$0xff] %v7292_v52  ;;  %4389 = vmatpush1.bf16.msra.mxu1 %v7284_v40  ;;  %4327 = vmatprep.subr.bf16.mxu0 %v7286_v41  ;;  %v7298_v54 = vpack.c.bf16 %v745_v49, %v737_v48  ;;  %v736_v56 = vld [vmem:[#allocation4 + $0x200] sm:$0xff]  ;;  %v738_v58 = vld [vmem:[#allocation4 + $0x210] sm:$0xff]  ;;  %v7301_v61 = vpack.c.bf16 %v747_v51, %v739_v50  ;;  %v753_v63 = vld [vmem:[#allocation4 + $0x288] sm:$0xff] }
  0x8a   :  { %9209 = vst [vmem:[#allocation49_spill] sm:$0xff] %v7296_v53  ;;  %v744_v57 = vld [vmem:[#allocation4 + $0x240] sm:$0xff]  ;;  %4391 = vmatprep.subr.bf16.mxu1 %v7289_v45  ;;  %v746_v62 = vld [vmem:[#allocation4 + $0x250] sm:$0xff]  ;;  %v761_v7 = vld [vmem:[#allocation4 + $0x2c8] sm:$0xff] }
  0x8b   :  { %9210 = vst [vmem:[#allocation50_spill] sm:$0xff] %v7298_v54  ;;  %9211 = vst [vmem:[#allocation51_spill] sm:$0xff] %v7301_v61  ;;  %v755_v8 = vld [vmem:[#allocation4 + $0x298] sm:$0xff]  ;;  %v7304_v12 = vpack.c.bf16 %v744_v57, %v736_v56  ;;  %v7308_v13 = vpack.c.bf16 %v746_v62, %v738_v58  ;;  %v7310_v18 = vpack.c.bf16 %v761_v7, %v753_v63  ;;  %v752_v20 = vld [vmem:[#allocation4 + $0x280] sm:$0xff] }
  0x8c   :  { %v763_v9 = vld [vmem:[#allocation4 + $0x2d8] sm:$0xff]  ;;  %4329 = vmatpush1.bf16.msra.mxu0 %v7292_v52  ;;  %v760_v25 = vld [vmem:[#allocation4 + $0x2c0] sm:$0xff]  ;;  %v754_v26 = vld [vmem:[#allocation4 + $0x290] sm:$0xff] }
  0x8d   :  { %9212 = vst [vmem:[#allocation52_spill] sm:$0xff] %v7304_v12  ;;  %4393 = vmatpush1.bf16.msra.mxu1 %v7296_v53  ;;  %4331 = vmatprep.subr.bf16.mxu0 %v7298_v54  ;;  %9213 = vst [vmem:[#allocation53_spill] sm:$0xff] %v7308_v13  ;;  %v7313_v29 = vpack.c.bf16 %v763_v9, %v755_v8  ;;  %v762_v30 = vld [vmem:[#allocation4 + $0x2d0] sm:$0xff]  ;;  %v769_v31 = vld [vmem:[#allocation4 + $0x308] sm:$0xff]  ;;  %v7316_v37 = vpack.c.bf16 %v760_v25, %v752_v20 }
  0x8e   :  { %9214 = vst [vmem:[#allocation54_spill] sm:$0xff] %v7310_v18  ;;  %4395 = vmatprep.subr.bf16.mxu1 %v7301_v61  ;;  %v777_v33 = vld [vmem:[#allocation4 + $0x348] sm:$0xff]  ;;  %v771_v34 = vld [vmem:[#allocation4 + $0x318] sm:$0xff]  ;;  %v7320_v38 = vpack.c.bf16 %v762_v30, %v754_v26  ;;  %v768_v42 = vld [vmem:[#allocation4 + $0x300] sm:$0xff] }
  0x8f   :  { %9215 = vst [vmem:[#allocation55_spill] sm:$0xff] %v7313_v29  ;;  %v779_v35 = vld [vmem:[#allocation4 + $0x358] sm:$0xff]  ;;  %9216 = vst [vmem:[#allocation56_spill] sm:$0xff] %v7316_v37  ;;  %v7322_v39 = vpack.c.bf16 %v777_v33, %v769_v31  ;;  %v776_v43 = vld [vmem:[#allocation4 + $0x340] sm:$0xff] }
  0x90   :  { %4333 = vmatpush1.bf16.msra.mxu0 %v7304_v12  ;;  %9217 = vst [vmem:[#allocation57_spill] sm:$0xff] %v7320_v38  ;;  %v770_v44 = vld [vmem:[#allocation4 + $0x310] sm:$0xff]  ;;  %v7325_v46 = vpack.c.bf16 %v779_v35, %v771_v34  ;;  %v785_v48 = vld [vmem:[#allocation4 + $0x388] sm:$0xff]  ;;  %v787_v50 = vld [vmem:[#allocation4 + $0x398] sm:$0xff]  ;;  %v7328_v56 = vpack.c.bf16 %v776_v43, %v768_v42 }
  0x91   :  { %4397 = vmatpush1.bf16.msra.mxu1 %v7308_v13  ;;  %4335 = vmatprep.subr.bf16.mxu0 %v7310_v18  ;;  %9218 = vst [vmem:[#allocation58_spill] sm:$0xff] %v7322_v39  ;;  %v778_v47 = vld [vmem:[#allocation4 + $0x350] sm:$0xff]  ;;  %v793_v49 = vld [vmem:[#allocation4 + $0x3c8] sm:$0xff]  ;;  %v795_v51 = vld [vmem:[#allocation4 + $0x3d8] sm:$0xff] }
  0x92   :  { %4399 = vmatprep.subr.bf16.mxu1 %v7313_v29  ;;  %9219 = vst [vmem:[#allocation59_spill] sm:$0xff] %v7325_v46  ;;  %9220 = vst [vmem:[#allocation60_spill] sm:$0xff] %v7328_v56  ;;  %v7332_v57 = vpack.c.bf16 %v778_v47, %v770_v44  ;;  %v7334_v58 = vpack.c.bf16 %v793_v49, %v785_v48  ;;  %v784_v62 = vld [vmem:[#allocation4 + $0x380] sm:$0xff]  ;;  %v786_v7 = vld [vmem:[#allocation4 + $0x390] sm:$0xff]  ;;  %v7337_v8 = vpack.c.bf16 %v795_v51, %v787_v50 }
  0x93   :  { %v792_v63 = vld [vmem:[#allocation4 + $0x3c0] sm:$0xff]  ;;  %v794_v9 = vld [vmem:[#allocation4 + $0x3d0] sm:$0xff]  ;;  %v801_v20 = vld [vmem:[#allocation4 + $0x408] sm:$0xff] }
  0x94   :  { %4337 = vmatpush1.bf16.msra.mxu0 %v7316_v37  ;;  %9221 = vst [vmem:[#allocation61_spill] sm:$0xff] %v7332_v57  ;;  %9222 = vst [vmem:[#allocation62_spill] sm:$0xff] %v7334_v58  ;;  %v809_v25 = vld [vmem:[#allocation4 + $0x448] sm:$0xff]  ;;  %v803_v26 = vld [vmem:[#allocation4 + $0x418] sm:$0xff]  ;;  %v7340_v31 = vpack.c.bf16 %v792_v63, %v784_v62  ;;  %v7344_v33 = vpack.c.bf16 %v794_v9, %v786_v7 }
  0x95   :  { %4401 = vmatpush1.bf16.msra.mxu1 %v7320_v38  ;;  %4339 = vmatprep.subr.bf16.mxu0 %v7322_v39  ;;  %9223 = vst [vmem:[#allocation63_spill] sm:$0xff] %v7337_v8  ;;  %v811_v30 = vld [vmem:[#allocation4 + $0x458] sm:$0xff]  ;;  %v7346_v34 = vpack.c.bf16 %v809_v25, %v801_v20  ;;  %v800_v35 = vld [vmem:[#allocation4 + $0x400] sm:$0xff]  ;;  %v802_v43 = vld [vmem:[#allocation4 + $0x410] sm:$0xff] }
  0x96   :  { %4403 = vmatprep.subr.bf16.mxu1 %v7325_v46  ;;  %9224 = vst [vmem:[#allocation64_spill] sm:$0xff] %v7340_v31  ;;  %9225 = vst [vmem:[#allocation65_spill] sm:$0xff] %v7344_v33  ;;  %v808_v42 = vld [vmem:[#allocation4 + $0x440] sm:$0xff]  ;;  %v7349_v44 = vpack.c.bf16 %v811_v30, %v803_v26  ;;  %v810_v47 = vld [vmem:[#allocation4 + $0x450] sm:$0xff] }
  0x97   :  { %9226 = vst [vmem:[#allocation66_spill] sm:$0xff] %v7346_v34  ;;  %v817_v48 = vld [vmem:[#allocation4 + $0x488] sm:$0xff]  ;;  %v819_v50 = vld [vmem:[#allocation4 + $0x498] sm:$0xff]  ;;  %v7352_v62 = vpack.c.bf16 %v808_v42, %v800_v35  ;;  %v7356_v63 = vpack.c.bf16 %v810_v47, %v802_v43  ;;  %v816_v9 = vld [vmem:[#allocation4 + $0x480] sm:$0xff] }
  0x98   :  { %4341 = vmatpush1.bf16.msra.mxu0 %v7328_v56  ;;  %9227 = vst [vmem:[#allocation67_spill] sm:$0xff] %v7349_v44  ;;  %v825_v49 = vld [vmem:[#allocation4 + $0x4c8] sm:$0xff]  ;;  %v827_v51 = vld [vmem:[#allocation4 + $0x4d8] sm:$0xff]  ;;  %v824_v20 = vld [vmem:[#allocation4 + $0x4c0] sm:$0xff] }
  0x99   :  { %4405 = vmatpush1.bf16.msra.mxu1 %v7332_v57  ;;  %4343 = vmatprep.subr.bf16.mxu0 %v7334_v58  ;;  %9228 = vst [vmem:[#allocation68_spill] sm:$0xff] %v7352_v62  ;;  %9229 = vst [vmem:[#allocation69_spill] sm:$0xff] %v7356_v63  ;;  %v7358_v7 = vpack.c.bf16 %v825_v49, %v817_v48  ;;  %v818_v25 = vld [vmem:[#allocation4 + $0x490] sm:$0xff]  ;;  %v7361_v26 = vpack.c.bf16 %v827_v51, %v819_v50  ;;  %v833_v6 = vld [vmem:[#allocation4 + $0x508] sm:$0xff] }
  0x9a   :  { %4407 = vmatprep.subr.bf16.mxu1 %v7337_v8  ;;  %v826_v30 = vld [vmem:[#allocation4 + $0x4d0] sm:$0xff]  ;;  %v841_v4 = vld [vmem:[#allocation4 + $0x548] sm:$0xff]  ;;  %v835_v35 = vld [vmem:[#allocation4 + $0x518] sm:$0xff]  ;;  %v7364_v5 = vpack.c.bf16 %v824_v20, %v816_v9 }
  0x9b   :  { %9230 = vst [vmem:[#allocation70_spill] sm:$0xff] %v7358_v7  ;;  %9231 = vst [vmem:[#allocation71_spill] sm:$0xff] %v7361_v26  ;;  %v843_v42 = vld [vmem:[#allocation4 + $0x558] sm:$0xff]  ;;  %v7368_v43 = vpack.c.bf16 %v826_v30, %v818_v25  ;;  %v7370_v47 = vpack.c.bf16 %v841_v4, %v833_v6  ;;  %v832_v48 = vld [vmem:[#allocation4 + $0x500] sm:$0xff] }
  0x9c   :  { %4345 = vmatpush1.bf16.msra.mxu0 %v7340_v31  ;;  %9232 = vst [vmem:[#allocation72_spill] sm:$0xff] %v7364_v5  ;;  %v840_v49 = vld [vmem:[#allocation4 + $0x540] sm:$0xff]  ;;  %v834_v50 = vld [vmem:[#allocation4 + $0x510] sm:$0xff]  ;;  %v7373_v51 = vpack.c.bf16 %v843_v42, %v835_v35  ;;  %v849_v1 = vld [vmem:[#allocation4 + $0x588] sm:$0xff] }
  0x9d   :  { %4409 = vmatpush1.bf16.msra.mxu1 %v7344_v33  ;;  %4347 = vmatprep.subr.bf16.mxu0 %v7346_v34  ;;  %9233 = vst [vmem:[#allocation73_spill] sm:$0xff] %v7368_v43  ;;  %9234 = vst [vmem:[#allocation74_spill] sm:$0xff] %v7370_v47  ;;  %v842_v3 = vld [vmem:[#allocation4 + $0x550] sm:$0xff]  ;;  %v857_v2 = vld [vmem:[#allocation4 + $0x5c8] sm:$0xff]  ;;  %v7376_v24 = vpack.c.bf16 %v840_v49, %v832_v48 }
  0x9e   :  { %4411 = vmatprep.subr.bf16.mxu1 %v7349_v44  ;;  %9235 = vst [vmem:[#allocation75_spill] sm:$0xff] %v7373_v51  ;;  %v851_v9 = vld [vmem:[#allocation4 + $0x598] sm:$0xff]  ;;  %v7380_v4 = vpack.c.bf16 %v842_v3, %v834_v50  ;;  %v7382_v6 = vpack.c.bf16 %v857_v2, %v849_v1  ;;  %v848_v25 = vld [vmem:[#allocation4 + $0x580] sm:$0xff]  ;;  %v850_v35 = vld [vmem:[#allocation4 + $0x590] sm:$0xff] }
  0x9f   :  { %v859_v20 = vld [vmem:[#allocation4 + $0x5d8] sm:$0xff]  ;;  %9236 = vst [vmem:[#allocation76_spill] sm:$0xff] %v7376_v24  ;;  %v856_v30 = vld [vmem:[#allocation4 + $0x5c0] sm:$0xff]  ;;  %v858_v22 = vld [vmem:[#allocation4 + $0x5d0] sm:$0xff] }
  0xa0   :  { %4349 = vmatpush1.bf16.msra.mxu0 %v7352_v62  ;;  %9237 = vst [vmem:[#allocation77_spill] sm:$0xff] %v7380_v4  ;;  %9238 = vst [vmem:[#allocation78_spill] sm:$0xff] %v7382_v6  ;;  %v7385_v42 = vpack.c.bf16 %v859_v20, %v851_v9  ;;  %v865_v23 = vld [vmem:[#allocation4 + $0x608] sm:$0xff]  ;;  %v867_v48 = vld [vmem:[#allocation4 + $0x618] sm:$0xff]  ;;  %v7388_v17 = vpack.c.bf16 %v856_v30, %v848_v25  ;;  %v7392_v1 = vpack.c.bf16 %v858_v22, %v850_v35 }
  0xa1   :  { %4413 = vmatpush1.bf16.msra.mxu1 %v7356_v63  ;;  %4351 = vmatprep.subr.bf16.mxu0 %v7358_v7  ;;  %v873_v21 = vld [vmem:[#allocation4 + $0x648] sm:$0xff]  ;;  %v875_v49 = vld [vmem:[#allocation4 + $0x658] sm:$0xff]  ;;  %v864_v3 = vld [vmem:[#allocation4 + $0x600] sm:$0xff] }
  0xa2   :  { %4415 = vmatprep.subr.bf16.mxu1 %v7361_v26  ;;  %9239 = vst [vmem:[#allocation79_spill] sm:$0xff] %v7385_v42  ;;  %9240 = vst [vmem:[#allocation80_spill] sm:$0xff] %v7388_v17  ;;  %v7394_v2 = vpack.c.bf16 %v873_v21, %v865_v23  ;;  %v872_v50 = vld [vmem:[#allocation4 + $0x640] sm:$0xff]  ;;  %v866_v9 = vld [vmem:[#allocation4 + $0x610] sm:$0xff]  ;;  %v7397_v20 = vpack.c.bf16 %v875_v49, %v867_v48 }
  0xa3   :  { %9241 = vst [vmem:[#allocation81_spill] sm:$0xff] %v7392_v1  ;;  %v874_v15 = vld [vmem:[#allocation4 + $0x650] sm:$0xff]  ;;  %v881_v16 = vld [vmem:[#allocation4 + $0x688] sm:$0xff]  ;;  %v883_v25 = vld [vmem:[#allocation4 + $0x698] sm:$0xff] }
  0xa4   :  { %4353 = vmatpush1.bf16.msra.mxu0 %v7364_v5  ;;  %9242 = vst [vmem:[#allocation82_spill] sm:$0xff] %v7394_v2  ;;  %9243 = vst [vmem:[#allocation83_spill] sm:$0xff] %v7397_v20  ;;  %v889_v14 = vld [vmem:[#allocation4 + $0x6c8] sm:$0xff]  ;;  %v891_v30 = vld [vmem:[#allocation4 + $0x6d8] sm:$0xff]  ;;  %v7404_v21 = vpack.c.bf16 %v874_v15, %v866_v9 }
  0xa5   :  { %4417 = vmatpush1.bf16.msra.mxu1 %v7368_v43  ;;  %4355 = vmatprep.subr.bf16.mxu0 %v7370_v47  ;;  %v7406_v22 = vpack.c.bf16 %v889_v14, %v881_v16  ;;  %v880_v23 = vld [vmem:[#allocation4 + $0x680] sm:$0xff]  ;;  %v882_v48 = vld [vmem:[#allocation4 + $0x690] sm:$0xff]  ;;  %v7409_v49 = vpack.c.bf16 %v891_v30, %v883_v25 }
  0xa6   :  { %4419 = vmatprep.subr.bf16.mxu1 %v7373_v51  ;;  %9245 = vst [vmem:[#allocation85_spill] sm:$0xff] %v7404_v21  ;;  %v888_v35 = vld [vmem:[#allocation4 + $0x6c0] sm:$0xff]  ;;  %v898_v25 = vld [vmem:[#allocation4 + $0x710] sm:$0xff] }
  0xa7   :  { %9246 = vst [vmem:[#allocation86_spill] sm:$0xff] %v7406_v22  ;;  %9247 = vst [vmem:[#allocation87_spill] sm:$0xff] %v7409_v49  ;;  %v896_v16 = vld [vmem:[#allocation4 + $0x700] sm:$0xff] }
  0xa8   :  { %4357 = vmatpush1.bf16.msra.mxu0 %v7376_v24  ;;  %v904_v9 = vld [vmem:[#allocation4 + $0x740] sm:$0xff]  ;;  %v725_v24 = vld [vmem:[#allocation4 + $0x1a8] sm:$0xff] }
  0xa9   :  { %4421 = vmatpush1.bf16.msra.mxu1 %v7380_v4  ;;  %4359 = vmatprep.subr.bf16.mxu0 %v7382_v6  ;;  %v7400_v4 = vpack.c.bf16 %v872_v50, %v864_v3  ;;  %v897_v6 = vld [vmem:[#allocation4 + $0x708] sm:$0xff]  ;;  %v899_v3 = vld [vmem:[#allocation4 + $0x718] sm:$0xff] }
  0xaa   :  { %4423 = vmatprep.subr.bf16.mxu1 %v7385_v42  ;;  %v890_v42 = vld [vmem:[#allocation4 + $0x6d0] sm:$0xff]  ;;  %v907_v50 = vld [vmem:[#allocation4 + $0x758] sm:$0xff] }
  0xab   :  { %9244 = vst [vmem:[#allocation84_spill] sm:$0xff] %v7400_v4  ;;  %v7416_v14 = vpack.c.bf16 %v890_v42, %v882_v48  ;;  %v7421_v30 = vpack.c.bf16 %v907_v50, %v899_v3  ;;  %v912_v42 = vld [vmem:[#allocation4 + $0x780] sm:$0xff]  ;;  %v914_v3 = vld [vmem:[#allocation4 + $0x790] sm:$0xff] }
  0xac   :  { %4361 = vmatpush1.bf16.msra.mxu0 %v7388_v17  ;;  %v905_v17 = vld [vmem:[#allocation4 + $0x748] sm:$0xff]  ;;  %v920_v48 = vld [vmem:[#allocation4 + $0x7c0] sm:$0xff] }
  0xad   :  { %4425 = vmatpush1.bf16.msra.mxu1 %v7392_v1  ;;  %4363 = vmatprep.subr.bf16.mxu0 %v7394_v2  ;;  %v7412_v1 = vpack.c.bf16 %v888_v35, %v880_v23  ;;  %9249 = vst [vmem:[#allocation89_spill] sm:$0xff] %v7416_v14  ;;  %v7418_v15 = vpack.c.bf16 %v905_v17, %v897_v6  ;;  %9251 = vst [vmem:[#allocation91_spill] sm:$0xff] %v7421_v30  ;;  %v913_v2 = vld [vmem:[#allocation4 + $0x788] sm:$0xff]  ;;  %v915_v23 = vld [vmem:[#allocation4 + $0x798] sm:$0xff] }
  0xae   :  { %4427 = vmatprep.subr.bf16.mxu1 %v7397_v20  ;;  %v906_v20 = vld [vmem:[#allocation4 + $0x750] sm:$0xff]  ;;  %v923_v35 = vld [vmem:[#allocation4 + $0x7d8] sm:$0xff] }
  0xaf   :  { %9248 = vst [vmem:[#allocation88_spill] sm:$0xff] %v7412_v1  ;;  %9250 = vst [vmem:[#allocation90_spill] sm:$0xff] %v7418_v15  ;;  %v7428_v17 = vpack.c.bf16 %v906_v20, %v898_v25  ;;  %v7433_v50 = vpack.c.bf16 %v923_v35, %v915_v23  ;;  %v676_v20 = vld [vmem:[#allocation4 + $0x20] sm:$0xff]  ;;  %v678_v23 = vld [vmem:[#allocation4 + $0x30] sm:$0xff] }
  0xb0   :  { %4365 = vmatpush1.bf16.msra.mxu0 %v7400_v4  ;;  %v921_v4 = vld [vmem:[#allocation4 + $0x7c8] sm:$0xff]  ;;  %v684_v25 = vld [vmem:[#allocation4 + $0x60] sm:$0xff] }
  0xb1   :  { %4429 = vmatpush1.bf16.msra.mxu1 %v7404_v21  ;;  %4367 = vmatprep.subr.bf16.mxu0 %v7406_v22  ;;  %v7424_v21 = vpack.c.bf16 %v904_v9, %v896_v16  ;;  %9253 = vst [vmem:[#allocation93_spill] sm:$0xff] %v7428_v17  ;;  %v7430_v6 = vpack.c.bf16 %v921_v4, %v913_v2  ;;  %9255 = vst [vmem:[#allocation95_spill] sm:$0xff] %v7433_v50  ;;  %v677_v22 = vld [vmem:[#allocation4 + $0x28] sm:$0xff]  ;;  %v679_v16 = vld [vmem:[#allocation4 + $0x38] sm:$0xff] }
  0xb2   :  { %4431 = vmatprep.subr.bf16.mxu1 %v7409_v49  ;;  %v922_v49 = vld [vmem:[#allocation4 + $0x7d0] sm:$0xff]  ;;  %v687_v9 = vld [vmem:[#allocation4 + $0x78] sm:$0xff] }
  0xb3   :  { %9252 = vst [vmem:[#allocation92_spill] sm:$0xff] %v7424_v21  ;;  %9254 = vst [vmem:[#allocation94_spill] sm:$0xff] %v7430_v6  ;;  %v7440_v4 = vpack.c.bf16 %v922_v49, %v914_v3  ;;  %v7445_v35 = vpack.c.bf16 %v687_v9, %v679_v16  ;;  %v692_v49 = vld [vmem:[#allocation4 + $0xa0] sm:$0xff]  ;;  %v694_v16 = vld [vmem:[#allocation4 + $0xb0] sm:$0xff] }
  0xb4   :  { %4369 = vmatpush1.bf16.msra.mxu0 %v7412_v1  ;;  %v685_v1 = vld [vmem:[#allocation4 + $0x68] sm:$0xff]  ;;  %v700_v3 = vld [vmem:[#allocation4 + $0xe0] sm:$0xff] }
  0xb5   :  { %4433 = vmatpush1.bf16.msra.mxu1 %v7416_v14  ;;  %4371 = vmatprep.subr.bf16.mxu0 %v7418_v15  ;;  %v7436_v14 = vpack.c.bf16 %v920_v48, %v912_v42  ;;  %9257 = vst [vmem:[#allocation97_spill] sm:$0xff] %v7440_v4  ;;  %v7442_v2 = vpack.c.bf16 %v685_v1, %v677_v22  ;;  %9259 = vst [vmem:[#allocation99_spill] sm:$0xff] %v7445_v35  ;;  %v693_v15 = vld [vmem:[#allocation4 + $0xa8] sm:$0xff]  ;;  %v695_v42 = vld [vmem:[#allocation4 + $0xb8] sm:$0xff] }
  0xb6   :  { %4435 = vmatprep.subr.bf16.mxu1 %v7421_v30  ;;  %v686_v30 = vld [vmem:[#allocation4 + $0x70] sm:$0xff]  ;;  %v703_v48 = vld [vmem:[#allocation4 + $0xf8] sm:$0xff] }
  0xb7   :  { %9256 = vst [vmem:[#allocation96_spill] sm:$0xff] %v7436_v14  ;;  %9258 = vst [vmem:[#allocation98_spill] sm:$0xff] %v7442_v2  ;;  %v7452_v1 = vpack.c.bf16 %v686_v30, %v678_v23  ;;  %v7457_v9 = vpack.c.bf16 %v703_v48, %v695_v42  ;;  %v708_v23 = vld [vmem:[#allocation4 + $0x120] sm:$0xff]  ;;  %v710_v48 = vld [vmem:[#allocation4 + $0x130] sm:$0xff] }
  0xb8   :  { %4373 = vmatpush1.bf16.msra.mxu0 %v7424_v21  ;;  %v701_v21 = vld [vmem:[#allocation4 + $0xe8] sm:$0xff]  ;;  %v716_v42 = vld [vmem:[#allocation4 + $0x160] sm:$0xff] }
  0xb9   :  { %4437 = vmatpush1.bf16.msra.mxu1 %v7428_v17  ;;  %4375 = vmatprep.subr.bf16.mxu0 %v7430_v6  ;;  %v7448_v17 = vpack.c.bf16 %v684_v25, %v676_v20  ;;  %9261 = vst [vmem:[#allocation101_spill] sm:$0xff] %v7452_v1  ;;  %v7454_v22 = vpack.c.bf16 %v701_v21, %v693_v15  ;;  %9263 = vst [vmem:[#allocation103_spill] sm:$0xff] %v7457_v9  ;;  %v709_v6 = vld [vmem:[#allocation4 + $0x128] sm:$0xff]  ;;  %v9264_v20 = vmov 0.0   ;;  %v711_v25 = vld [vmem:[#allocation4 + $0x138] sm:$0xff] }
  0xba   :  { %4439 = vmatprep.subr.bf16.mxu1 %v7433_v50  ;;  %v702_v50 = vld [vmem:[#allocation4 + $0xf0] sm:$0xff]  ;;  %v7462_v21 = vpack.c.bf16 %v700_v3, %v692_v49  ;;  %v727_v49 = vld [vmem:[#allocation4 + $0x1b8] sm:$0xff] }
  0xbb   :  { %9260 = vst [vmem:[#allocation100_spill] sm:$0xff] %v7448_v17  ;;  %9262 = vst [vmem:[#allocation102_spill] sm:$0xff] %v7454_v22  ;;  %v7466_v15 = vpack.c.bf16 %v702_v50, %v694_v16  ;;  %v735_v3 = vld [vmem:[#allocation4 + $0x1f8] sm:$0xff]  ;;  %v732_v16 = vld [vmem:[#allocation4 + $0x1e0] sm:$0xff] }
  0xbc   :  { %4377 = vmatpush1.bf16.msra.mxu0 %v7436_v14  ;;  %v717_v14 = vld [vmem:[#allocation4 + $0x168] sm:$0xff]  ;;  %9265 = vst [vmem:[#allocation104_spill] sm:$0xff] %v7462_v21 }
  0xbd   :  { %4441 = vmatpush1.bf16.msra.mxu1 %v7440_v4  ;;  %4443 = vmatprep.subr.bf16.mxu0 %v7442_v2  ;;  %v719_v4 = vld [vmem:[#allocation4 + $0x178] sm:$0xff]  ;;  %9266 = vst [vmem:[#allocation105_spill] sm:$0xff] %v7466_v15  ;;  %v7468_v30 = vpack.c.bf16 %v717_v14, %v709_v6  ;;  %v718_v2 = vld [vmem:[#allocation4 + $0x170] sm:$0xff]  ;;  %v7476_v14 = vpack.c.bf16 %v716_v42, %v708_v23 }
  0xbe   :  { %4507 = vmatprep.subr.bf16.mxu1 %v7445_v35  ;;  %v7471_v35 = vpack.c.bf16 %v719_v4, %v711_v25  ;;  %v7480_v6 = vpack.c.bf16 %v718_v2, %v710_v48  ;;  %v724_v4 = vld [vmem:[#allocation4 + $0x1a0] sm:$0xff]  ;;  %v726_v25 = vld [vmem:[#allocation4 + $0x1b0] sm:$0xff]  ;;  %v743_v23 = vld [vmem:[#allocation4 + $0x238] sm:$0xff] }
  0xbf   :  { %1001 = vmatmul.mubr.f32.vlgmr.msra.gmra.mrb[0].mxu0 %v9264_v20  ;;  %9267 = vst [vmem:[#allocation106_spill] sm:$0xff] %v7468_v30  ;;  %9269 = vst [vmem:[#allocation108_spill] sm:$0xff] %v7476_v14  ;;  %v751_v42 = vld [vmem:[#allocation4 + $0x278] sm:$0xff]  ;;  %v740_v2 = vld [vmem:[#allocation4 + $0x220] sm:$0xff] }
  0xc0   :  { %1072 = vmatmul.mubr.f32.vlgmr.msra.gmra.mrb[0].mxu1 %v9264_v20  ;;  %4445 = vmatpush1.bf16.msra.mxu0 %v7448_v17  ;;  %9268 = vst [vmem:[#allocation107_spill] sm:$0xff] %v7471_v35  ;;  %v733_v17 = vld [vmem:[#allocation4 + $0x1e8] sm:$0xff]  ;;  %9270 = vst [vmem:[#allocation109_spill] sm:$0xff] %v7480_v6  ;;  %v748_v48 = vld [vmem:[#allocation4 + $0x260] sm:$0xff] }
  0xc1   :  { %4509 = vmatpush1.bf16.msra.mxu1 %v7452_v1  ;;  %4447 = vmatprep.subr.bf16.mxu0 %v7454_v22  ;;  %v7482_v50 = vpack.c.bf16 %v733_v17, %v725_v24  ;;  %v734_v22 = vld [vmem:[#allocation4 + $0x1f0] sm:$0xff]  ;;  %v741_v1 = vld [vmem:[#allocation4 + $0x228] sm:$0xff] }
  0xc2   :  { %4511 = vmatprep.subr.bf16.mxu1 %v7457_v9  ;;  %1142 = vmatprep.mubr.f32.mxu0 %v9264_v20  ;;  %v7485_v9 = vpack.c.bf16 %v735_v3, %v727_v49  ;;  %v7492_v24 = vpack.c.bf16 %v734_v22, %v726_v25  ;;  %v742_v49 = vld [vmem:[#allocation4 + $0x230] sm:$0xff]  ;;  %v7497_v3 = vpack.c.bf16 %v751_v42, %v743_v23  ;;  %v764_v25 = vld [vmem:[#allocation4 + $0x2e0] sm:$0xff] }
  0xc3   :  { %1213 = vmatprep.mubr.f32.mxu1 %v9264_v20  ;;  %9271 = vst [vmem:[#allocation110_spill] sm:$0xff] %v7482_v50  ;;  %v758_v23 = vld [vmem:[#allocation4 + $0x2b0] sm:$0xff] }
  0xc4   :  { %4449 = vmatpush1.bf16.msra.mxu0 %v7462_v21  ;;  %9272 = vst [vmem:[#allocation111_spill] sm:$0xff] %v7485_v9  ;;  %v749_v21 = vld [vmem:[#allocation4 + $0x268] sm:$0xff]  ;;  %9274 = vst [vmem:[#allocation113_spill] sm:$0xff] %v7492_v24 }
  0xc5   :  { %4513 = vmatpush1.bf16.msra.mxu1 %v7466_v15  ;;  %4451 = vmatprep.subr.bf16.mxu0 %v7468_v30  ;;  %v7488_v15 = vpack.c.bf16 %v732_v16, %v724_v4  ;;  %v7494_v17 = vpack.c.bf16 %v749_v21, %v741_v1  ;;  %9276 = vst [vmem:[#allocation115_spill] sm:$0xff] %v7497_v3  ;;  %v757_v30 = vld [vmem:[#allocation4 + $0x2a8] sm:$0xff]  ;;  %v759_v4 = vld [vmem:[#allocation4 + $0x2b8] sm:$0xff]  ;;  %v756_v21 = vld [vmem:[#allocation4 + $0x2a0] sm:$0xff] }
  0xc6   :  { %4515 = vmatprep.subr.bf16.mxu1 %v7471_v35  ;;  %v750_v35 = vld [vmem:[#allocation4 + $0x270] sm:$0xff]  ;;  %v767_v16 = vld [vmem:[#allocation4 + $0x2f8] sm:$0xff] }
  0xc7   :  { %9273 = vst [vmem:[#allocation112_spill] sm:$0xff] %v7488_v15  ;;  %9275 = vst [vmem:[#allocation114_spill] sm:$0xff] %v7494_v17  ;;  %v7504_v1 = vpack.c.bf16 %v750_v35, %v742_v49  ;;  %v7509_v42 = vpack.c.bf16 %v767_v16, %v759_v4  ;;  %v780_v49 = vld [vmem:[#allocation4 + $0x360] sm:$0xff]  ;;  %v774_v4 = vld [vmem:[#allocation4 + $0x330] sm:$0xff] }
  0xc8   :  { %4453 = vmatpush1.bf16.msra.mxu0 %v7476_v14  ;;  %v765_v14 = vld [vmem:[#allocation4 + $0x2e8] sm:$0xff] }
  0xc9   :  { %4517 = vmatpush1.bf16.msra.mxu1 %v7480_v6  ;;  %4455 = vmatprep.subr.bf16.mxu0 %v7482_v50  ;;  %v7500_v6 = vpack.c.bf16 %v748_v48, %v740_v2  ;;  %9278 = vst [vmem:[#allocation117_spill] sm:$0xff] %v7504_v1  ;;  %v7506_v22 = vpack.c.bf16 %v765_v14, %v757_v30  ;;  %9280 = vst [vmem:[#allocation119_spill] sm:$0xff] %v7509_v42  ;;  %v773_v50 = vld [vmem:[#allocation4 + $0x328] sm:$0xff]  ;;  %v775_v2 = vld [vmem:[#allocation4 + $0x338] sm:$0xff] }
  0xca   :  { %4519 = vmatprep.subr.bf16.mxu1 %v7485_v9  ;;  %v766_v9 = vld [vmem:[#allocation4 + $0x2f0] sm:$0xff]  ;;  %v783_v48 = vld [vmem:[#allocation4 + $0x378] sm:$0xff]  ;;  %v772_v14 = vld [vmem:[#allocation4 + $0x320] sm:$0xff] }
  0xcb   :  { %9277 = vst [vmem:[#allocation116_spill] sm:$0xff] %v7500_v6  ;;  %9279 = vst [vmem:[#allocation118_spill] sm:$0xff] %v7506_v22  ;;  %v7516_v35 = vpack.c.bf16 %v766_v9, %v758_v23  ;;  %v7521_v16 = vpack.c.bf16 %v783_v48, %v775_v2  ;;  %v796_v23 = vld [vmem:[#allocation4 + $0x3e0] sm:$0xff]  ;;  %v790_v2 = vld [vmem:[#allocation4 + $0x3b0] sm:$0xff] }
  0xcc   :  { %4457 = vmatpush1.bf16.msra.mxu0 %v7488_v15  ;;  %v781_v15 = vld [vmem:[#allocation4 + $0x368] sm:$0xff] }
  0xcd   :  { %4521 = vmatpush1.bf16.msra.mxu1 %v7492_v24  ;;  %4459 = vmatprep.subr.bf16.mxu0 %v7494_v17  ;;  %v7512_v24 = vpack.c.bf16 %v764_v25, %v756_v21  ;;  %9282 = vst [vmem:[#allocation121_spill] sm:$0xff] %v7516_v35  ;;  %v7518_v30 = vpack.c.bf16 %v781_v15, %v773_v50  ;;  %9284 = vst [vmem:[#allocation123_spill] sm:$0xff] %v7521_v16  ;;  %v789_v17 = vld [vmem:[#allocation4 + $0x3a8] sm:$0xff]  ;;  %v791_v21 = vld [vmem:[#allocation4 + $0x3b8] sm:$0xff] }
  0xce   :  { %4523 = vmatprep.subr.bf16.mxu1 %v7497_v3  ;;  %v782_v3 = vld [vmem:[#allocation4 + $0x370] sm:$0xff]  ;;  %v799_v25 = vld [vmem:[#allocation4 + $0x3f8] sm:$0xff]  ;;  %v788_v50 = vld [vmem:[#allocation4 + $0x3a0] sm:$0xff] }
  0xcf   :  { %9281 = vst [vmem:[#allocation120_spill] sm:$0xff] %v7512_v24  ;;  %9283 = vst [vmem:[#allocation122_spill] sm:$0xff] %v7518_v30  ;;  %v7528_v9 = vpack.c.bf16 %v782_v3, %v774_v4  ;;  %v7533_v48 = vpack.c.bf16 %v799_v25, %v791_v21  ;;  %v804_v3 = vld [vmem:[#allocation4 + $0x420] sm:$0xff]  ;;  %v806_v21 = vld [vmem:[#allocation4 + $0x430] sm:$0xff] }
  0xd0   :  { %4461 = vmatpush1.bf16.msra.mxu0 %v7500_v6  ;;  %v797_v6 = vld [vmem:[#allocation4 + $0x3e8] sm:$0xff]  ;;  %v812_v4 = vld [vmem:[#allocation4 + $0x460] sm:$0xff] }
  0xd1   :  { %4525 = vmatpush1.bf16.msra.mxu1 %v7504_v1  ;;  %4463 = vmatprep.subr.bf16.mxu0 %v7506_v22  ;;  %v7524_v1 = vpack.c.bf16 %v780_v49, %v772_v14  ;;  %9286 = vst [vmem:[#allocation125_spill] sm:$0xff] %v7528_v9  ;;  %v7530_v15 = vpack.c.bf16 %v797_v6, %v789_v17  ;;  %9288 = vst [vmem:[#allocation127_spill] sm:$0xff] %v7533_v48  ;;  %v805_v22 = vld [vmem:[#allocation4 + $0x428] sm:$0xff]  ;;  %v807_v14 = vld [vmem:[#allocation4 + $0x438] sm:$0xff] }
  0xd2   :  { %4527 = vmatprep.subr.bf16.mxu1 %v7509_v42  ;;  %v798_v42 = vld [vmem:[#allocation4 + $0x3f0] sm:$0xff]  ;;  %v815_v49 = vld [vmem:[#allocation4 + $0x478] sm:$0xff] }
  0xd3   :  { %9285 = vst [vmem:[#allocation124_spill] sm:$0xff] %v7524_v1  ;;  %9287 = vst [vmem:[#allocation126_spill] sm:$0xff] %v7530_v15  ;;  %v7540_v6 = vpack.c.bf16 %v798_v42, %v790_v2  ;;  %v7545_v25 = vpack.c.bf16 %v815_v49, %v807_v14  ;;  %v820_v42 = vld [vmem:[#allocation4 + $0x4a0] sm:$0xff]  ;;  %v822_v14 = vld [vmem:[#allocation4 + $0x4b0] sm:$0xff] }
  0xd4   :  { %4465 = vmatpush1.bf16.msra.mxu0 %v7512_v24  ;;  %v813_v24 = vld [vmem:[#allocation4 + $0x468] sm:$0xff]  ;;  %v828_v2 = vld [vmem:[#allocation4 + $0x4e0] sm:$0xff] }
  0xd5   :  { %4529 = vmatpush1.bf16.msra.mxu1 %v7516_v35  ;;  %4467 = vmatprep.subr.bf16.mxu0 %v7518_v30  ;;  %v7536_v35 = vpack.c.bf16 %v796_v23, %v788_v50  ;;  %9290 = vst [vmem:[#allocation129_spill] sm:$0xff] %v7540_v6  ;;  %v7542_v17 = vpack.c.bf16 %v813_v24, %v805_v22  ;;  %9292 = vst [vmem:[#allocation131_spill] sm:$0xff] %v7545_v25  ;;  %v821_v30 = vld [vmem:[#allocation4 + $0x4a8] sm:$0xff]  ;;  %v823_v50 = vld [vmem:[#allocation4 + $0x4b8] sm:$0xff] }
  0xd6   :  { %4531 = vmatprep.subr.bf16.mxu1 %v7521_v16  ;;  %v814_v16 = vld [vmem:[#allocation4 + $0x470] sm:$0xff]  ;;  %v831_v23 = vld [vmem:[#allocation4 + $0x4f8] sm:$0xff] }
  0xd7   :  { %9289 = vst [vmem:[#allocation128_spill] sm:$0xff] %v7536_v35  ;;  %9291 = vst [vmem:[#allocation130_spill] sm:$0xff] %v7542_v17  ;;  %v7552_v24 = vpack.c.bf16 %v814_v16, %v806_v21  ;;  %v7557_v49 = vpack.c.bf16 %v831_v23, %v823_v50  ;;  %v836_v16 = vld [vmem:[#allocation4 + $0x520] sm:$0xff]  ;;  %v838_v50 = vld [vmem:[#allocation4 + $0x530] sm:$0xff] }
  0xd8   :  { %4469 = vmatpush1.bf16.msra.mxu0 %v7524_v1  ;;  %v829_v1 = vld [vmem:[#allocation4 + $0x4e8] sm:$0xff]  ;;  %v844_v21 = vld [vmem:[#allocation4 + $0x560] sm:$0xff] }
  0xd9   :  { %4533 = vmatpush1.bf16.msra.mxu1 %v7528_v9  ;;  %4471 = vmatprep.subr.bf16.mxu0 %v7530_v15  ;;  %v7548_v9 = vpack.c.bf16 %v812_v4, %v804_v3  ;;  %9294 = vst [vmem:[#allocation133_spill] sm:$0xff] %v7552_v24  ;;  %v7554_v22 = vpack.c.bf16 %v829_v1, %v821_v30  ;;  %9296 = vst [vmem:[#allocation135_spill] sm:$0xff] %v7557_v49  ;;  %v837_v15 = vld [vmem:[#allocation4 + $0x528] sm:$0xff]  ;;  %v839_v3 = vld [vmem:[#allocation4 + $0x538] sm:$0xff] }
  0xda   :  { %4535 = vmatprep.subr.bf16.mxu1 %v7533_v48  ;;  %v830_v48 = vld [vmem:[#allocation4 + $0x4f0] sm:$0xff]  ;;  %v847_v4 = vld [vmem:[#allocation4 + $0x578] sm:$0xff] }
  0xdb   :  { %9293 = vst [vmem:[#allocation132_spill] sm:$0xff] %v7548_v9  ;;  %9295 = vst [vmem:[#allocation134_spill] sm:$0xff] %v7554_v22  ;;  %v7564_v1 = vpack.c.bf16 %v830_v48, %v822_v14  ;;  %v7569_v23 = vpack.c.bf16 %v847_v4, %v839_v3  ;;  %v852_v48 = vld [vmem:[#allocation4 + $0x5a0] sm:$0xff]  ;;  %v854_v3 = vld [vmem:[#allocation4 + $0x5b0] sm:$0xff] }
  0xdc   :  { %4473 = vmatpush1.bf16.msra.mxu0 %v7536_v35  ;;  %v845_v35 = vld [vmem:[#allocation4 + $0x568] sm:$0xff]  ;;  %v860_v14 = vld [vmem:[#allocation4 + $0x5e0] sm:$0xff] }
  0xdd   :  { %4537 = vmatpush1.bf16.msra.mxu1 %v7540_v6  ;;  %4475 = vmatprep.subr.bf16.mxu0 %v7542_v17  ;;  %v7560_v6 = vpack.c.bf16 %v828_v2, %v820_v42  ;;  %9298 = vst [vmem:[#allocation137_spill] sm:$0xff] %v7564_v1  ;;  %v7566_v30 = vpack.c.bf16 %v845_v35, %v837_v15  ;;  %9300 = vst [vmem:[#allocation139_spill] sm:$0xff] %v7569_v23  ;;  %v853_v17 = vld [vmem:[#allocation4 + $0x5a8] sm:$0xff]  ;;  %v855_v42 = vld [vmem:[#allocation4 + $0x5b8] sm:$0xff] }
  0xde   :  { %4539 = vmatprep.subr.bf16.mxu1 %v7545_v25  ;;  %v846_v25 = vld [vmem:[#allocation4 + $0x570] sm:$0xff]  ;;  %v863_v2 = vld [vmem:[#allocation4 + $0x5f8] sm:$0xff] }
  0xdf   :  { %9297 = vst [vmem:[#allocation136_spill] sm:$0xff] %v7560_v6  ;;  %9299 = vst [vmem:[#allocation138_spill] sm:$0xff] %v7566_v30  ;;  %v7576_v35 = vpack.c.bf16 %v846_v25, %v838_v50  ;;  %v7581_v4 = vpack.c.bf16 %v863_v2, %v855_v42  ;;  %v868_v25 = vld [vmem:[#allocation4 + $0x620] sm:$0xff]  ;;  %v870_v42 = vld [vmem:[#allocation4 + $0x630] sm:$0xff] }
  0xe0   :  { %4477 = vmatpush1.bf16.msra.mxu0 %v7548_v9  ;;  %v861_v9 = vld [vmem:[#allocation4 + $0x5e8] sm:$0xff]  ;;  %v876_v50 = vld [vmem:[#allocation4 + $0x660] sm:$0xff] }
  0xe1   :  { %4541 = vmatpush1.bf16.msra.mxu1 %v7552_v24  ;;  %4479 = vmatprep.subr.bf16.mxu0 %v7554_v22  ;;  %v7572_v24 = vpack.c.bf16 %v844_v21, %v836_v16  ;;  %9302 = vst [vmem:[#allocation141_spill] sm:$0xff] %v7576_v35  ;;  %v7578_v15 = vpack.c.bf16 %v861_v9, %v853_v17  ;;  %9304 = vst [vmem:[#allocation143_spill] sm:$0xff] %v7581_v4  ;;  %v869_v22 = vld [vmem:[#allocation4 + $0x628] sm:$0xff]  ;;  %v871_v16 = vld [vmem:[#allocation4 + $0x638] sm:$0xff] }
  0xe2   :  { %4543 = vmatprep.subr.bf16.mxu1 %v7557_v49  ;;  %v862_v49 = vld [vmem:[#allocation4 + $0x5f0] sm:$0xff]  ;;  %v879_v21 = vld [vmem:[#allocation4 + $0x678] sm:$0xff] }
  0xe3   :  { %9301 = vst [vmem:[#allocation140_spill] sm:$0xff] %v7572_v24  ;;  %9303 = vst [vmem:[#allocation142_spill] sm:$0xff] %v7578_v15  ;;  %v7588_v9 = vpack.c.bf16 %v862_v49, %v854_v3  ;;  %v7593_v2 = vpack.c.bf16 %v879_v21, %v871_v16  ;;  %v884_v49 = vld [vmem:[#allocation4 + $0x6a0] sm:$0xff]  ;;  %v886_v16 = vld [vmem:[#allocation4 + $0x6b0] sm:$0xff] }
  0xe4   :  { %4481 = vmatpush1.bf16.msra.mxu0 %v7560_v6  ;;  %v877_v6 = vld [vmem:[#allocation4 + $0x668] sm:$0xff]  ;;  %v892_v3 = vld [vmem:[#allocation4 + $0x6e0] sm:$0xff] }
  0xe5   :  { %4545 = vmatpush1.bf16.msra.mxu1 %v7564_v1  ;;  %4483 = vmatprep.subr.bf16.mxu0 %v7566_v30  ;;  %v7584_v1 = vpack.c.bf16 %v860_v14, %v852_v48  ;;  %9306 = vst [vmem:[#allocation145_spill] sm:$0xff] %v7588_v9  ;;  %v7590_v17 = vpack.c.bf16 %v877_v6, %v869_v22  ;;  %9308 = vst [vmem:[#allocation147_spill] sm:$0xff] %v7593_v2  ;;  %v885_v30 = vld [vmem:[#allocation4 + $0x6a8] sm:$0xff]  ;;  %v887_v48 = vld [vmem:[#allocation4 + $0x6b8] sm:$0xff] }
  0xe6   :  { %4547 = vmatprep.subr.bf16.mxu1 %v7569_v23  ;;  %v878_v23 = vld [vmem:[#allocation4 + $0x670] sm:$0xff]  ;;  %v895_v14 = vld [vmem:[#allocation4 + $0x6f8] sm:$0xff] }
  0xe7   :  { %9305 = vst [vmem:[#allocation144_spill] sm:$0xff] %v7584_v1  ;;  %9307 = vst [vmem:[#allocation146_spill] sm:$0xff] %v7590_v17  ;;  %v7600_v6 = vpack.c.bf16 %v878_v23, %v870_v42  ;;  %v7605_v21 = vpack.c.bf16 %v895_v14, %v887_v48  ;;  %v900_v23 = vld [vmem:[#allocation4 + $0x720] sm:$0xff]  ;;  %v902_v48 = vld [vmem:[#allocation4 + $0x730] sm:$0xff] }
  0xe8   :  { %4485 = vmatpush1.bf16.msra.mxu0 %v7572_v24  ;;  %v893_v24 = vld [vmem:[#allocation4 + $0x6e8] sm:$0xff]  ;;  %v908_v42 = vld [vmem:[#allocation4 + $0x760] sm:$0xff] }
  0xe9   :  { %4549 = vmatpush1.bf16.msra.mxu1 %v7576_v35  ;;  %4487 = vmatprep.subr.bf16.mxu0 %v7578_v15  ;;  %v7596_v35 = vpack.c.bf16 %v876_v50, %v868_v25  ;;  %9310 = vst [vmem:[#allocation149_spill] sm:$0xff] %v7600_v6  ;;  %v7602_v22 = vpack.c.bf16 %v893_v24, %v885_v30  ;;  %9312 = vst [vmem:[#allocation151_spill] sm:$0xff] %v7605_v21  ;;  %v901_v15 = vld [vmem:[#allocation4 + $0x728] sm:$0xff]  ;;  %v903_v25 = vld [vmem:[#allocation4 + $0x738] sm:$0xff] }
  0xea   :  { %4551 = vmatprep.subr.bf16.mxu1 %v7581_v4  ;;  %v894_v4 = vld [vmem:[#allocation4 + $0x6f0] sm:$0xff]  ;;  %v911_v50 = vld [vmem:[#allocation4 + $0x778] sm:$0xff] }
  0xeb   :  { %9309 = vst [vmem:[#allocation148_spill] sm:$0xff] %v7596_v35  ;;  %9311 = vst [vmem:[#allocation150_spill] sm:$0xff] %v7602_v22  ;;  %v7612_v24 = vpack.c.bf16 %v894_v4, %v886_v16  ;;  %v7617_v14 = vpack.c.bf16 %v911_v50, %v903_v25  ;;  %v916_v4 = vld [vmem:[#allocation4 + $0x7a0] sm:$0xff]  ;;  %v918_v50 = vld [vmem:[#allocation4 + $0x7b0] sm:$0xff] }
  0xec   :  { %4489 = vmatpush1.bf16.msra.mxu0 %v7584_v1  ;;  %v909_v1 = vld [vmem:[#allocation4 + $0x768] sm:$0xff]  ;;  %v924_v16 = vld [vmem:[#allocation4 + $0x7e0] sm:$0xff] }
  0xed   :  { %4553 = vmatpush1.bf16.msra.mxu1 %v7588_v9  ;;  %4491 = vmatprep.subr.bf16.mxu0 %v7590_v17  ;;  %v7608_v9 = vpack.c.bf16 %v892_v3, %v884_v49  ;;  %9314 = vst [vmem:[#allocation153_spill] sm:$0xff] %v7612_v24  ;;  %v7614_v30 = vpack.c.bf16 %v909_v1, %v901_v15  ;;  %9316 = vst [vmem:[#allocation155_spill] sm:$0xff] %v7617_v14  ;;  %v917_v17 = vld [vmem:[#allocation4 + $0x7a8] sm:$0xff]  ;;  %v919_v49 = vld [vmem:[#allocation4 + $0x7b8] sm:$0xff] }
  0xee   :  { %4555 = vmatprep.subr.bf16.mxu1 %v7593_v2  ;;  %v910_v2 = vld [vmem:[#allocation4 + $0x770] sm:$0xff]  ;;  %v927_v3 = vld [vmem:[#allocation4 + $0x7f8] sm:$0xff] }
  0xef   :  { %9313 = vst [vmem:[#allocation152_spill] sm:$0xff] %v7608_v9  ;;  %9315 = vst [vmem:[#allocation154_spill] sm:$0xff] %v7614_v30  ;;  %v7624_v1 = vpack.c.bf16 %v910_v2, %v902_v48  ;;  %v7629_v25 = vpack.c.bf16 %v927_v3, %v919_v49  ;;  %v9328_v48 = vld [vmem:[#allocation81_spill] sm:$0xff]  ;;  %v9329_v49 = vld [vmem:[#allocation82_spill] sm:$0xff] }
  0xf0   :  { %4493 = vmatpush1.bf16.msra.mxu0 %v7596_v35  ;;  %v925_v35 = vld [vmem:[#allocation4 + $0x7e8] sm:$0xff]  ;;  %v9330_v3 = vld [vmem:[#allocation83_spill] sm:$0xff] }
  0xf1   :  { %4557 = vmatpush1.bf16.msra.mxu1 %v7600_v6  ;;  %4495 = vmatprep.subr.bf16.mxu0 %v7602_v22  ;;  %v7620_v6 = vpack.c.bf16 %v908_v42, %v900_v23  ;;  %9318 = vst [vmem:[#allocation157_spill] sm:$0xff] %v7624_v1  ;;  %v7626_v15 = vpack.c.bf16 %v925_v35, %v917_v17  ;;  %9320 = vst [vmem:[#allocation159_spill] sm:$0xff] %v7629_v25  ;;  %v9324_v35 = vld [vmem:[#allocation77_spill] sm:$0xff]  ;;  %v9325_v17 = vld [vmem:[#allocation78_spill] sm:$0xff] }
  0xf2   :  { %4559 = vmatprep.subr.bf16.mxu1 %v7605_v21  ;;  %v926_v21 = vld [vmem:[#allocation4 + $0x7f0] sm:$0xff]  ;;  %v7632_v23 = vpack.c.bf16 %v924_v16, %v916_v4  ;;  %v9327_v42 = vld [vmem:[#allocation80_spill] sm:$0xff]  ;;  %v9332_v16 = vld [vmem:[#allocation85_spill] sm:$0xff] }
  0xf3   :  { %9317 = vst [vmem:[#allocation156_spill] sm:$0xff] %v7620_v6  ;;  %9319 = vst [vmem:[#allocation158_spill] sm:$0xff] %v7626_v15  ;;  %v7636_v2 = vpack.c.bf16 %v926_v21, %v918_v50  ;;  %v9326_v21 = vld [vmem:[#allocation79_spill] sm:$0xff]  ;;  %v9331_v4 = vld [vmem:[#allocation84_spill] sm:$0xff] }
  0xf4   :  { %4497 = vmatpush1.bf16.msra.mxu0 %v7608_v9  ;;  %9321 = vst [vmem:[#allocation160_spill] sm:$0xff] %v7632_v23  ;;  %v9333_v50 = vld [vmem:[#allocation86_spill] sm:$0xff] }
  0xf5   :  { %4561 = vmatpush1.bf16.msra.mxu1 %v7612_v24  ;;  %4499 = vmatprep.subr.bf16.mxu0 %v7614_v30  ;;  %9322 = vst [vmem:[#allocation161_spill] sm:$0xff] %v7636_v2 }
  0xf6   :  { %4563 = vmatprep.subr.bf16.mxu1 %v7617_v14 }
  0xf8   :  { %4501 = vmatpush1.bf16.msra.mxu0 %v7620_v6 }
  0xf9   :  { %4565 = vmatpush1.bf16.msra.mxu1 %v7624_v1  ;;  %4503 = vmatprep.subr.bf16.mxu0 %v7626_v15 }
  0xfa   :  { %4567 = vmatprep.subr.bf16.mxu1 %v7629_v25 }
  0xfc   :  { %4505 = vmatpush1.bf16.msra.mxu0 %v7632_v23 }
  0xfd   :  { %4569 = vmatpush1.bf16.msra.mxu1 %v7636_v2  ;;  %4571 = vmatprep.subr.bf16.mxu0 %v7253_v55 }
  0xfe   :  { %4635 = vmatprep.subr.bf16.mxu1 %v7255_v59 }
  0xff   :  { %1143 = vmatmul.mubr.f32.vlgmr.msra.gmra.mrb[16].mxu0 %v9264_v20 }
 0x100   :  { %1214 = vmatmul.mubr.f32.vlgmr.msra.gmra.mrb[16].mxu1 %v9264_v20  ;;  %4573 = vmatpush1.bf16.msra.mxu0 %v7257_v60  ;;  %v9323_v20 = vld [vmem:[#allocation76_spill] sm:$0xff] }
 0x101   :  { %4637 = vmatpush1.bf16.msra.mxu1 %v7260_v0  ;;  %4575 = vmatprep.subr.bf16.mxu0 %v7264_v10 }
 0x102   :  { %4639 = vmatprep.subr.bf16.mxu1 %v7266_v11 }
 0x104   :  { %4577 = vmatpush1.bf16.msra.mxu0 %v7269_v19 }
 0x105   :  { %4641 = vmatpush1.bf16.msra.mxu1 %v7273_v27  ;;  %4579 = vmatprep.subr.bf16.mxu0 %v7275_v28 }
 0x106   :  { %4643 = vmatprep.subr.bf16.mxu1 %v7277_v32 }
 0x108   :  { %4581 = vmatpush1.bf16.msra.mxu0 %v7280_v36 }
 0x109   :  { %4645 = vmatpush1.bf16.msra.mxu1 %v7284_v40  ;;  %4583 = vmatprep.subr.bf16.mxu0 %v7286_v41 }
 0x10a   :  { %4647 = vmatprep.subr.bf16.mxu1 %v7289_v45 }
 0x10c   :  { %4585 = vmatpush1.bf16.msra.mxu0 %v7292_v52 }
 0x10d   :  { %4649 = vmatpush1.bf16.msra.mxu1 %v7296_v53  ;;  %4587 = vmatprep.subr.bf16.mxu0 %v7298_v54 }
 0x10e   :  { %4651 = vmatprep.subr.bf16.mxu1 %v7301_v61 }
 0x110   :  { %4589 = vmatpush1.bf16.msra.mxu0 %v7304_v12 }
 0x111   :  { %4653 = vmatpush1.bf16.msra.mxu1 %v7308_v13  ;;  %4591 = vmatprep.subr.bf16.mxu0 %v7310_v18 }
 0x112   :  { %4655 = vmatprep.subr.bf16.mxu1 %v7313_v29 }
 0x114   :  { %4593 = vmatpush1.bf16.msra.mxu0 %v7316_v37 }
 0x115   :  { %4657 = vmatpush1.bf16.msra.mxu1 %v7320_v38  ;;  %4595 = vmatprep.subr.bf16.mxu0 %v7322_v39 }
 0x116   :  { %4659 = vmatprep.subr.bf16.mxu1 %v7325_v46 }
 0x118   :  { %4597 = vmatpush1.bf16.msra.mxu0 %v7328_v56 }
 0x119   :  { %4661 = vmatpush1.bf16.msra.mxu1 %v7332_v57  ;;  %4599 = vmatprep.subr.bf16.mxu0 %v7334_v58 }
 0x11a   :  { %4663 = vmatprep.subr.bf16.mxu1 %v7337_v8 }
 0x11c   :  { %4601 = vmatpush1.bf16.msra.mxu0 %v7340_v31 }
 0x11d   :  { %4665 = vmatpush1.bf16.msra.mxu1 %v7344_v33  ;;  %4603 = vmatprep.subr.bf16.mxu0 %v7346_v34 }
 0x11e   :  { %4667 = vmatprep.subr.bf16.mxu1 %v7349_v44 }
 0x120   :  { %4605 = vmatpush1.bf16.msra.mxu0 %v7352_v62 }
 0x121   :  { %4669 = vmatpush1.bf16.msra.mxu1 %v7356_v63  ;;  %4607 = vmatprep.subr.bf16.mxu0 %v7358_v7 }
 0x122   :  { %4671 = vmatprep.subr.bf16.mxu1 %v7361_v26  ;;  %v9350_v26 = vld [vmem:[#allocation29_spill] sm:$0xff] }
 0x124   :  { %4609 = vmatpush1.bf16.msra.mxu0 %v7364_v5  ;;  %v9349_v5 = vld [vmem:[#allocation27_spill] sm:$0xff] }
 0x125   :  { %4673 = vmatpush1.bf16.msra.mxu1 %v7368_v43  ;;  %4611 = vmatprep.subr.bf16.mxu0 %v7370_v47  ;;  %v9347_v47 = vld [vmem:[#allocation26_spill] sm:$0xff]  ;;  %v9348_v43 = vld [vmem:[#allocation28_spill] sm:$0xff] }
 0x126   :  { %4675 = vmatprep.subr.bf16.mxu1 %v7373_v51 }
 0x128   :  { %4613 = vmatpush1.bf16.msra.mxu0 %v9323_v20  ;;  %v9334_v20 = vld [vmem:[#allocation87_spill] sm:$0xff] }
 0x129   :  { %4677 = vmatpush1.bf16.msra.mxu1 %v9324_v35  ;;  %4615 = vmatprep.subr.bf16.mxu0 %v9325_v17  ;;  %v9335_v35 = vld [vmem:[#allocation88_spill] sm:$0xff]  ;;  %v9336_v17 = vld [vmem:[#allocation89_spill] sm:$0xff] }
 0x12a   :  { %4679 = vmatprep.subr.bf16.mxu1 %v9326_v21  ;;  %v9337_v21 = vld [vmem:[#allocation90_spill] sm:$0xff] }
 0x12c   :  { %4617 = vmatpush1.bf16.msra.mxu0 %v9327_v42  ;;  %v9338_v42 = vld [vmem:[#allocation91_spill] sm:$0xff] }
 0x12d   :  { %4681 = vmatpush1.bf16.msra.mxu1 %v9328_v48  ;;  %4619 = vmatprep.subr.bf16.mxu0 %v9329_v49  ;;  %v9339_v48 = vld [vmem:[#allocation92_spill] sm:$0xff]  ;;  %v9340_v49 = vld [vmem:[#allocation93_spill] sm:$0xff] }
 0x12e   :  { %4683 = vmatprep.subr.bf16.mxu1 %v9330_v3  ;;  %v9341_v3 = vld [vmem:[#allocation94_spill] sm:$0xff] }
 0x130   :  { %4621 = vmatpush1.bf16.msra.mxu0 %v9331_v4  ;;  %v9342_v4 = vld [vmem:[#allocation95_spill] sm:$0xff] }
 0x131   :  { %4685 = vmatpush1.bf16.msra.mxu1 %v9332_v16  ;;  %4623 = vmatprep.subr.bf16.mxu0 %v9333_v50  ;;  %v9343_v16 = vld [vmem:[#allocation96_spill] sm:$0xff]  ;;  %v9344_v50 = vld [vmem:[#allocation97_spill] sm:$0xff] }
 0x132   :  { %4687 = vmatprep.subr.bf16.mxu1 %v9334_v20  ;;  %v9345_v20 = vld [vmem:[#allocation98_spill] sm:$0xff] }
 0x134   :  { %4625 = vmatpush1.bf16.msra.mxu0 %v9335_v35  ;;  %v9346_v35 = vld [vmem:[#allocation99_spill] sm:$0xff] }
 0x135   :  { %4689 = vmatpush1.bf16.msra.mxu1 %v9336_v17  ;;  %4627 = vmatprep.subr.bf16.mxu0 %v9337_v21 }
 0x136   :  { %4691 = vmatprep.subr.bf16.mxu1 %v9338_v42 }
 0x138   :  { %4629 = vmatpush1.bf16.msra.mxu0 %v9339_v48 }
 0x139   :  { %4693 = vmatpush1.bf16.msra.mxu1 %v9340_v49  ;;  %4631 = vmatprep.subr.bf16.mxu0 %v9341_v3 }
 0x13a   :  { %4695 = vmatprep.subr.bf16.mxu1 %v9342_v4 }
 0x13c   :  { %4633 = vmatpush1.bf16.msra.mxu0 %v9343_v16 }
 0x13d   :  { %4697 = vmatpush1.bf16.msra.mxu1 %v9344_v50  ;;  %4699 = vmatprep.subr.bf16.mxu0 %v9345_v20 }
 0x13e   :  { %4763 = vmatprep.subr.bf16.mxu1 %v9346_v35 }
 0x192   :  { %v1002_v17 = vpop.f32.mrb[0].mxu0 }
 0x193   :  { %v1073_v21 = vpop.f32.mrb[0].mxu1  ;;  %v1004_v51 = vpop.f32.mrb[1].mxu0  ;;  %v6490_v48 = vadd.f32 %v1002_v17, %v9347_v47 }
 0x194   :  { %v1075_v42 = vpop.f32.mrb[1].mxu1  ;;  %v6506_v49 = vadd.f32 %v1073_v21, %v9348_v43  ;;  %v6491_v3 = vadd.f32 %v1004_v51, %v9349_v5  ;;  %v9354_v5 = vld [vmem:[#allocation33_spill] sm:$0xff] }
 0x195   :  { %v6507_v4 = vadd.f32 %v1075_v42, %v9350_v26  ;;  %v4248_v7 = vmul.f32 -1.442695, %v6490_v48  ;;  %v9351_v42 = vld [vmem:[#allocation30_spill] sm:$0xff] }
 0x196   :  { %v4250_v16 = vmul.f32 -1.442695, %v6506_v49  ;;  %v4249_v63 = vmul.f32 -1.442695, %v6491_v3 }
 0x197   :  { %v4251_v50 = vmul.f32 -1.442695, %v6507_v4  ;;  %6629 = vpow2.f32 %v4248_v7  ;;  %v9352_v7 = vld [vmem:[#allocation32_spill] sm:$0xff] }
 0x198   :  { %6631 = vpow2.f32 %v4250_v16 }
 0x199   :  { %6633 = vpow2.f32 %v4249_v63  ;;  %v9353_v63 = vld [vmem:[#allocation31_spill] sm:$0xff] }
 0x19a   :  { %6635 = vpow2.f32 %v4251_v50 }
 0x1a1   :  { %v6630_v35 = vpop.eup %6629 }
 0x1a2   :  { %v6632_v20 = vpop.eup %6631  ;;  %v1246_v34 = vadd.f32 1.0, %v6630_v35 }
 0x1a3   :  { %v6634_v62 = vpop.eup %6633  ;;  %v1248_v17 = vadd.f32 1.0, %v6632_v20 }
 0x1a4   :  { %v6636_v44 = vpop.eup %6635  ;;  %v1247_v47 = vadd.f32 1.0, %v6634_v62  ;;  %6637 = vrcp.f32 %v1246_v34 }
 0x1a5   :  { %v1249_v21 = vadd.f32 1.0, %v6636_v44  ;;  %6639 = vrcp.f32 %v1248_v17 }
 0x1a6   :  { %6641 = vrcp.f32 %v1247_v47 }
 0x1a7   :  { %6643 = vrcp.f32 %v1249_v21 }
 0x1ae   :  { %v6638_v34 = vpop.eup %6637 }
 0x1af   :  { %v6640_v44 = vpop.eup %6639 }
 0x1b0   :  { %v6642_v20 = vpop.eup %6641 }
 0x1b1   :  { %v6644_v17 = vpop.eup %6643 }
 0x1d2   :  { %v1144_v51 = vpop.f32.mrb[16].mxu0 }
 0x1d3   :  { %v6522_v48 = vadd.f32 %v1144_v51, %v9351_v42  ;;  %v1215_v49 = vpop.f32.mrb[16].mxu1  ;;  %v1146_v3 = vpop.f32.mrb[17].mxu0  ;;  %v1266_v42 = vmul.f32 0.0, %v6640_v44 }
 0x1d4   :  { %v6538_v4 = vadd.f32 %v1215_v49, %v9352_v7  ;;  %v6523_v16 = vadd.f32 %v1146_v3, %v9353_v63  ;;  %v1217_v50 = vpop.f32.mrb[17].mxu1 }
 0x1d5   :  { %v4252_v26 = vmul.f32 -1.442695, %v6522_v48  ;;  %v6539_v35 = vadd.f32 %v1217_v50, %v9354_v5  ;;  %v1267_v50 = vmul.f32 0.0, %v6644_v17  ;;  %v9361_v17 = vld [vmem:[#allocation104_spill] sm:$0xff] }
 0x1d6   :  { %6645 = vtanh.f32 %v6538_v4  ;;  %v4253_v62 = vmul.f32 -1.442695, %v6523_v16 }
 0x1d7   :  { %6647 = vpow2.f32 %v4252_v26 }
 0x1d8   :  { %6649 = vpow2.f32 %v4253_v62 }
 0x1d9   :  { %6651 = vtanh.f32 %v6539_v35 }
 0x1e0   :  { %v6646_v51 = vpop.eup %6645 }
 0x1e1   :  { %v6648_v47 = vpop.eup %6647  ;;  %v1268_v49 = vmul.f32 %v6646_v51, %v6638_v34 }
 0x1e2   :  { %v6650_v7 = vpop.eup %6649  ;;  %v1250_v3 = vadd.f32 1.0, %v6648_v47  ;;  %v9362_v47 = vld [vmem:[#allocation105_spill] sm:$0xff] }
 0x1e3   :  { %v6652_v63 = vpop.eup %6651  ;;  %v7717_v21 = vadd.f32 %v1268_v49, %v1266_v42  ;;  %v1251_v48 = vadd.f32 1.0, %v6650_v7  ;;  %v9357_v42 = vld [vmem:[#allocation100_spill] sm:$0xff]  ;;  %v9358_v7 = vld [vmem:[#allocation101_spill] sm:$0xff]  ;;  %v9363_v49 = vld [vmem:[#allocation106_spill] sm:$0xff] }
 0x1e4   :  { %v1269_v4 = vmul.f32 %v6652_v63, %v6642_v20  ;;  %6653 = vrcp.f32 %v1250_v3  ;;  %v9359_v63 = vld [vmem:[#allocation102_spill] sm:$0xff]  ;;  %v9360_v20 = vld [vmem:[#allocation103_spill] sm:$0xff] }
 0x1e5   :  { %6655 = vrcp.f32 %v1251_v48  ;;  %v9364_v3 = vld [vmem:[#allocation107_spill] sm:$0xff]  ;;  %v9365_v48 = vld [vmem:[#allocation108_spill] sm:$0xff] }
 0x1e6   :  { %v7719_v26 = vadd.f32 %v1269_v4, %v1267_v50  ;;  %6657 = vtanh.f32 %v7717_v21  ;;  %v9366_v50 = vld [vmem:[#allocation109_spill] sm:$0xff]  ;;  %v9367_v4 = vld [vmem:[#allocation110_spill] sm:$0xff] }
 0x1e8   :  { %6659 = vtanh.f32 %v7719_v26 }
 0x1ee   :  { %v6654_v16 = vpop.eup %6653 }
 0x1ef   :  { %v6656_v35 = vpop.eup %6655 }
 0x1f0   :  { %v6658_v62 = vpop.eup %6657 }
 0x1f1   :  { %v7725_v51 = vmul.f32 %v6658_v62, %v6654_v16  ;;  %v9368_v16 = vld [vmem:[#allocation111_spill] sm:$0xff]  ;;  %v9370_v62 = vld [vmem:[#allocation113_spill] sm:$0xff] }
 0x1f2   :  { %v6660_v34 = vpop.eup %6659 }
 0x1f3   :  { %v7723_v44 = vmul.f32 %v6660_v34, %v6656_v35  ;;  %9356 = vst [vmem:[#allocation33_spill] sm:$0xff] %v7725_v51  ;;  %v9369_v35 = vld [vmem:[#allocation112_spill] sm:$0xff]  ;;  %v9371_v34 = vld [vmem:[#allocation114_spill] sm:$0xff] }
 0x1f5   :  { %9355 = vst [vmem:[#allocation28_spill] sm:$0xff] %v7723_v44  ;;  %1350 = vmatprep.mubr.f32.mxu0 %v7723_v44  ;;  %1421 = vmatprep.mubr.f32.mxu1 %v7723_v44 }
 0x1f6   :  { %1351 = vmatmul.mubr.f32.vlgmr.msra.gmra.mrb[2].mxu0 %v7725_v51  ;;  %1422 = vmatmul.mubr.f32.vlgmr.msra.gmra.mrb[2].mxu1 %v7725_v51 }
 0x1f7   :  { %4701 = vmatpush1.bf16.msra.mxu0 %v9357_v42  ;;  %4765 = vmatpush1.bf16.msra.mxu1 %v9358_v7 }
 0x1f8   :  { %1492 = vmatprep.mubr.f32.mxu0 %v7723_v44  ;;  %1563 = vmatprep.mubr.f32.mxu1 %v7723_v44  ;;  %v9372_v44 = vld [vmem:[#allocation115_spill] sm:$0xff] }
 0x1f9   :  { %4703 = vmatprep.subr.bf16.mxu0 %v9359_v63  ;;  %4767 = vmatprep.subr.bf16.mxu1 %v9360_v20 }
 0x1fb   :  { %4705 = vmatpush1.bf16.msra.mxu0 %v9361_v17  ;;  %4769 = vmatpush1.bf16.msra.mxu1 %v9362_v47  ;;  %v9373_v47 = vld [vmem:[#allocation116_spill] sm:$0xff] }
 0x1fc   :  { %4707 = vmatprep.subr.bf16.mxu0 %v9363_v49  ;;  %4771 = vmatprep.subr.bf16.mxu1 %v9364_v3  ;;  %v9374_v49 = vld [vmem:[#allocation117_spill] sm:$0xff]  ;;  %v9375_v3 = vld [vmem:[#allocation118_spill] sm:$0xff] }
 0x1ff   :  { %4709 = vmatpush1.bf16.msra.mxu0 %v9365_v48  ;;  %4773 = vmatpush1.bf16.msra.mxu1 %v9366_v50  ;;  %v9376_v48 = vld [vmem:[#allocation119_spill] sm:$0xff]  ;;  %v9377_v50 = vld [vmem:[#allocation120_spill] sm:$0xff] }
 0x200   :  { %4711 = vmatprep.subr.bf16.mxu0 %v9367_v4  ;;  %4775 = vmatprep.subr.bf16.mxu1 %v9368_v16  ;;  %v9378_v4 = vld [vmem:[#allocation121_spill] sm:$0xff]  ;;  %v9379_v16 = vld [vmem:[#allocation122_spill] sm:$0xff] }
 0x203   :  { %4713 = vmatpush1.bf16.msra.mxu0 %v9369_v35  ;;  %4777 = vmatpush1.bf16.msra.mxu1 %v9370_v62  ;;  %v9380_v35 = vld [vmem:[#allocation123_spill] sm:$0xff]  ;;  %v9381_v62 = vld [vmem:[#allocation124_spill] sm:$0xff] }
 0x204   :  { %4715 = vmatprep.subr.bf16.mxu0 %v9371_v34  ;;  %4779 = vmatprep.subr.bf16.mxu1 %v9372_v44  ;;  %v9382_v34 = vld [vmem:[#allocation125_spill] sm:$0xff]  ;;  %v9383_v44 = vld [vmem:[#allocation126_spill] sm:$0xff] }
 0x207   :  { %4717 = vmatpush1.bf16.msra.mxu0 %v9373_v47  ;;  %4781 = vmatpush1.bf16.msra.mxu1 %v9374_v49  ;;  %v9384_v47 = vld [vmem:[#allocation127_spill] sm:$0xff]  ;;  %v9385_v49 = vld [vmem:[#allocation128_spill] sm:$0xff] }
 0x208   :  { %4719 = vmatprep.subr.bf16.mxu0 %v9375_v3  ;;  %4783 = vmatprep.subr.bf16.mxu1 %v9376_v48  ;;  %v9386_v3 = vld [vmem:[#allocation129_spill] sm:$0xff]  ;;  %v9387_v48 = vld [vmem:[#allocation130_spill] sm:$0xff] }
 0x20b   :  { %4721 = vmatpush1.bf16.msra.mxu0 %v9377_v50  ;;  %4785 = vmatpush1.bf16.msra.mxu1 %v9378_v4  ;;  %v9388_v50 = vld [vmem:[#allocation131_spill] sm:$0xff]  ;;  %v9389_v4 = vld [vmem:[#allocation132_spill] sm:$0xff] }
 0x20c   :  { %4723 = vmatprep.subr.bf16.mxu0 %v9379_v16  ;;  %4787 = vmatprep.subr.bf16.mxu1 %v9380_v35  ;;  %v9390_v16 = vld [vmem:[#allocation133_spill] sm:$0xff]  ;;  %v9391_v35 = vld [vmem:[#allocation134_spill] sm:$0xff] }
 0x20f   :  { %4725 = vmatpush1.bf16.msra.mxu0 %v9381_v62  ;;  %4789 = vmatpush1.bf16.msra.mxu1 %v9382_v34  ;;  %v9392_v62 = vld [vmem:[#allocation135_spill] sm:$0xff]  ;;  %v9393_v34 = vld [vmem:[#allocation136_spill] sm:$0xff] }
 0x210   :  { %4727 = vmatprep.subr.bf16.mxu0 %v9383_v44  ;;  %4791 = vmatprep.subr.bf16.mxu1 %v9384_v47  ;;  %v9394_v44 = vld [vmem:[#allocation137_spill] sm:$0xff]  ;;  %v9395_v47 = vld [vmem:[#allocation138_spill] sm:$0xff] }
 0x213   :  { %4729 = vmatpush1.bf16.msra.mxu0 %v9385_v49  ;;  %4793 = vmatpush1.bf16.msra.mxu1 %v9386_v3  ;;  %v9396_v49 = vld [vmem:[#allocation139_spill] sm:$0xff]  ;;  %v9397_v3 = vld [vmem:[#allocation140_spill] sm:$0xff] }
 0x214   :  { %4731 = vmatprep.subr.bf16.mxu0 %v9387_v48  ;;  %4795 = vmatprep.subr.bf16.mxu1 %v9388_v50  ;;  %v9398_v48 = vld [vmem:[#allocation141_spill] sm:$0xff]  ;;  %v9399_v50 = vld [vmem:[#allocation142_spill] sm:$0xff] }
 0x217   :  { %4733 = vmatpush1.bf16.msra.mxu0 %v9389_v4  ;;  %4797 = vmatpush1.bf16.msra.mxu1 %v9390_v16  ;;  %v9400_v4 = vld [vmem:[#allocation143_spill] sm:$0xff]  ;;  %v9401_v16 = vld [vmem:[#allocation144_spill] sm:$0xff] }
 0x218   :  { %4735 = vmatprep.subr.bf16.mxu0 %v9391_v35  ;;  %4799 = vmatprep.subr.bf16.mxu1 %v9392_v62  ;;  %v9402_v35 = vld [vmem:[#allocation145_spill] sm:$0xff]  ;;  %v9403_v62 = vld [vmem:[#allocation146_spill] sm:$0xff] }
 0x21b   :  { %4737 = vmatpush1.bf16.msra.mxu0 %v9393_v34  ;;  %4801 = vmatpush1.bf16.msra.mxu1 %v9394_v44  ;;  %v9404_v34 = vld [vmem:[#allocation147_spill] sm:$0xff]  ;;  %v9405_v44 = vld [vmem:[#allocation148_spill] sm:$0xff] }
 0x21c   :  { %4739 = vmatprep.subr.bf16.mxu0 %v9395_v47  ;;  %4803 = vmatprep.subr.bf16.mxu1 %v9396_v49  ;;  %v9406_v47 = vld [vmem:[#allocation149_spill] sm:$0xff] }
 0x21f   :  { %4741 = vmatpush1.bf16.msra.mxu0 %v9397_v3  ;;  %4805 = vmatpush1.bf16.msra.mxu1 %v9398_v48  ;;  %v9407_v3 = vld [vmem:[#allocation151_spill] sm:$0xff] }
 0x220   :  { %4743 = vmatprep.subr.bf16.mxu0 %v9399_v50  ;;  %4807 = vmatprep.subr.bf16.mxu1 %v9400_v4 }
 0x223   :  { %4745 = vmatpush1.bf16.msra.mxu0 %v9401_v16  ;;  %4809 = vmatpush1.bf16.msra.mxu1 %v9402_v35 }
 0x224   :  { %4747 = vmatprep.subr.bf16.mxu0 %v9403_v62  ;;  %4811 = vmatprep.subr.bf16.mxu1 %v9404_v34 }
 0x227   :  { %4749 = vmatpush1.bf16.msra.mxu0 %v9405_v44  ;;  %4813 = vmatpush1.bf16.msra.mxu1 %v9406_v47 }
 0x228   :  { %4751 = vmatprep.subr.bf16.mxu0 %v7602_v22  ;;  %4815 = vmatprep.subr.bf16.mxu1 %v9407_v3 }
 0x22b   :  { %4753 = vmatpush1.bf16.msra.mxu0 %v7608_v9  ;;  %4817 = vmatpush1.bf16.msra.mxu1 %v7612_v24 }
 0x22c   :  { %4755 = vmatprep.subr.bf16.mxu0 %v7614_v30  ;;  %4819 = vmatprep.subr.bf16.mxu1 %v7617_v14 }
 0x22f   :  { %4757 = vmatpush1.bf16.msra.mxu0 %v7620_v6  ;;  %4821 = vmatpush1.bf16.msra.mxu1 %v7624_v1 }
 0x230   :  { %4759 = vmatprep.subr.bf16.mxu0 %v7626_v15  ;;  %4823 = vmatprep.subr.bf16.mxu1 %v7629_v25 }
 0x233   :  { %4761 = vmatpush1.bf16.msra.mxu0 %v7632_v23  ;;  %4825 = vmatpush1.bf16.msra.mxu1 %v7636_v2 }
 0x234   :  { %4827 = vmatprep.subr.bf16.mxu0 %v7253_v55  ;;  %4891 = vmatprep.subr.bf16.mxu1 %v7255_v59 }
 0x236   :  { %1493 = vmatmul.mubr.f32.vlgmr.msra.gmra.mrb[18].mxu0 %v7725_v51  ;;  %1564 = vmatmul.mubr.f32.vlgmr.msra.gmra.mrb[18].mxu1 %v7725_v51  ;;  %v9408_v51 = vld [vmem:[#allocation66_spill] sm:$0xff] }
 0x237   :  { %4829 = vmatpush1.bf16.msra.mxu0 %v7257_v60  ;;  %4893 = vmatpush1.bf16.msra.mxu1 %v7260_v0 }
 0x238   :  { %4831 = vmatprep.subr.bf16.mxu0 %v7264_v10  ;;  %4895 = vmatprep.subr.bf16.mxu1 %v7266_v11 }
 0x23b   :  { %4833 = vmatpush1.bf16.msra.mxu0 %v7269_v19  ;;  %4897 = vmatpush1.bf16.msra.mxu1 %v7273_v27 }
 0x23c   :  { %4835 = vmatprep.subr.bf16.mxu0 %v7275_v28  ;;  %4899 = vmatprep.subr.bf16.mxu1 %v7277_v32 }
 0x23f   :  { %4837 = vmatpush1.bf16.msra.mxu0 %v7280_v36  ;;  %4901 = vmatpush1.bf16.msra.mxu1 %v7284_v40 }
 0x240   :  { %4839 = vmatprep.subr.bf16.mxu0 %v7286_v41  ;;  %4903 = vmatprep.subr.bf16.mxu1 %v7289_v45 }
 0x243   :  { %4841 = vmatpush1.bf16.msra.mxu0 %v7292_v52  ;;  %4905 = vmatpush1.bf16.msra.mxu1 %v7296_v53 }
 0x244   :  { %4843 = vmatprep.subr.bf16.mxu0 %v7298_v54  ;;  %4907 = vmatprep.subr.bf16.mxu1 %v7301_v61 }
 0x247   :  { %4845 = vmatpush1.bf16.msra.mxu0 %v7304_v12  ;;  %4909 = vmatpush1.bf16.msra.mxu1 %v7308_v13  ;;  %v9443_v13 = vld [vmem:[#allocation27_spill] sm:$0xff]  ;;  %v9444_v12 = vld [vmem:[#allocation29_spill] sm:$0xff] }
 0x248   :  { %4847 = vmatprep.subr.bf16.mxu0 %v7310_v18  ;;  %4911 = vmatprep.subr.bf16.mxu1 %v7313_v29  ;;  %v9442_v18 = vld [vmem:[#allocation26_spill] sm:$0xff] }
 0x24b   :  { %4849 = vmatpush1.bf16.msra.mxu0 %v7316_v37  ;;  %4913 = vmatpush1.bf16.msra.mxu1 %v7320_v38  ;;  %v9409_v37 = vld [vmem:[#allocation67_spill] sm:$0xff]  ;;  %v9410_v38 = vld [vmem:[#allocation68_spill] sm:$0xff] }
 0x24c   :  { %4851 = vmatprep.subr.bf16.mxu0 %v7322_v39  ;;  %4915 = vmatprep.subr.bf16.mxu1 %v7325_v46  ;;  %v9411_v39 = vld [vmem:[#allocation69_spill] sm:$0xff]  ;;  %v9412_v46 = vld [vmem:[#allocation70_spill] sm:$0xff] }
 0x24f   :  { %4853 = vmatpush1.bf16.msra.mxu0 %v7328_v56  ;;  %4917 = vmatpush1.bf16.msra.mxu1 %v7332_v57  ;;  %v9413_v56 = vld [vmem:[#allocation71_spill] sm:$0xff]  ;;  %v9414_v57 = vld [vmem:[#allocation72_spill] sm:$0xff] }
 0x250   :  { %4855 = vmatprep.subr.bf16.mxu0 %v7334_v58  ;;  %4919 = vmatprep.subr.bf16.mxu1 %v7337_v8  ;;  %v9415_v58 = vld [vmem:[#allocation73_spill] sm:$0xff]  ;;  %v9416_v8 = vld [vmem:[#allocation74_spill] sm:$0xff] }
 0x253   :  { %4857 = vmatpush1.bf16.msra.mxu0 %v7340_v31  ;;  %4921 = vmatpush1.bf16.msra.mxu1 %v7344_v33  ;;  %v9417_v31 = vld [vmem:[#allocation75_spill] sm:$0xff]  ;;  %v9418_v33 = vld [vmem:[#allocation76_spill] sm:$0xff] }
 0x254   :  { %4859 = vmatprep.subr.bf16.mxu0 %v9408_v51  ;;  %4923 = vmatprep.subr.bf16.mxu1 %v9409_v37  ;;  %v9419_v51 = vld [vmem:[#allocation77_spill] sm:$0xff]  ;;  %v9420_v37 = vld [vmem:[#allocation78_spill] sm:$0xff] }
 0x257   :  { %4861 = vmatpush1.bf16.msra.mxu0 %v9410_v38  ;;  %4925 = vmatpush1.bf16.msra.mxu1 %v9411_v39  ;;  %v9421_v38 = vld [vmem:[#allocation79_spill] sm:$0xff]  ;;  %v9422_v39 = vld [vmem:[#allocation80_spill] sm:$0xff] }
 0x258   :  { %4863 = vmatprep.subr.bf16.mxu0 %v9412_v46  ;;  %4927 = vmatprep.subr.bf16.mxu1 %v9413_v56  ;;  %v9423_v46 = vld [vmem:[#allocation81_spill] sm:$0xff]  ;;  %v9424_v56 = vld [vmem:[#allocation82_spill] sm:$0xff] }
 0x25b   :  { %4865 = vmatpush1.bf16.msra.mxu0 %v9414_v57  ;;  %4929 = vmatpush1.bf16.msra.mxu1 %v9415_v58  ;;  %v9425_v57 = vld [vmem:[#allocation83_spill] sm:$0xff]  ;;  %v9426_v58 = vld [vmem:[#allocation84_spill] sm:$0xff] }
 0x25c   :  { %4867 = vmatprep.subr.bf16.mxu0 %v9416_v8  ;;  %4931 = vmatprep.subr.bf16.mxu1 %v9417_v31  ;;  %v9427_v8 = vld [vmem:[#allocation85_spill] sm:$0xff]  ;;  %v9428_v31 = vld [vmem:[#allocation86_spill] sm:$0xff] }
 0x25f   :  { %4869 = vmatpush1.bf16.msra.mxu0 %v9418_v33  ;;  %4933 = vmatpush1.bf16.msra.mxu1 %v9419_v51  ;;  %v9429_v33 = vld [vmem:[#allocation87_spill] sm:$0xff]  ;;  %v9430_v51 = vld [vmem:[#allocation88_spill] sm:$0xff] }
 0x260   :  { %4871 = vmatprep.subr.bf16.mxu0 %v9420_v37  ;;  %4935 = vmatprep.subr.bf16.mxu1 %v9421_v38  ;;  %v9431_v37 = vld [vmem:[#allocation89_spill] sm:$0xff]  ;;  %v9432_v38 = vld [vmem:[#allocation90_spill] sm:$0xff] }
 0x263   :  { %4873 = vmatpush1.bf16.msra.mxu0 %v9422_v39  ;;  %4937 = vmatpush1.bf16.msra.mxu1 %v9423_v46  ;;  %v9433_v39 = vld [vmem:[#allocation91_spill] sm:$0xff]  ;;  %v9434_v46 = vld [vmem:[#allocation92_spill] sm:$0xff] }
 0x264   :  { %4875 = vmatprep.subr.bf16.mxu0 %v9424_v56  ;;  %4939 = vmatprep.subr.bf16.mxu1 %v9425_v57  ;;  %v9435_v56 = vld [vmem:[#allocation93_spill] sm:$0xff]  ;;  %v9436_v57 = vld [vmem:[#allocation94_spill] sm:$0xff] }
 0x267   :  { %4877 = vmatpush1.bf16.msra.mxu0 %v9426_v58  ;;  %4941 = vmatpush1.bf16.msra.mxu1 %v9427_v8  ;;  %v9437_v58 = vld [vmem:[#allocation95_spill] sm:$0xff]  ;;  %v9438_v8 = vld [vmem:[#allocation96_spill] sm:$0xff] }
 0x268   :  { %4879 = vmatprep.subr.bf16.mxu0 %v9428_v31  ;;  %4943 = vmatprep.subr.bf16.mxu1 %v9429_v33  ;;  %v9439_v31 = vld [vmem:[#allocation97_spill] sm:$0xff]  ;;  %v9440_v33 = vld [vmem:[#allocation98_spill] sm:$0xff] }
 0x26b   :  { %4881 = vmatpush1.bf16.msra.mxu0 %v9430_v51  ;;  %4945 = vmatpush1.bf16.msra.mxu1 %v9431_v37  ;;  %v9441_v51 = vld [vmem:[#allocation99_spill] sm:$0xff] }
 0x26c   :  { %4883 = vmatprep.subr.bf16.mxu0 %v9432_v38  ;;  %4947 = vmatprep.subr.bf16.mxu1 %v9433_v39 }
 0x26f   :  { %4885 = vmatpush1.bf16.msra.mxu0 %v9434_v46  ;;  %4949 = vmatpush1.bf16.msra.mxu1 %v9435_v56 }
 0x270   :  { %4887 = vmatprep.subr.bf16.mxu0 %v9436_v57  ;;  %4951 = vmatprep.subr.bf16.mxu1 %v9437_v58 }
 0x273   :  { %4889 = vmatpush1.bf16.msra.mxu0 %v9438_v8  ;;  %4953 = vmatpush1.bf16.msra.mxu1 %v9439_v31 }
 0x274   :  { %4955 = vmatprep.subr.bf16.mxu0 %v9440_v33  ;;  %5019 = vmatprep.subr.bf16.mxu1 %v9441_v51 }
 0x2c9   :  { %v1352_v37 = vpop.f32.mrb[2].mxu0  ;;  %v1423_v38 = vpop.f32.mrb[2].mxu1 }
 0x2ca   :  { %v1354_v29 = vpop.f32.mrb[3].mxu0  ;;  %v1425_v39 = vpop.f32.mrb[3].mxu1  ;;  %v6492_v46 = vadd.f32 %v1352_v37, %v9442_v18  ;;  %v6508_v56 = vadd.f32 %v1423_v38, %v9348_v43 }
 0x2cb   :  { %v6493_v57 = vadd.f32 %v1354_v29, %v9443_v13  ;;  %v6509_v58 = vadd.f32 %v1425_v39, %v9444_v12 }
 0x2cc   :  { %v4254_v61 = vmul.f32 -1.442695, %v6492_v46  ;;  %v4256_v8 = vmul.f32 -1.442695, %v6508_v56  ;;  %v9445_v46 = vld [vmem:[#allocation30_spill] sm:$0xff] }
 0x2cd   :  { %v4255_v54 = vmul.f32 -1.442695, %v6493_v57  ;;  %v4257_v31 = vmul.f32 -1.442695, %v6509_v58  ;;  %v9446_v57 = vld [vmem:[#allocation32_spill] sm:$0xff] }
 0x2ce   :  { %6661 = vpow2.f32 %v4254_v61 }
 0x2cf   :  { %6663 = vpow2.f32 %v4256_v8  ;;  %v9447_v8 = vld [vmem:[#allocation31_spill] sm:$0xff] }
 0x2d0   :  { %6665 = vpow2.f32 %v4255_v54 }
 0x2d1   :  { %6667 = vpow2.f32 %v4257_v31 }
 0x2d8   :  { %v6662_v51 = vpop.eup %6661 }
 0x2d9   :  { %v6664_v33 = vpop.eup %6663  ;;  %v1596_v45 = vadd.f32 1.0, %v6662_v51 }
 0x2da   :  { %v6666_v53 = vpop.eup %6665  ;;  %v1598_v37 = vadd.f32 1.0, %v6664_v33 }
 0x2db   :  { %v6668_v52 = vpop.eup %6667  ;;  %v1597_v18 = vadd.f32 1.0, %v6666_v53  ;;  %6669 = vrcp.f32 %v1596_v45 }
 0x2dc   :  { %v1599_v38 = vadd.f32 1.0, %v6668_v52  ;;  %6671 = vrcp.f32 %v1598_v37 }
 0x2dd   :  { %6673 = vrcp.f32 %v1597_v18 }
 0x2de   :  { %6675 = vrcp.f32 %v1599_v38 }
 0x2e5   :  { %v6670_v45 = vpop.eup %6669 }
 0x2e6   :  { %v6672_v52 = vpop.eup %6671 }
 0x2e7   :  { %v6674_v18 = vpop.eup %6673 }
 0x2e8   :  { %v6676_v33 = vpop.eup %6675 }
 0x309   :  { %v1494_v29 = vpop.f32.mrb[18].mxu0  ;;  %v1565_v39 = vpop.f32.mrb[18].mxu1 }
 0x30a   :  { %v6524_v56 = vadd.f32 %v1494_v29, %v9445_v46  ;;  %v6540_v61 = vadd.f32 %v1565_v39, %v9446_v57  ;;  %v1496_v58 = vpop.f32.mrb[19].mxu0  ;;  %v1567_v54 = vpop.f32.mrb[19].mxu1  ;;  %v1616_v39 = vmul.f32 %v6672_v52, %v7717_v21 }
 0x30b   :  { %v6525_v31 = vadd.f32 %v1496_v58, %v9447_v8  ;;  %v6541_v12 = vadd.f32 %v1567_v54, %v9354_v5  ;;  %v1617_v58 = vmul.f32 %v6676_v33, %v7719_v26  ;;  %v9453_v33 = vld [vmem:[#allocation108_spill] sm:$0xff] }
 0x30c   :  { %v4258_v51 = vmul.f32 -1.442695, %v6524_v56  ;;  %6677 = vtanh.f32 %v6540_v61 }
 0x30d   :  { %v4259_v53 = vmul.f32 -1.442695, %v6525_v31  ;;  %6679 = vtanh.f32 %v6541_v12 }
 0x30e   :  { %6681 = vpow2.f32 %v4258_v51 }
 0x30f   :  { %6683 = vpow2.f32 %v4259_v53 }
 0x316   :  { %v6678_v37 = vpop.eup %6677 }
 0x317   :  { %v6680_v29 = vpop.eup %6679  ;;  %v1618_v57 = vmul.f32 %v6678_v37, %v6670_v45  ;;  %v9454_v37 = vld [vmem:[#allocation109_spill] sm:$0xff] }
 0x318   :  { %v6682_v38 = vpop.eup %6681  ;;  %v1619_v8 = vmul.f32 %v6680_v29, %v6674_v18  ;;  %v9452_v18 = vld [vmem:[#allocation107_spill] sm:$0xff]  ;;  %v9455_v29 = vld [vmem:[#allocation110_spill] sm:$0xff] }
 0x319   :  { %v6684_v54 = vpop.eup %6683  ;;  %v1600_v56 = vadd.f32 1.0, %v6682_v38  ;;  %v7873_v61 = vadd.f32 %v1618_v57, %v1616_v39  ;;  %v9450_v57 = vld [vmem:[#allocation105_spill] sm:$0xff]  ;;  %v9456_v39 = vld [vmem:[#allocation111_spill] sm:$0xff]  ;;  %v9457_v38 = vld [vmem:[#allocation112_spill] sm:$0xff] }
 0x31a   :  { %v1601_v12 = vadd.f32 1.0, %v6684_v54  ;;  %v7875_v31 = vadd.f32 %v1619_v8, %v1617_v58  ;;  %v9451_v8 = vld [vmem:[#allocation106_spill] sm:$0xff]  ;;  %v9458_v58 = vld [vmem:[#allocation113_spill] sm:$0xff] }
 0x31b   :  { %6685 = vrcp.f32 %v1600_v56  ;;  %v9459_v54 = vld [vmem:[#allocation114_spill] sm:$0xff]  ;;  %v9460_v56 = vld [vmem:[#allocation115_spill] sm:$0xff] }
 0x31c   :  { %6687 = vtanh.f32 %v7873_v61 }
 0x31d   :  { %6689 = vrcp.f32 %v1601_v12  ;;  %v9461_v12 = vld [vmem:[#allocation116_spill] sm:$0xff] }
 0x31e   :  { %6691 = vtanh.f32 %v7875_v31 }
 0x325   :  { %v6686_v51 = vpop.eup %6685 }
 0x326   :  { %v6688_v21 = vpop.eup %6687 }
 0x327   :  { %v6690_v53 = vpop.eup %6689  ;;  %v7881_v26 = vmul.f32 %v6688_v21, %v6686_v51  ;;  %v9462_v51 = vld [vmem:[#allocation117_spill] sm:$0xff]  ;;  %v9463_v21 = vld [vmem:[#allocation118_spill] sm:$0xff] }
 0x328   :  { %v6692_v45 = vpop.eup %6691 }
 0x329   :  { %v7879_v52 = vmul.f32 %v6692_v45, %v6690_v53  ;;  %9449 = vst [vmem:[#allocation101_spill] sm:$0xff] %v7881_v26  ;;  %v9464_v53 = vld [vmem:[#allocation119_spill] sm:$0xff]  ;;  %v9465_v45 = vld [vmem:[#allocation120_spill] sm:$0xff] }
 0x32b   :  { %9448 = vst [vmem:[#allocation100_spill] sm:$0xff] %v7879_v52  ;;  %1700 = vmatprep.mubr.f32.mxu0 %v7879_v52  ;;  %1771 = vmatprep.mubr.f32.mxu1 %v7879_v52 }
 0x32c   :  { %1701 = vmatmul.mubr.f32.vlgmr.msra.gmra.mrb[4].mxu0 %v7881_v26  ;;  %1772 = vmatmul.mubr.f32.vlgmr.msra.gmra.mrb[4].mxu1 %v7881_v26 }
 0x32d   :  { %4957 = vmatpush1.bf16.msra.mxu0 %v9357_v42  ;;  %5021 = vmatpush1.bf16.msra.mxu1 %v9358_v7 }
 0x32e   :  { %1842 = vmatprep.mubr.f32.mxu0 %v7879_v52  ;;  %1913 = vmatprep.mubr.f32.mxu1 %v7879_v52  ;;  %v9466_v52 = vld [vmem:[#allocation121_spill] sm:$0xff] }
 0x32f   :  { %4959 = vmatprep.subr.bf16.mxu0 %v9359_v63  ;;  %5023 = vmatprep.subr.bf16.mxu1 %v9360_v20 }
 0x331   :  { %4961 = vmatpush1.bf16.msra.mxu0 %v9361_v17  ;;  %5025 = vmatpush1.bf16.msra.mxu1 %v9450_v57 }
 0x332   :  { %4963 = vmatprep.subr.bf16.mxu0 %v9451_v8  ;;  %5027 = vmatprep.subr.bf16.mxu1 %v9452_v18 }
 0x335   :  { %4965 = vmatpush1.bf16.msra.mxu0 %v9453_v33  ;;  %5029 = vmatpush1.bf16.msra.mxu1 %v9454_v37 }
 0x336   :  { %4967 = vmatprep.subr.bf16.mxu0 %v9455_v29  ;;  %5031 = vmatprep.subr.bf16.mxu1 %v9456_v39  ;;  %v9467_v39 = vld [vmem:[#allocation122_spill] sm:$0xff] }
 0x339   :  { %4969 = vmatpush1.bf16.msra.mxu0 %v9457_v38  ;;  %5033 = vmatpush1.bf16.msra.mxu1 %v9458_v58  ;;  %v9468_v38 = vld [vmem:[#allocation123_spill] sm:$0xff]  ;;  %v9469_v58 = vld [vmem:[#allocation124_spill] sm:$0xff] }
 0x33a   :  { %4971 = vmatprep.subr.bf16.mxu0 %v9459_v54  ;;  %5035 = vmatprep.subr.bf16.mxu1 %v9460_v56  ;;  %v9470_v54 = vld [vmem:[#allocation125_spill] sm:$0xff]  ;;  %v9471_v56 = vld [vmem:[#allocation126_spill] sm:$0xff] }
 0x33d   :  { %4973 = vmatpush1.bf16.msra.mxu0 %v9461_v12  ;;  %5037 = vmatpush1.bf16.msra.mxu1 %v9462_v51  ;;  %v9472_v12 = vld [vmem:[#allocation127_spill] sm:$0xff]  ;;  %v9473_v51 = vld [vmem:[#allocation128_spill] sm:$0xff] }
 0x33e   :  { %4975 = vmatprep.subr.bf16.mxu0 %v9463_v21  ;;  %5039 = vmatprep.subr.bf16.mxu1 %v9464_v53  ;;  %v9474_v21 = vld [vmem:[#allocation129_spill] sm:$0xff]  ;;  %v9475_v53 = vld [vmem:[#allocation130_spill] sm:$0xff] }
 0x341   :  { %4977 = vmatpush1.bf16.msra.mxu0 %v9465_v45  ;;  %5041 = vmatpush1.bf16.msra.mxu1 %v9466_v52  ;;  %v9476_v45 = vld [vmem:[#allocation131_spill] sm:$0xff]  ;;  %v9477_v52 = vld [vmem:[#allocation132_spill] sm:$0xff] }
 0x342   :  { %4979 = vmatprep.subr.bf16.mxu0 %v9467_v39  ;;  %5043 = vmatprep.subr.bf16.mxu1 %v9468_v38  ;;  %v9478_v39 = vld [vmem:[#allocation133_spill] sm:$0xff]  ;;  %v9479_v38 = vld [vmem:[#allocation134_spill] sm:$0xff] }
 0x345   :  { %4981 = vmatpush1.bf16.msra.mxu0 %v9469_v58  ;;  %5045 = vmatpush1.bf16.msra.mxu1 %v9470_v54  ;;  %v9480_v58 = vld [vmem:[#allocation135_spill] sm:$0xff]  ;;  %v9481_v54 = vld [vmem:[#allocation136_spill] sm:$0xff] }
 0x346   :  { %4983 = vmatprep.subr.bf16.mxu0 %v9471_v56  ;;  %5047 = vmatprep.subr.bf16.mxu1 %v9472_v12  ;;  %v9482_v56 = vld [vmem:[#allocation137_spill] sm:$0xff]  ;;  %v9483_v12 = vld [vmem:[#allocation138_spill] sm:$0xff] }
 0x349   :  { %4985 = vmatpush1.bf16.msra.mxu0 %v9473_v51  ;;  %5049 = vmatpush1.bf16.msra.mxu1 %v9474_v21  ;;  %v9484_v21 = vld [vmem:[#allocation140_spill] sm:$0xff] }
 0x34a   :  { %4987 = vmatprep.subr.bf16.mxu0 %v9475_v53  ;;  %5051 = vmatprep.subr.bf16.mxu1 %v9476_v45 }
 0x34d   :  { %4989 = vmatpush1.bf16.msra.mxu0 %v9477_v52  ;;  %5053 = vmatpush1.bf16.msra.mxu1 %v9478_v39 }
 0x34e   :  { %4991 = vmatprep.subr.bf16.mxu0 %v9479_v38  ;;  %5055 = vmatprep.subr.bf16.mxu1 %v9480_v58 }
 0x351   :  { %4993 = vmatpush1.bf16.msra.mxu0 %v9481_v54  ;;  %5057 = vmatpush1.bf16.msra.mxu1 %v9482_v56 }
 0x352   :  { %4995 = vmatprep.subr.bf16.mxu0 %v9483_v12  ;;  %5059 = vmatprep.subr.bf16.mxu1 %v9396_v49 }
 0x355   :  { %4997 = vmatpush1.bf16.msra.mxu0 %v9484_v21  ;;  %5061 = vmatpush1.bf16.msra.mxu1 %v9398_v48 }
 0x356   :  { %4999 = vmatprep.subr.bf16.mxu0 %v9399_v50  ;;  %5063 = vmatprep.subr.bf16.mxu1 %v9400_v4 }
 0x359   :  { %5001 = vmatpush1.bf16.msra.mxu0 %v9401_v16  ;;  %5065 = vmatpush1.bf16.msra.mxu1 %v9402_v35 }
 0x35a   :  { %5003 = vmatprep.subr.bf16.mxu0 %v9403_v62  ;;  %5067 = vmatprep.subr.bf16.mxu1 %v9404_v34 }
 0x35d   :  { %5005 = vmatpush1.bf16.msra.mxu0 %v9405_v44  ;;  %5069 = vmatpush1.bf16.msra.mxu1 %v9406_v47 }
 0x35e   :  { %5007 = vmatprep.subr.bf16.mxu0 %v7602_v22  ;;  %5071 = vmatprep.subr.bf16.mxu1 %v9407_v3 }
 0x361   :  { %5009 = vmatpush1.bf16.msra.mxu0 %v7608_v9  ;;  %5073 = vmatpush1.bf16.msra.mxu1 %v7612_v24 }
 0x362   :  { %5011 = vmatprep.subr.bf16.mxu0 %v7614_v30  ;;  %5075 = vmatprep.subr.bf16.mxu1 %v7617_v14 }
 0x365   :  { %5013 = vmatpush1.bf16.msra.mxu0 %v7620_v6  ;;  %5077 = vmatpush1.bf16.msra.mxu1 %v7624_v1 }
 0x366   :  { %5015 = vmatprep.subr.bf16.mxu0 %v7626_v15  ;;  %5079 = vmatprep.subr.bf16.mxu1 %v7629_v25 }
 0x369   :  { %5017 = vmatpush1.bf16.msra.mxu0 %v7632_v23  ;;  %5081 = vmatpush1.bf16.msra.mxu1 %v7636_v2 }
 0x36a   :  { %5083 = vmatprep.subr.bf16.mxu0 %v7253_v55  ;;  %5147 = vmatprep.subr.bf16.mxu1 %v7255_v59  ;;  %v9538_v59 = vld [vmem:[#allocation26_spill] sm:$0xff]  ;;  %v9539_v55 = vld [vmem:[#allocation29_spill] sm:$0xff] }
 0x36c   :  { %1843 = vmatmul.mubr.f32.vlgmr.msra.gmra.mrb[20].mxu0 %v7881_v26  ;;  %1914 = vmatmul.mubr.f32.vlgmr.msra.gmra.mrb[20].mxu1 %v7881_v26  ;;  %v9485_v26 = vld [vmem:[#allocation47_spill] sm:$0xff] }
 0x36d   :  { %5085 = vmatpush1.bf16.msra.mxu0 %v7257_v60  ;;  %5149 = vmatpush1.bf16.msra.mxu1 %v7260_v0  ;;  %v9486_v0 = vld [vmem:[#allocation48_spill] sm:$0xff] }
 0x36e   :  { %5087 = vmatprep.subr.bf16.mxu0 %v7264_v10  ;;  %5151 = vmatprep.subr.bf16.mxu1 %v7266_v11  ;;  %v9487_v10 = vld [vmem:[#allocation49_spill] sm:$0xff]  ;;  %v9488_v11 = vld [vmem:[#allocation50_spill] sm:$0xff] }
 0x371   :  { %5089 = vmatpush1.bf16.msra.mxu0 %v7269_v19  ;;  %5153 = vmatpush1.bf16.msra.mxu1 %v7273_v27  ;;  %v9489_v19 = vld [vmem:[#allocation51_spill] sm:$0xff]  ;;  %v9490_v27 = vld [vmem:[#allocation52_spill] sm:$0xff] }
 0x372   :  { %5091 = vmatprep.subr.bf16.mxu0 %v7275_v28  ;;  %5155 = vmatprep.subr.bf16.mxu1 %v7277_v32  ;;  %v9491_v28 = vld [vmem:[#allocation53_spill] sm:$0xff]  ;;  %v9492_v32 = vld [vmem:[#allocation54_spill] sm:$0xff] }
 0x375   :  { %5093 = vmatpush1.bf16.msra.mxu0 %v7280_v36  ;;  %5157 = vmatpush1.bf16.msra.mxu1 %v7284_v40  ;;  %v9493_v36 = vld [vmem:[#allocation55_spill] sm:$0xff]  ;;  %v9494_v40 = vld [vmem:[#allocation56_spill] sm:$0xff] }
 0x376   :  { %5095 = vmatprep.subr.bf16.mxu0 %v7286_v41  ;;  %5159 = vmatprep.subr.bf16.mxu1 %v9485_v26  ;;  %v9495_v41 = vld [vmem:[#allocation57_spill] sm:$0xff]  ;;  %v9496_v26 = vld [vmem:[#allocation58_spill] sm:$0xff] }
 0x379   :  { %5097 = vmatpush1.bf16.msra.mxu0 %v9486_v0  ;;  %5161 = vmatpush1.bf16.msra.mxu1 %v9487_v10  ;;  %v9497_v0 = vld [vmem:[#allocation59_spill] sm:$0xff]  ;;  %v9498_v10 = vld [vmem:[#allocation60_spill] sm:$0xff] }
 0x37a   :  { %5099 = vmatprep.subr.bf16.mxu0 %v9488_v11  ;;  %5163 = vmatprep.subr.bf16.mxu1 %v9489_v19  ;;  %v9499_v11 = vld [vmem:[#allocation61_spill] sm:$0xff]  ;;  %v9500_v19 = vld [vmem:[#allocation62_spill] sm:$0xff] }
 0x37d   :  { %5101 = vmatpush1.bf16.msra.mxu0 %v9490_v27  ;;  %5165 = vmatpush1.bf16.msra.mxu1 %v9491_v28  ;;  %v9501_v27 = vld [vmem:[#allocation63_spill] sm:$0xff]  ;;  %v9502_v28 = vld [vmem:[#allocation64_spill] sm:$0xff] }
 0x37e   :  { %5103 = vmatprep.subr.bf16.mxu0 %v9492_v32  ;;  %5167 = vmatprep.subr.bf16.mxu1 %v9493_v36  ;;  %v9503_v32 = vld [vmem:[#allocation65_spill] sm:$0xff]  ;;  %v9504_v36 = vld [vmem:[#allocation66_spill] sm:$0xff] }
 0x381   :  { %5105 = vmatpush1.bf16.msra.mxu0 %v9494_v40  ;;  %5169 = vmatpush1.bf16.msra.mxu1 %v9495_v41  ;;  %v9505_v40 = vld [vmem:[#allocation67_spill] sm:$0xff]  ;;  %v9506_v41 = vld [vmem:[#allocation68_spill] sm:$0xff] }
 0x382   :  { %5107 = vmatprep.subr.bf16.mxu0 %v9496_v26  ;;  %5171 = vmatprep.subr.bf16.mxu1 %v9497_v0  ;;  %v9507_v26 = vld [vmem:[#allocation69_spill] sm:$0xff]  ;;  %v9508_v0 = vld [vmem:[#allocation70_spill] sm:$0xff] }
 0x385   :  { %5109 = vmatpush1.bf16.msra.mxu0 %v9498_v10  ;;  %5173 = vmatpush1.bf16.msra.mxu1 %v9499_v11  ;;  %v9509_v10 = vld [vmem:[#allocation71_spill] sm:$0xff]  ;;  %v9510_v11 = vld [vmem:[#allocation72_spill] sm:$0xff] }
 0x386   :  { %5111 = vmatprep.subr.bf16.mxu0 %v9500_v19  ;;  %5175 = vmatprep.subr.bf16.mxu1 %v9501_v27  ;;  %v9511_v19 = vld [vmem:[#allocation73_spill] sm:$0xff]  ;;  %v9512_v27 = vld [vmem:[#allocation74_spill] sm:$0xff] }
 0x389   :  { %5113 = vmatpush1.bf16.msra.mxu0 %v9502_v28  ;;  %5177 = vmatpush1.bf16.msra.mxu1 %v9503_v32  ;;  %v9513_v28 = vld [vmem:[#allocation75_spill] sm:$0xff]  ;;  %v9514_v32 = vld [vmem:[#allocation76_spill] sm:$0xff] }
 0x38a   :  { %5115 = vmatprep.subr.bf16.mxu0 %v9504_v36  ;;  %5179 = vmatprep.subr.bf16.mxu1 %v9505_v40  ;;  %v9515_v36 = vld [vmem:[#allocation77_spill] sm:$0xff]  ;;  %v9516_v40 = vld [vmem:[#allocation78_spill] sm:$0xff] }
 0x38d   :  { %5117 = vmatpush1.bf16.msra.mxu0 %v9506_v41  ;;  %5181 = vmatpush1.bf16.msra.mxu1 %v9507_v26  ;;  %v9517_v41 = vld [vmem:[#allocation79_spill] sm:$0xff]  ;;  %v9518_v26 = vld [vmem:[#allocation80_spill] sm:$0xff] }
 0x38e   :  { %5119 = vmatprep.subr.bf16.mxu0 %v9508_v0  ;;  %5183 = vmatprep.subr.bf16.mxu1 %v9509_v10  ;;  %v9519_v0 = vld [vmem:[#allocation81_spill] sm:$0xff]  ;;  %v9520_v10 = vld [vmem:[#allocation82_spill] sm:$0xff] }
 0x391   :  { %5121 = vmatpush1.bf16.msra.mxu0 %v9510_v11  ;;  %5185 = vmatpush1.bf16.msra.mxu1 %v9511_v19  ;;  %v9521_v11 = vld [vmem:[#allocation83_spill] sm:$0xff]  ;;  %v9522_v19 = vld [vmem:[#allocation84_spill] sm:$0xff] }
 0x392   :  { %5123 = vmatprep.subr.bf16.mxu0 %v9512_v27  ;;  %5187 = vmatprep.subr.bf16.mxu1 %v9513_v28  ;;  %v9523_v27 = vld [vmem:[#allocation85_spill] sm:$0xff]  ;;  %v9524_v28 = vld [vmem:[#allocation86_spill] sm:$0xff] }
 0x395   :  { %5125 = vmatpush1.bf16.msra.mxu0 %v9514_v32  ;;  %5189 = vmatpush1.bf16.msra.mxu1 %v9515_v36  ;;  %v9525_v32 = vld [vmem:[#allocation87_spill] sm:$0xff]  ;;  %v9526_v36 = vld [vmem:[#allocation88_spill] sm:$0xff] }
 0x396   :  { %5127 = vmatprep.subr.bf16.mxu0 %v9516_v40  ;;  %5191 = vmatprep.subr.bf16.mxu1 %v9517_v41  ;;  %v9527_v40 = vld [vmem:[#allocation89_spill] sm:$0xff]  ;;  %v9528_v41 = vld [vmem:[#allocation90_spill] sm:$0xff] }
 0x399   :  { %5129 = vmatpush1.bf16.msra.mxu0 %v9518_v26  ;;  %5193 = vmatpush1.bf16.msra.mxu1 %v9519_v0  ;;  %v9529_v26 = vld [vmem:[#allocation91_spill] sm:$0xff]  ;;  %v9530_v0 = vld [vmem:[#allocation92_spill] sm:$0xff] }
 0x39a   :  { %5131 = vmatprep.subr.bf16.mxu0 %v9520_v10  ;;  %5195 = vmatprep.subr.bf16.mxu1 %v9521_v11  ;;  %v9531_v10 = vld [vmem:[#allocation93_spill] sm:$0xff]  ;;  %v9532_v11 = vld [vmem:[#allocation94_spill] sm:$0xff] }
 0x39d   :  { %5133 = vmatpush1.bf16.msra.mxu0 %v9522_v19  ;;  %5197 = vmatpush1.bf16.msra.mxu1 %v9523_v27  ;;  %v9533_v19 = vld [vmem:[#allocation95_spill] sm:$0xff]  ;;  %v9534_v27 = vld [vmem:[#allocation96_spill] sm:$0xff] }
 0x39e   :  { %5135 = vmatprep.subr.bf16.mxu0 %v9524_v28  ;;  %5199 = vmatprep.subr.bf16.mxu1 %v9525_v32  ;;  %v9535_v28 = vld [vmem:[#allocation97_spill] sm:$0xff]  ;;  %v9536_v32 = vld [vmem:[#allocation98_spill] sm:$0xff] }
 0x3a1   :  { %5137 = vmatpush1.bf16.msra.mxu0 %v9526_v36  ;;  %5201 = vmatpush1.bf16.msra.mxu1 %v9527_v40  ;;  %v9537_v36 = vld [vmem:[#allocation99_spill] sm:$0xff] }
 0x3a2   :  { %5139 = vmatprep.subr.bf16.mxu0 %v9528_v41  ;;  %5203 = vmatprep.subr.bf16.mxu1 %v9529_v26 }
 0x3a5   :  { %5141 = vmatpush1.bf16.msra.mxu0 %v9530_v0  ;;  %5205 = vmatpush1.bf16.msra.mxu1 %v9531_v10 }
 0x3a6   :  { %5143 = vmatprep.subr.bf16.mxu0 %v9532_v11  ;;  %5207 = vmatprep.subr.bf16.mxu1 %v9533_v19 }
 0x3a9   :  { %5145 = vmatpush1.bf16.msra.mxu0 %v9534_v27  ;;  %5209 = vmatpush1.bf16.msra.mxu1 %v9535_v28 }
 0x3aa   :  { %5211 = vmatprep.subr.bf16.mxu0 %v9536_v32  ;;  %5275 = vmatprep.subr.bf16.mxu1 %v9537_v36 }
 0x3ff   :  { %v1702_v40 = vpop.f32.mrb[4].mxu0  ;;  %v1773_v41 = vpop.f32.mrb[4].mxu1 }
 0x400   :  { %v1704_v60 = vpop.f32.mrb[5].mxu0  ;;  %v1775_v26 = vpop.f32.mrb[5].mxu1  ;;  %v6494_v0 = vadd.f32 %v1702_v40, %v9538_v59  ;;  %v6510_v10 = vadd.f32 %v1773_v41, %v9348_v43 }
 0x401   :  { %v6495_v11 = vadd.f32 %v1704_v60, %v9443_v13  ;;  %v6511_v19 = vadd.f32 %v1775_v26, %v9539_v55 }
 0x402   :  { %v4260_v2 = vmul.f32 -1.442695, %v6494_v0  ;;  %v4262_v27 = vmul.f32 -1.442695, %v6510_v10  ;;  %v9540_v10 = vld [vmem:[#allocation32_spill] sm:$0xff] }
 0x403   :  { %v4261_v23 = vmul.f32 -1.442695, %v6495_v11  ;;  %v4263_v28 = vmul.f32 -1.442695, %v6511_v19 }
 0x404   :  { %6693 = vpow2.f32 %v4260_v2 }
 0x405   :  { %6695 = vpow2.f32 %v4262_v27 }
 0x406   :  { %6697 = vpow2.f32 %v4261_v23 }
 0x407   :  { %6699 = vpow2.f32 %v4263_v28  ;;  %v9541_v28 = vld [vmem:[#allocation31_spill] sm:$0xff] }
 0x40e   :  { %v6694_v36 = vpop.eup %6693 }
 0x40f   :  { %v6696_v32 = vpop.eup %6695  ;;  %v1946_v1 = vadd.f32 1.0, %v6694_v36 }
 0x410   :  { %v6698_v25 = vpop.eup %6697  ;;  %v1948_v40 = vadd.f32 1.0, %v6696_v32 }
 0x411   :  { %v6700_v15 = vpop.eup %6699  ;;  %v1947_v59 = vadd.f32 1.0, %v6698_v25  ;;  %6701 = vrcp.f32 %v1946_v1 }
 0x412   :  { %v1949_v41 = vadd.f32 1.0, %v6700_v15  ;;  %6703 = vrcp.f32 %v1948_v40 }
 0x413   :  { %6705 = vrcp.f32 %v1947_v59 }
 0x414   :  { %6707 = vrcp.f32 %v1949_v41 }
 0x41b   :  { %v6702_v1 = vpop.eup %6701 }
 0x41c   :  { %v6704_v15 = vpop.eup %6703 }
 0x41d   :  { %v6706_v59 = vpop.eup %6705 }
 0x41e   :  { %v6708_v25 = vpop.eup %6707 }
 0x43f   :  { %v1844_v60 = vpop.f32.mrb[20].mxu0  ;;  %v1915_v26 = vpop.f32.mrb[20].mxu1 }
 0x440   :  { %v6526_v0 = vadd.f32 %v1844_v60, %v9445_v46  ;;  %v6542_v11 = vadd.f32 %v1915_v26, %v9540_v10  ;;  %v1846_v19 = vpop.f32.mrb[21].mxu0  ;;  %v1917_v27 = vpop.f32.mrb[21].mxu1  ;;  %v1966_v26 = vmul.f32 %v6704_v15, %v7873_v61 }
 0x441   :  { %v6527_v23 = vadd.f32 %v1846_v19, %v9541_v28  ;;  %v6543_v2 = vadd.f32 %v1917_v27, %v9354_v5  ;;  %v1967_v19 = vmul.f32 %v6708_v25, %v7875_v31  ;;  %v9547_v25 = vld [vmem:[#allocation114_spill] sm:$0xff] }
 0x442   :  { %v4264_v36 = vmul.f32 -1.442695, %v6526_v0  ;;  %6709 = vtanh.f32 %v6542_v11 }
 0x443   :  { %v4265_v32 = vmul.f32 -1.442695, %v6527_v23  ;;  %6711 = vtanh.f32 %v6543_v2 }
 0x444   :  { %6713 = vpow2.f32 %v4264_v36 }
 0x445   :  { %6715 = vpow2.f32 %v4265_v32 }
 0x44c   :  { %v6710_v40 = vpop.eup %6709 }
 0x44d   :  { %v6712_v60 = vpop.eup %6711  ;;  %v1968_v10 = vmul.f32 %v6710_v40, %v6702_v1  ;;  %v9548_v40 = vld [vmem:[#allocation115_spill] sm:$0xff] }
 0x44e   :  { %v6714_v41 = vpop.eup %6713  ;;  %v1969_v28 = vmul.f32 %v6712_v60, %v6706_v59  ;;  %v9546_v59 = vld [vmem:[#allocation113_spill] sm:$0xff]  ;;  %v9549_v60 = vld [vmem:[#allocation116_spill] sm:$0xff] }
 0x44f   :  { %v6716_v27 = vpop.eup %6715  ;;  %v1950_v0 = vadd.f32 1.0, %v6714_v41  ;;  %v8029_v11 = vadd.f32 %v1968_v10, %v1966_v26  ;;  %v9544_v10 = vld [vmem:[#allocation111_spill] sm:$0xff]  ;;  %v9550_v26 = vld [vmem:[#allocation117_spill] sm:$0xff]  ;;  %v9551_v41 = vld [vmem:[#allocation118_spill] sm:$0xff] }
 0x450   :  { %v1951_v23 = vadd.f32 1.0, %v6716_v27  ;;  %v8031_v2 = vadd.f32 %v1969_v28, %v1967_v19  ;;  %v9545_v28 = vld [vmem:[#allocation112_spill] sm:$0xff]  ;;  %v9552_v19 = vld [vmem:[#allocation119_spill] sm:$0xff] }
 0x451   :  { %6717 = vrcp.f32 %v1950_v0  ;;  %v9553_v27 = vld [vmem:[#allocation120_spill] sm:$0xff]  ;;  %v9554_v0 = vld [vmem:[#allocation121_spill] sm:$0xff] }
 0x452   :  { %6719 = vtanh.f32 %v8029_v11 }
 0x453   :  { %6721 = vrcp.f32 %v1951_v23  ;;  %v9555_v23 = vld [vmem:[#allocation122_spill] sm:$0xff] }
 0x454   :  { %6723 = vtanh.f32 %v8031_v2 }
 0x45b   :  { %v6718_v36 = vpop.eup %6717 }
 0x45c   :  { %v6720_v61 = vpop.eup %6719 }
 0x45d   :  { %v6722_v32 = vpop.eup %6721  ;;  %v8037_v31 = vmul.f32 %v6720_v61, %v6718_v36  ;;  %v9556_v36 = vld [vmem:[#allocation123_spill] sm:$0xff]  ;;  %v9557_v61 = vld [vmem:[#allocation124_spill] sm:$0xff] }
 0x45e   :  { %v6724_v1 = vpop.eup %6723 }
 0x45f   :  { %v8035_v15 = vmul.f32 %v6724_v1, %v6722_v32  ;;  %9543 = vst [vmem:[#allocation103_spill] sm:$0xff] %v8037_v31  ;;  %v9558_v32 = vld [vmem:[#allocation125_spill] sm:$0xff]  ;;  %v9559_v1 = vld [vmem:[#allocation126_spill] sm:$0xff] }
 0x461   :  { %9542 = vst [vmem:[#allocation102_spill] sm:$0xff] %v8035_v15  ;;  %2050 = vmatprep.mubr.f32.mxu0 %v8035_v15  ;;  %2121 = vmatprep.mubr.f32.mxu1 %v8035_v15 }
 0x462   :  { %2051 = vmatmul.mubr.f32.vlgmr.msra.gmra.mrb[6].mxu0 %v8037_v31  ;;  %2122 = vmatmul.mubr.f32.vlgmr.msra.gmra.mrb[6].mxu1 %v8037_v31 }
 0x463   :  { %5213 = vmatpush1.bf16.msra.mxu0 %v9357_v42  ;;  %5277 = vmatpush1.bf16.msra.mxu1 %v9358_v7 }
 0x464   :  { %2192 = vmatprep.mubr.f32.mxu0 %v8035_v15  ;;  %2263 = vmatprep.mubr.f32.mxu1 %v8035_v15  ;;  %v9560_v15 = vld [vmem:[#allocation127_spill] sm:$0xff] }
 0x465   :  { %5215 = vmatprep.subr.bf16.mxu0 %v9359_v63  ;;  %5279 = vmatprep.subr.bf16.mxu1 %v9360_v20 }
 0x467   :  { %5217 = vmatpush1.bf16.msra.mxu0 %v9361_v17  ;;  %5281 = vmatpush1.bf16.msra.mxu1 %v9450_v57 }
 0x468   :  { %5219 = vmatprep.subr.bf16.mxu0 %v9451_v8  ;;  %5283 = vmatprep.subr.bf16.mxu1 %v9452_v18 }
 0x46b   :  { %5221 = vmatpush1.bf16.msra.mxu0 %v9453_v33  ;;  %5285 = vmatpush1.bf16.msra.mxu1 %v9454_v37 }
 0x46c   :  { %5223 = vmatprep.subr.bf16.mxu0 %v9455_v29  ;;  %5287 = vmatprep.subr.bf16.mxu1 %v9544_v10 }
 0x46f   :  { %5225 = vmatpush1.bf16.msra.mxu0 %v9545_v28  ;;  %5289 = vmatpush1.bf16.msra.mxu1 %v9546_v59 }
 0x470   :  { %5227 = vmatprep.subr.bf16.mxu0 %v9547_v25  ;;  %5291 = vmatprep.subr.bf16.mxu1 %v9548_v40 }
 0x473   :  { %5229 = vmatpush1.bf16.msra.mxu0 %v9549_v60  ;;  %5293 = vmatpush1.bf16.msra.mxu1 %v9550_v26 }
 0x474   :  { %5231 = vmatprep.subr.bf16.mxu0 %v9551_v41  ;;  %5295 = vmatprep.subr.bf16.mxu1 %v9552_v19  ;;  %v9561_v41 = vld [vmem:[#allocation129_spill] sm:$0xff] }
 0x477   :  { %5233 = vmatpush1.bf16.msra.mxu0 %v9553_v27  ;;  %5297 = vmatpush1.bf16.msra.mxu1 %v9554_v0 }
 0x478   :  { %5235 = vmatprep.subr.bf16.mxu0 %v9555_v23  ;;  %5299 = vmatprep.subr.bf16.mxu1 %v9556_v36 }
 0x47b   :  { %5237 = vmatpush1.bf16.msra.mxu0 %v9557_v61  ;;  %5301 = vmatpush1.bf16.msra.mxu1 %v9558_v32 }
 0x47c   :  { %5239 = vmatprep.subr.bf16.mxu0 %v9559_v1  ;;  %5303 = vmatprep.subr.bf16.mxu1 %v9560_v15 }
 0x47f   :  { %5241 = vmatpush1.bf16.msra.mxu0 %v9473_v51  ;;  %5305 = vmatpush1.bf16.msra.mxu1 %v9561_v41 }
 0x480   :  { %5243 = vmatprep.subr.bf16.mxu0 %v9475_v53  ;;  %5307 = vmatprep.subr.bf16.mxu1 %v9476_v45 }
 0x483   :  { %5245 = vmatpush1.bf16.msra.mxu0 %v9477_v52  ;;  %5309 = vmatpush1.bf16.msra.mxu1 %v9478_v39 }
 0x484   :  { %5247 = vmatprep.subr.bf16.mxu0 %v9479_v38  ;;  %5311 = vmatprep.subr.bf16.mxu1 %v9480_v58 }
 0x487   :  { %5249 = vmatpush1.bf16.msra.mxu0 %v9481_v54  ;;  %5313 = vmatpush1.bf16.msra.mxu1 %v9482_v56 }
 0x488   :  { %5251 = vmatprep.subr.bf16.mxu0 %v9483_v12  ;;  %5315 = vmatprep.subr.bf16.mxu1 %v9396_v49 }
 0x48b   :  { %5253 = vmatpush1.bf16.msra.mxu0 %v9484_v21  ;;  %5317 = vmatpush1.bf16.msra.mxu1 %v9398_v48 }
 0x48c   :  { %5255 = vmatprep.subr.bf16.mxu0 %v9399_v50  ;;  %5319 = vmatprep.subr.bf16.mxu1 %v9400_v4 }
 0x48f   :  { %5257 = vmatpush1.bf16.msra.mxu0 %v9401_v16  ;;  %5321 = vmatpush1.bf16.msra.mxu1 %v9402_v35  ;;  %v9633_v35 = vld [vmem:[#allocation26_spill] sm:$0xff] }
 0x490   :  { %5259 = vmatprep.subr.bf16.mxu0 %v9403_v62  ;;  %5323 = vmatprep.subr.bf16.mxu1 %v9404_v34  ;;  %v9562_v62 = vld [vmem:[#allocation157_spill] sm:$0xff]  ;;  %v9563_v34 = vld [vmem:[#allocation158_spill] sm:$0xff] }
 0x493   :  { %5261 = vmatpush1.bf16.msra.mxu0 %v9405_v44  ;;  %5325 = vmatpush1.bf16.msra.mxu1 %v9406_v47  ;;  %v9564_v44 = vld [vmem:[#allocation159_spill] sm:$0xff]  ;;  %v9565_v47 = vld [vmem:[#allocation160_spill] sm:$0xff] }
 0x494   :  { %5263 = vmatprep.subr.bf16.mxu0 %v7602_v22  ;;  %5327 = vmatprep.subr.bf16.mxu1 %v9407_v3  ;;  %v9566_v22 = vld [vmem:[#allocation161_spill] sm:$0xff]  ;;  %v9567_v3 = vld [vmem:[#allocation34_spill] sm:$0xff] }
 0x497   :  { %5265 = vmatpush1.bf16.msra.mxu0 %v7608_v9  ;;  %5329 = vmatpush1.bf16.msra.mxu1 %v7612_v24  ;;  %v9568_v9 = vld [vmem:[#allocation35_spill] sm:$0xff] }
 0x498   :  { %5267 = vmatprep.subr.bf16.mxu0 %v7614_v30  ;;  %5331 = vmatprep.subr.bf16.mxu1 %v7617_v14  ;;  %v9569_v14 = vld [vmem:[#allocation36_spill] sm:$0xff]  ;;  %v9578_v30 = vld [vmem:[#allocation45_spill] sm:$0xff] }
 0x49b   :  { %5269 = vmatpush1.bf16.msra.mxu0 %v7620_v6  ;;  %5333 = vmatpush1.bf16.msra.mxu1 %v9562_v62  ;;  %v9570_v6 = vld [vmem:[#allocation37_spill] sm:$0xff]  ;;  %v9571_v62 = vld [vmem:[#allocation38_spill] sm:$0xff] }
 0x49c   :  { %5271 = vmatprep.subr.bf16.mxu0 %v9563_v34  ;;  %5335 = vmatprep.subr.bf16.mxu1 %v9564_v44  ;;  %v9572_v34 = vld [vmem:[#allocation39_spill] sm:$0xff]  ;;  %v9573_v44 = vld [vmem:[#allocation40_spill] sm:$0xff] }
 0x49f   :  { %5273 = vmatpush1.bf16.msra.mxu0 %v9565_v47  ;;  %5337 = vmatpush1.bf16.msra.mxu1 %v9566_v22  ;;  %v9574_v47 = vld [vmem:[#allocation41_spill] sm:$0xff]  ;;  %v9575_v22 = vld [vmem:[#allocation42_spill] sm:$0xff] }
 0x4a0   :  { %5339 = vmatprep.subr.bf16.mxu0 %v9567_v3  ;;  %5403 = vmatprep.subr.bf16.mxu1 %v9568_v9  ;;  %v9576_v3 = vld [vmem:[#allocation43_spill] sm:$0xff]  ;;  %v9577_v9 = vld [vmem:[#allocation44_spill] sm:$0xff] }
 0x4a2   :  { %2193 = vmatmul.mubr.f32.vlgmr.msra.gmra.mrb[22].mxu0 %v8037_v31  ;;  %2264 = vmatmul.mubr.f32.vlgmr.msra.gmra.mrb[22].mxu1 %v8037_v31  ;;  %v9579_v31 = vld [vmem:[#allocation46_spill] sm:$0xff] }
 0x4a3   :  { %5341 = vmatpush1.bf16.msra.mxu0 %v9569_v14  ;;  %5405 = vmatpush1.bf16.msra.mxu1 %v9570_v6  ;;  %v9580_v14 = vld [vmem:[#allocation47_spill] sm:$0xff]  ;;  %v9581_v6 = vld [vmem:[#allocation48_spill] sm:$0xff] }
 0x4a4   :  { %5343 = vmatprep.subr.bf16.mxu0 %v9571_v62  ;;  %5407 = vmatprep.subr.bf16.mxu1 %v9572_v34  ;;  %v9582_v62 = vld [vmem:[#allocation49_spill] sm:$0xff]  ;;  %v9583_v34 = vld [vmem:[#allocation50_spill] sm:$0xff] }
 0x4a7   :  { %5345 = vmatpush1.bf16.msra.mxu0 %v9573_v44  ;;  %5409 = vmatpush1.bf16.msra.mxu1 %v9574_v47  ;;  %v9584_v44 = vld [vmem:[#allocation51_spill] sm:$0xff]  ;;  %v9585_v47 = vld [vmem:[#allocation52_spill] sm:$0xff] }
 0x4a8   :  { %5347 = vmatprep.subr.bf16.mxu0 %v9575_v22  ;;  %5411 = vmatprep.subr.bf16.mxu1 %v9576_v3  ;;  %v9586_v22 = vld [vmem:[#allocation53_spill] sm:$0xff]  ;;  %v9587_v3 = vld [vmem:[#allocation54_spill] sm:$0xff] }
 0x4ab   :  { %5349 = vmatpush1.bf16.msra.mxu0 %v9577_v9  ;;  %5413 = vmatpush1.bf16.msra.mxu1 %v9578_v30  ;;  %v9588_v9 = vld [vmem:[#allocation55_spill] sm:$0xff]  ;;  %v9589_v30 = vld [vmem:[#allocation56_spill] sm:$0xff] }
 0x4ac   :  { %5351 = vmatprep.subr.bf16.mxu0 %v9579_v31  ;;  %5415 = vmatprep.subr.bf16.mxu1 %v9580_v14  ;;  %v9590_v31 = vld [vmem:[#allocation57_spill] sm:$0xff]  ;;  %v9591_v14 = vld [vmem:[#allocation58_spill] sm:$0xff] }
 0x4af   :  { %5353 = vmatpush1.bf16.msra.mxu0 %v9581_v6  ;;  %5417 = vmatpush1.bf16.msra.mxu1 %v9582_v62  ;;  %v9592_v6 = vld [vmem:[#allocation59_spill] sm:$0xff]  ;;  %v9593_v62 = vld [vmem:[#allocation60_spill] sm:$0xff] }
 0x4b0   :  { %5355 = vmatprep.subr.bf16.mxu0 %v9583_v34  ;;  %5419 = vmatprep.subr.bf16.mxu1 %v9584_v44  ;;  %v9594_v34 = vld [vmem:[#allocation61_spill] sm:$0xff]  ;;  %v9595_v44 = vld [vmem:[#allocation62_spill] sm:$0xff] }
 0x4b3   :  { %5357 = vmatpush1.bf16.msra.mxu0 %v9585_v47  ;;  %5421 = vmatpush1.bf16.msra.mxu1 %v9586_v22  ;;  %v9596_v47 = vld [vmem:[#allocation63_spill] sm:$0xff]  ;;  %v9597_v22 = vld [vmem:[#allocation64_spill] sm:$0xff] }
 0x4b4   :  { %5359 = vmatprep.subr.bf16.mxu0 %v9587_v3  ;;  %5423 = vmatprep.subr.bf16.mxu1 %v9588_v9  ;;  %v9598_v3 = vld [vmem:[#allocation65_spill] sm:$0xff]  ;;  %v9599_v9 = vld [vmem:[#allocation66_spill] sm:$0xff] }
 0x4b7   :  { %5361 = vmatpush1.bf16.msra.mxu0 %v9589_v30  ;;  %5425 = vmatpush1.bf16.msra.mxu1 %v9590_v31  ;;  %v9600_v30 = vld [vmem:[#allocation67_spill] sm:$0xff]  ;;  %v9601_v31 = vld [vmem:[#allocation68_spill] sm:$0xff] }
 0x4b8   :  { %5363 = vmatprep.subr.bf16.mxu0 %v9591_v14  ;;  %5427 = vmatprep.subr.bf16.mxu1 %v9592_v6  ;;  %v9602_v14 = vld [vmem:[#allocation69_spill] sm:$0xff]  ;;  %v9603_v6 = vld [vmem:[#allocation70_spill] sm:$0xff] }
 0x4bb   :  { %5365 = vmatpush1.bf16.msra.mxu0 %v9593_v62  ;;  %5429 = vmatpush1.bf16.msra.mxu1 %v9594_v34  ;;  %v9604_v62 = vld [vmem:[#allocation71_spill] sm:$0xff]  ;;  %v9605_v34 = vld [vmem:[#allocation72_spill] sm:$0xff] }
 0x4bc   :  { %5367 = vmatprep.subr.bf16.mxu0 %v9595_v44  ;;  %5431 = vmatprep.subr.bf16.mxu1 %v9596_v47  ;;  %v9606_v44 = vld [vmem:[#allocation73_spill] sm:$0xff]  ;;  %v9607_v47 = vld [vmem:[#allocation74_spill] sm:$0xff] }
 0x4bf   :  { %5369 = vmatpush1.bf16.msra.mxu0 %v9597_v22  ;;  %5433 = vmatpush1.bf16.msra.mxu1 %v9598_v3  ;;  %v9608_v22 = vld [vmem:[#allocation75_spill] sm:$0xff]  ;;  %v9609_v3 = vld [vmem:[#allocation76_spill] sm:$0xff] }
 0x4c0   :  { %5371 = vmatprep.subr.bf16.mxu0 %v9599_v9  ;;  %5435 = vmatprep.subr.bf16.mxu1 %v9600_v30  ;;  %v9610_v9 = vld [vmem:[#allocation77_spill] sm:$0xff]  ;;  %v9611_v30 = vld [vmem:[#allocation78_spill] sm:$0xff] }
 0x4c3   :  { %5373 = vmatpush1.bf16.msra.mxu0 %v9601_v31  ;;  %5437 = vmatpush1.bf16.msra.mxu1 %v9602_v14  ;;  %v9612_v31 = vld [vmem:[#allocation79_spill] sm:$0xff]  ;;  %v9613_v14 = vld [vmem:[#allocation80_spill] sm:$0xff] }
 0x4c4   :  { %5375 = vmatprep.subr.bf16.mxu0 %v9603_v6  ;;  %5439 = vmatprep.subr.bf16.mxu1 %v9604_v62  ;;  %v9614_v6 = vld [vmem:[#allocation81_spill] sm:$0xff]  ;;  %v9615_v62 = vld [vmem:[#allocation82_spill] sm:$0xff] }
 0x4c7   :  { %5377 = vmatpush1.bf16.msra.mxu0 %v9605_v34  ;;  %5441 = vmatpush1.bf16.msra.mxu1 %v9606_v44  ;;  %v9616_v34 = vld [vmem:[#allocation83_spill] sm:$0xff]  ;;  %v9617_v44 = vld [vmem:[#allocation84_spill] sm:$0xff] }
 0x4c8   :  { %5379 = vmatprep.subr.bf16.mxu0 %v9607_v47  ;;  %5443 = vmatprep.subr.bf16.mxu1 %v9608_v22  ;;  %v9618_v47 = vld [vmem:[#allocation85_spill] sm:$0xff]  ;;  %v9619_v22 = vld [vmem:[#allocation86_spill] sm:$0xff] }
 0x4cb   :  { %5381 = vmatpush1.bf16.msra.mxu0 %v9609_v3  ;;  %5445 = vmatpush1.bf16.msra.mxu1 %v9610_v9  ;;  %v9620_v3 = vld [vmem:[#allocation87_spill] sm:$0xff]  ;;  %v9621_v9 = vld [vmem:[#allocation88_spill] sm:$0xff] }
 0x4cc   :  { %5383 = vmatprep.subr.bf16.mxu0 %v9611_v30  ;;  %5447 = vmatprep.subr.bf16.mxu1 %v9612_v31  ;;  %v9622_v30 = vld [vmem:[#allocation89_spill] sm:$0xff]  ;;  %v9623_v31 = vld [vmem:[#allocation90_spill] sm:$0xff] }
 0x4cf   :  { %5385 = vmatpush1.bf16.msra.mxu0 %v9613_v14  ;;  %5449 = vmatpush1.bf16.msra.mxu1 %v9614_v6  ;;  %v9624_v14 = vld [vmem:[#allocation91_spill] sm:$0xff]  ;;  %v9625_v6 = vld [vmem:[#allocation92_spill] sm:$0xff] }
 0x4d0   :  { %5387 = vmatprep.subr.bf16.mxu0 %v9615_v62  ;;  %5451 = vmatprep.subr.bf16.mxu1 %v9616_v34  ;;  %v9626_v62 = vld [vmem:[#allocation93_spill] sm:$0xff]  ;;  %v9627_v34 = vld [vmem:[#allocation94_spill] sm:$0xff] }
 0x4d3   :  { %5389 = vmatpush1.bf16.msra.mxu0 %v9617_v44  ;;  %5453 = vmatpush1.bf16.msra.mxu1 %v9618_v47  ;;  %v9628_v44 = vld [vmem:[#allocation95_spill] sm:$0xff]  ;;  %v9629_v47 = vld [vmem:[#allocation96_spill] sm:$0xff] }
 0x4d4   :  { %5391 = vmatprep.subr.bf16.mxu0 %v9619_v22  ;;  %5455 = vmatprep.subr.bf16.mxu1 %v9620_v3  ;;  %v9630_v22 = vld [vmem:[#allocation97_spill] sm:$0xff]  ;;  %v9631_v3 = vld [vmem:[#allocation98_spill] sm:$0xff] }
 0x4d7   :  { %5393 = vmatpush1.bf16.msra.mxu0 %v9621_v9  ;;  %5457 = vmatpush1.bf16.msra.mxu1 %v9622_v30  ;;  %v9632_v9 = vld [vmem:[#allocation99_spill] sm:$0xff] }
 0x4d8   :  { %5395 = vmatprep.subr.bf16.mxu0 %v9623_v31  ;;  %5459 = vmatprep.subr.bf16.mxu1 %v9624_v14 }
 0x4db   :  { %5397 = vmatpush1.bf16.msra.mxu0 %v9625_v6  ;;  %5461 = vmatpush1.bf16.msra.mxu1 %v9626_v62 }
 0x4dc   :  { %5399 = vmatprep.subr.bf16.mxu0 %v9627_v34  ;;  %5463 = vmatprep.subr.bf16.mxu1 %v9628_v44 }
 0x4df   :  { %5401 = vmatpush1.bf16.msra.mxu0 %v9629_v47  ;;  %5465 = vmatpush1.bf16.msra.mxu1 %v9630_v22 }
 0x4e0   :  { %5467 = vmatprep.subr.bf16.mxu0 %v9631_v3  ;;  %5531 = vmatprep.subr.bf16.mxu1 %v9632_v9 }
 0x535   :  { %v2052_v30 = vpop.f32.mrb[6].mxu0  ;;  %v2123_v31 = vpop.f32.mrb[6].mxu1 }
 0x536   :  { %v2054_v24 = vpop.f32.mrb[7].mxu0  ;;  %v2125_v14 = vpop.f32.mrb[7].mxu1  ;;  %v6496_v6 = vadd.f32 %v2052_v30, %v9633_v35  ;;  %v6512_v62 = vadd.f32 %v2123_v31, %v9348_v43 }
 0x537   :  { %v6497_v34 = vadd.f32 %v2054_v24, %v9443_v13  ;;  %v6513_v44 = vadd.f32 %v2125_v14, %v9539_v55 }
 0x538   :  { %v4266_v16 = vmul.f32 -1.442695, %v6496_v6  ;;  %v4268_v47 = vmul.f32 -1.442695, %v6512_v62 }
 0x539   :  { %v4267_v4 = vmul.f32 -1.442695, %v6497_v34  ;;  %v4269_v22 = vmul.f32 -1.442695, %v6513_v44  ;;  %v9634_v44 = vld [vmem:[#allocation32_spill] sm:$0xff] }
 0x53a   :  { %6725 = vpow2.f32 %v4266_v16 }
 0x53b   :  { %6727 = vpow2.f32 %v4268_v47 }
 0x53c   :  { %6729 = vpow2.f32 %v4267_v4 }
 0x53d   :  { %6731 = vpow2.f32 %v4269_v22  ;;  %v9635_v22 = vld [vmem:[#allocation31_spill] sm:$0xff] }
 0x544   :  { %v6726_v9 = vpop.eup %6725 }
 0x545   :  { %v6728_v3 = vpop.eup %6727  ;;  %v2296_v21 = vadd.f32 1.0, %v6726_v9 }
 0x546   :  { %v6730_v50 = vpop.eup %6729  ;;  %v2298_v30 = vadd.f32 1.0, %v6728_v3 }
 0x547   :  { %v6732_v48 = vpop.eup %6731  ;;  %v2297_v35 = vadd.f32 1.0, %v6730_v50  ;;  %6733 = vrcp.f32 %v2296_v21 }
 0x548   :  { %v2299_v31 = vadd.f32 1.0, %v6732_v48  ;;  %6735 = vrcp.f32 %v2298_v30 }
 0x549   :  { %6737 = vrcp.f32 %v2297_v35 }
 0x54a   :  { %6739 = vrcp.f32 %v2299_v31 }
 0x551   :  { %v6734_v48 = vpop.eup %6733 }
 0x552   :  { %v6736_v50 = vpop.eup %6735 }
 0x553   :  { %v6738_v35 = vpop.eup %6737 }
 0x554   :  { %v6740_v21 = vpop.eup %6739 }
 0x575   :  { %v2194_v24 = vpop.f32.mrb[22].mxu0  ;;  %v2265_v14 = vpop.f32.mrb[22].mxu1 }
 0x576   :  { %v6528_v6 = vadd.f32 %v2194_v24, %v9445_v46  ;;  %v6544_v16 = vadd.f32 %v2265_v14, %v9634_v44  ;;  %v2196_v47 = vpop.f32.mrb[23].mxu0  ;;  %v2267_v4 = vpop.f32.mrb[23].mxu1  ;;  %v2316_v14 = vmul.f32 %v6736_v50, %v8029_v11 }
 0x577   :  { %v6529_v62 = vadd.f32 %v2196_v47, %v9635_v22  ;;  %v6545_v34 = vadd.f32 %v2267_v4, %v9354_v5  ;;  %v2317_v47 = vmul.f32 %v6740_v21, %v8031_v2  ;;  %v9641_v21 = vld [vmem:[#allocation142_spill] sm:$0xff] }
 0x578   :  { %v4270_v9 = vmul.f32 -1.442695, %v6528_v6  ;;  %6741 = vtanh.f32 %v6544_v16 }
 0x579   :  { %v4271_v3 = vmul.f32 -1.442695, %v6529_v62  ;;  %6743 = vtanh.f32 %v6545_v34 }
 0x57a   :  { %6745 = vpow2.f32 %v4270_v9 }
 0x57b   :  { %6747 = vpow2.f32 %v4271_v3 }
 0x582   :  { %v6742_v30 = vpop.eup %6741 }
 0x583   :  { %v6744_v24 = vpop.eup %6743  ;;  %v2318_v44 = vmul.f32 %v6742_v30, %v6734_v48  ;;  %v9642_v30 = vld [vmem:[#allocation143_spill] sm:$0xff] }
 0x584   :  { %v6746_v31 = vpop.eup %6745  ;;  %v2319_v22 = vmul.f32 %v6744_v24, %v6738_v35  ;;  %v9640_v35 = vld [vmem:[#allocation141_spill] sm:$0xff]  ;;  %v9643_v24 = vld [vmem:[#allocation144_spill] sm:$0xff] }
 0x585   :  { %v6748_v4 = vpop.eup %6747  ;;  %v2300_v6 = vadd.f32 1.0, %v6746_v31  ;;  %v8185_v16 = vadd.f32 %v2318_v44, %v2316_v14  ;;  %v9638_v44 = vld [vmem:[#allocation118_spill] sm:$0xff]  ;;  %v9644_v14 = vld [vmem:[#allocation145_spill] sm:$0xff] }
 0x586   :  { %v2301_v62 = vadd.f32 1.0, %v6748_v4  ;;  %v8187_v34 = vadd.f32 %v2319_v22, %v2317_v47  ;;  %v9639_v22 = vld [vmem:[#allocation140_spill] sm:$0xff]  ;;  %v9645_v31 = vld [vmem:[#allocation146_spill] sm:$0xff]  ;;  %v9646_v47 = vld [vmem:[#allocation147_spill] sm:$0xff] }
 0x587   :  { %6749 = vrcp.f32 %v2300_v6  ;;  %v9647_v4 = vld [vmem:[#allocation148_spill] sm:$0xff]  ;;  %v9648_v6 = vld [vmem:[#allocation149_spill] sm:$0xff] }
 0x588   :  { %6751 = vtanh.f32 %v8185_v16 }
 0x589   :  { %6753 = vrcp.f32 %v2301_v62  ;;  %v9649_v62 = vld [vmem:[#allocation150_spill] sm:$0xff] }
 0x58a   :  { %6755 = vtanh.f32 %v8187_v34 }
 0x591   :  { %v6750_v9 = vpop.eup %6749 }
 0x592   :  { %v6752_v11 = vpop.eup %6751 }
 0x593   :  { %v6754_v3 = vpop.eup %6753  ;;  %v8193_v2 = vmul.f32 %v6752_v11, %v6750_v9  ;;  %v9650_v9 = vld [vmem:[#allocation151_spill] sm:$0xff]  ;;  %v9651_v11 = vld [vmem:[#allocation152_spill] sm:$0xff] }
 0x594   :  { %v6756_v48 = vpop.eup %6755 }
 0x595   :  { %v8191_v50 = vmul.f32 %v6756_v48, %v6754_v3  ;;  %9637 = vst [vmem:[#allocation27_spill] sm:$0xff] %v8193_v2  ;;  %v9652_v3 = vld [vmem:[#allocation153_spill] sm:$0xff]  ;;  %v9653_v48 = vld [vmem:[#allocation154_spill] sm:$0xff] }
 0x597   :  { %9636 = vst [vmem:[#allocation104_spill] sm:$0xff] %v8191_v50  ;;  %2400 = vmatprep.mubr.f32.mxu0 %v8191_v50  ;;  %2471 = vmatprep.mubr.f32.mxu1 %v8191_v50 }
 0x598   :  { %2401 = vmatmul.mubr.f32.vlgmr.msra.gmra.mrb[8].mxu0 %v8193_v2  ;;  %2472 = vmatmul.mubr.f32.vlgmr.msra.gmra.mrb[8].mxu1 %v8193_v2 }
 0x599   :  { %5469 = vmatpush1.bf16.msra.mxu0 %v9357_v42  ;;  %5533 = vmatpush1.bf16.msra.mxu1 %v9358_v7 }
 0x59a   :  { %2542 = vmatprep.mubr.f32.mxu0 %v8191_v50  ;;  %2613 = vmatprep.mubr.f32.mxu1 %v8191_v50  ;;  %v9654_v50 = vld [vmem:[#allocation155_spill] sm:$0xff] }
 0x59b   :  { %5471 = vmatprep.subr.bf16.mxu0 %v9359_v63  ;;  %5535 = vmatprep.subr.bf16.mxu1 %v9360_v20 }
 0x59d   :  { %5473 = vmatpush1.bf16.msra.mxu0 %v9361_v17  ;;  %5537 = vmatpush1.bf16.msra.mxu1 %v9450_v57 }
 0x59e   :  { %5475 = vmatprep.subr.bf16.mxu0 %v9451_v8  ;;  %5539 = vmatprep.subr.bf16.mxu1 %v9452_v18 }
 0x5a1   :  { %5477 = vmatpush1.bf16.msra.mxu0 %v9453_v33  ;;  %5541 = vmatpush1.bf16.msra.mxu1 %v9454_v37 }
 0x5a2   :  { %5479 = vmatprep.subr.bf16.mxu0 %v9455_v29  ;;  %5543 = vmatprep.subr.bf16.mxu1 %v9544_v10 }
 0x5a5   :  { %5481 = vmatpush1.bf16.msra.mxu0 %v9545_v28  ;;  %5545 = vmatpush1.bf16.msra.mxu1 %v9546_v59 }
 0x5a6   :  { %5483 = vmatprep.subr.bf16.mxu0 %v9547_v25  ;;  %5547 = vmatprep.subr.bf16.mxu1 %v9548_v40 }
 0x5a9   :  { %5485 = vmatpush1.bf16.msra.mxu0 %v9549_v60  ;;  %5549 = vmatpush1.bf16.msra.mxu1 %v9550_v26 }
 0x5aa   :  { %5487 = vmatprep.subr.bf16.mxu0 %v9638_v44  ;;  %5551 = vmatprep.subr.bf16.mxu1 %v9552_v19 }
 0x5ad   :  { %5489 = vmatpush1.bf16.msra.mxu0 %v9553_v27  ;;  %5553 = vmatpush1.bf16.msra.mxu1 %v9554_v0 }
 0x5ae   :  { %5491 = vmatprep.subr.bf16.mxu0 %v9555_v23  ;;  %5555 = vmatprep.subr.bf16.mxu1 %v9556_v36 }
 0x5b1   :  { %5493 = vmatpush1.bf16.msra.mxu0 %v9557_v61  ;;  %5557 = vmatpush1.bf16.msra.mxu1 %v9558_v32 }
 0x5b2   :  { %5495 = vmatprep.subr.bf16.mxu0 %v9559_v1  ;;  %5559 = vmatprep.subr.bf16.mxu1 %v9560_v15 }
 0x5b5   :  { %5497 = vmatpush1.bf16.msra.mxu0 %v9473_v51  ;;  %5561 = vmatpush1.bf16.msra.mxu1 %v9561_v41 }
 0x5b6   :  { %5499 = vmatprep.subr.bf16.mxu0 %v9475_v53  ;;  %5563 = vmatprep.subr.bf16.mxu1 %v9476_v45 }
 0x5b9   :  { %5501 = vmatpush1.bf16.msra.mxu0 %v9477_v52  ;;  %5565 = vmatpush1.bf16.msra.mxu1 %v9478_v39 }
 0x5ba   :  { %5503 = vmatprep.subr.bf16.mxu0 %v9479_v38  ;;  %5567 = vmatprep.subr.bf16.mxu1 %v9480_v58 }
 0x5bd   :  { %5505 = vmatpush1.bf16.msra.mxu0 %v9481_v54  ;;  %5569 = vmatpush1.bf16.msra.mxu1 %v9482_v56 }
 0x5be   :  { %5507 = vmatprep.subr.bf16.mxu0 %v9483_v12  ;;  %5571 = vmatprep.subr.bf16.mxu1 %v9396_v49 }
 0x5c1   :  { %5509 = vmatpush1.bf16.msra.mxu0 %v9639_v22  ;;  %5573 = vmatpush1.bf16.msra.mxu1 %v9640_v35 }
 0x5c2   :  { %5511 = vmatprep.subr.bf16.mxu0 %v9641_v21  ;;  %5575 = vmatprep.subr.bf16.mxu1 %v9642_v30 }
 0x5c5   :  { %5513 = vmatpush1.bf16.msra.mxu0 %v9643_v24  ;;  %5577 = vmatpush1.bf16.msra.mxu1 %v9644_v14  ;;  %v9655_v14 = vld [vmem:[#allocation156_spill] sm:$0xff]  ;;  %v9727_v24 = vld [vmem:[#allocation26_spill] sm:$0xff] }
 0x5c6   :  { %5515 = vmatprep.subr.bf16.mxu0 %v9645_v31  ;;  %5579 = vmatprep.subr.bf16.mxu1 %v9646_v47  ;;  %v9656_v31 = vld [vmem:[#allocation157_spill] sm:$0xff]  ;;  %v9657_v47 = vld [vmem:[#allocation158_spill] sm:$0xff] }
 0x5c9   :  { %5517 = vmatpush1.bf16.msra.mxu0 %v9647_v4  ;;  %5581 = vmatpush1.bf16.msra.mxu1 %v9648_v6  ;;  %v9658_v4 = vld [vmem:[#allocation159_spill] sm:$0xff]  ;;  %v9659_v6 = vld [vmem:[#allocation160_spill] sm:$0xff] }
 0x5ca   :  { %5519 = vmatprep.subr.bf16.mxu0 %v9649_v62  ;;  %5583 = vmatprep.subr.bf16.mxu1 %v9650_v9  ;;  %v9660_v62 = vld [vmem:[#allocation161_spill] sm:$0xff]  ;;  %v9661_v9 = vld [vmem:[#allocation34_spill] sm:$0xff] }
 0x5cd   :  { %5521 = vmatpush1.bf16.msra.mxu0 %v9651_v11  ;;  %5585 = vmatpush1.bf16.msra.mxu1 %v9652_v3  ;;  %v9662_v11 = vld [vmem:[#allocation35_spill] sm:$0xff] }
 0x5ce   :  { %5523 = vmatprep.subr.bf16.mxu0 %v9653_v48  ;;  %5587 = vmatprep.subr.bf16.mxu1 %v9654_v50  ;;  %v9663_v50 = vld [vmem:[#allocation36_spill] sm:$0xff]  ;;  %v9672_v48 = vld [vmem:[#allocation45_spill] sm:$0xff] }
 0x5d1   :  { %5525 = vmatpush1.bf16.msra.mxu0 %v9655_v14  ;;  %5589 = vmatpush1.bf16.msra.mxu1 %v9656_v31  ;;  %v9664_v14 = vld [vmem:[#allocation37_spill] sm:$0xff]  ;;  %v9665_v31 = vld [vmem:[#allocation38_spill] sm:$0xff] }
 0x5d2   :  { %5527 = vmatprep.subr.bf16.mxu0 %v9657_v47  ;;  %5591 = vmatprep.subr.bf16.mxu1 %v9658_v4  ;;  %v9666_v47 = vld [vmem:[#allocation39_spill] sm:$0xff]  ;;  %v9667_v4 = vld [vmem:[#allocation40_spill] sm:$0xff] }
 0x5d5   :  { %5529 = vmatpush1.bf16.msra.mxu0 %v9659_v6  ;;  %5593 = vmatpush1.bf16.msra.mxu1 %v9660_v62  ;;  %v9668_v6 = vld [vmem:[#allocation41_spill] sm:$0xff]  ;;  %v9669_v62 = vld [vmem:[#allocation42_spill] sm:$0xff] }
 0x5d6   :  { %5595 = vmatprep.subr.bf16.mxu0 %v9661_v9  ;;  %5659 = vmatprep.subr.bf16.mxu1 %v9662_v11  ;;  %v9670_v9 = vld [vmem:[#allocation43_spill] sm:$0xff]  ;;  %v9671_v11 = vld [vmem:[#allocation44_spill] sm:$0xff] }
 0x5d8   :  { %2543 = vmatmul.mubr.f32.vlgmr.msra.gmra.mrb[24].mxu0 %v8193_v2  ;;  %2614 = vmatmul.mubr.f32.vlgmr.msra.gmra.mrb[24].mxu1 %v8193_v2  ;;  %v9673_v2 = vld [vmem:[#allocation46_spill] sm:$0xff] }
 0x5d9   :  { %5597 = vmatpush1.bf16.msra.mxu0 %v9663_v50  ;;  %5661 = vmatpush1.bf16.msra.mxu1 %v9664_v14  ;;  %v9674_v50 = vld [vmem:[#allocation47_spill] sm:$0xff]  ;;  %v9675_v14 = vld [vmem:[#allocation48_spill] sm:$0xff] }
 0x5da   :  { %5599 = vmatprep.subr.bf16.mxu0 %v9665_v31  ;;  %5663 = vmatprep.subr.bf16.mxu1 %v9666_v47  ;;  %v9676_v31 = vld [vmem:[#allocation49_spill] sm:$0xff]  ;;  %v9677_v47 = vld [vmem:[#allocation50_spill] sm:$0xff] }
 0x5dd   :  { %5601 = vmatpush1.bf16.msra.mxu0 %v9667_v4  ;;  %5665 = vmatpush1.bf16.msra.mxu1 %v9668_v6  ;;  %v9678_v4 = vld [vmem:[#allocation51_spill] sm:$0xff]  ;;  %v9679_v6 = vld [vmem:[#allocation52_spill] sm:$0xff] }
 0x5de   :  { %5603 = vmatprep.subr.bf16.mxu0 %v9669_v62  ;;  %5667 = vmatprep.subr.bf16.mxu1 %v9670_v9  ;;  %v9680_v62 = vld [vmem:[#allocation53_spill] sm:$0xff]  ;;  %v9681_v9 = vld [vmem:[#allocation54_spill] sm:$0xff] }
 0x5e1   :  { %5605 = vmatpush1.bf16.msra.mxu0 %v9671_v11  ;;  %5669 = vmatpush1.bf16.msra.mxu1 %v9672_v48  ;;  %v9682_v11 = vld [vmem:[#allocation55_spill] sm:$0xff]  ;;  %v9683_v48 = vld [vmem:[#allocation56_spill] sm:$0xff] }
 0x5e2   :  { %5607 = vmatprep.subr.bf16.mxu0 %v9673_v2  ;;  %5671 = vmatprep.subr.bf16.mxu1 %v9674_v50  ;;  %v9684_v2 = vld [vmem:[#allocation57_spill] sm:$0xff]  ;;  %v9685_v50 = vld [vmem:[#allocation58_spill] sm:$0xff] }
 0x5e5   :  { %5609 = vmatpush1.bf16.msra.mxu0 %v9675_v14  ;;  %5673 = vmatpush1.bf16.msra.mxu1 %v9676_v31  ;;  %v9686_v14 = vld [vmem:[#allocation59_spill] sm:$0xff]  ;;  %v9687_v31 = vld [vmem:[#allocation60_spill] sm:$0xff] }
 0x5e6   :  { %5611 = vmatprep.subr.bf16.mxu0 %v9677_v47  ;;  %5675 = vmatprep.subr.bf16.mxu1 %v9678_v4  ;;  %v9688_v47 = vld [vmem:[#allocation61_spill] sm:$0xff]  ;;  %v9689_v4 = vld [vmem:[#allocation62_spill] sm:$0xff] }
 0x5e9   :  { %5613 = vmatpush1.bf16.msra.mxu0 %v9679_v6  ;;  %5677 = vmatpush1.bf16.msra.mxu1 %v9680_v62  ;;  %v9690_v6 = vld [vmem:[#allocation63_spill] sm:$0xff]  ;;  %v9691_v62 = vld [vmem:[#allocation64_spill] sm:$0xff] }
 0x5ea   :  { %5615 = vmatprep.subr.bf16.mxu0 %v9681_v9  ;;  %5679 = vmatprep.subr.bf16.mxu1 %v9682_v11  ;;  %v9692_v9 = vld [vmem:[#allocation65_spill] sm:$0xff]  ;;  %v9693_v11 = vld [vmem:[#allocation66_spill] sm:$0xff] }
 0x5ed   :  { %5617 = vmatpush1.bf16.msra.mxu0 %v9683_v48  ;;  %5681 = vmatpush1.bf16.msra.mxu1 %v9684_v2  ;;  %v9694_v48 = vld [vmem:[#allocation67_spill] sm:$0xff]  ;;  %v9695_v2 = vld [vmem:[#allocation68_spill] sm:$0xff] }
 0x5ee   :  { %5619 = vmatprep.subr.bf16.mxu0 %v9685_v50  ;;  %5683 = vmatprep.subr.bf16.mxu1 %v9686_v14  ;;  %v9696_v50 = vld [vmem:[#allocation69_spill] sm:$0xff]  ;;  %v9697_v14 = vld [vmem:[#allocation70_spill] sm:$0xff] }
 0x5f1   :  { %5621 = vmatpush1.bf16.msra.mxu0 %v9687_v31  ;;  %5685 = vmatpush1.bf16.msra.mxu1 %v9688_v47  ;;  %v9698_v31 = vld [vmem:[#allocation71_spill] sm:$0xff]  ;;  %v9699_v47 = vld [vmem:[#allocation72_spill] sm:$0xff] }
 0x5f2   :  { %5623 = vmatprep.subr.bf16.mxu0 %v9689_v4  ;;  %5687 = vmatprep.subr.bf16.mxu1 %v9690_v6  ;;  %v9700_v4 = vld [vmem:[#allocation73_spill] sm:$0xff]  ;;  %v9701_v6 = vld [vmem:[#allocation74_spill] sm:$0xff] }
 0x5f5   :  { %5625 = vmatpush1.bf16.msra.mxu0 %v9691_v62  ;;  %5689 = vmatpush1.bf16.msra.mxu1 %v9692_v9  ;;  %v9702_v62 = vld [vmem:[#allocation75_spill] sm:$0xff]  ;;  %v9703_v9 = vld [vmem:[#allocation76_spill] sm:$0xff] }
 0x5f6   :  { %5627 = vmatprep.subr.bf16.mxu0 %v9693_v11  ;;  %5691 = vmatprep.subr.bf16.mxu1 %v9694_v48  ;;  %v9704_v11 = vld [vmem:[#allocation77_spill] sm:$0xff]  ;;  %v9705_v48 = vld [vmem:[#allocation78_spill] sm:$0xff] }
 0x5f9   :  { %5629 = vmatpush1.bf16.msra.mxu0 %v9695_v2  ;;  %5693 = vmatpush1.bf16.msra.mxu1 %v9696_v50  ;;  %v9706_v2 = vld [vmem:[#allocation79_spill] sm:$0xff]  ;;  %v9707_v50 = vld [vmem:[#allocation80_spill] sm:$0xff] }
 0x5fa   :  { %5631 = vmatprep.subr.bf16.mxu0 %v9697_v14  ;;  %5695 = vmatprep.subr.bf16.mxu1 %v9698_v31  ;;  %v9708_v14 = vld [vmem:[#allocation81_spill] sm:$0xff]  ;;  %v9709_v31 = vld [vmem:[#allocation82_spill] sm:$0xff] }
 0x5fd   :  { %5633 = vmatpush1.bf16.msra.mxu0 %v9699_v47  ;;  %5697 = vmatpush1.bf16.msra.mxu1 %v9700_v4  ;;  %v9710_v47 = vld [vmem:[#allocation83_spill] sm:$0xff]  ;;  %v9711_v4 = vld [vmem:[#allocation84_spill] sm:$0xff] }
 0x5fe   :  { %5635 = vmatprep.subr.bf16.mxu0 %v9701_v6  ;;  %5699 = vmatprep.subr.bf16.mxu1 %v9702_v62  ;;  %v9712_v6 = vld [vmem:[#allocation85_spill] sm:$0xff]  ;;  %v9713_v62 = vld [vmem:[#allocation86_spill] sm:$0xff] }
 0x601   :  { %5637 = vmatpush1.bf16.msra.mxu0 %v9703_v9  ;;  %5701 = vmatpush1.bf16.msra.mxu1 %v9704_v11  ;;  %v9714_v9 = vld [vmem:[#allocation87_spill] sm:$0xff]  ;;  %v9715_v11 = vld [vmem:[#allocation88_spill] sm:$0xff] }
 0x602   :  { %5639 = vmatprep.subr.bf16.mxu0 %v9705_v48  ;;  %5703 = vmatprep.subr.bf16.mxu1 %v9706_v2  ;;  %v9716_v48 = vld [vmem:[#allocation89_spill] sm:$0xff]  ;;  %v9717_v2 = vld [vmem:[#allocation90_spill] sm:$0xff] }
 0x605   :  { %5641 = vmatpush1.bf16.msra.mxu0 %v9707_v50  ;;  %5705 = vmatpush1.bf16.msra.mxu1 %v9708_v14  ;;  %v9718_v50 = vld [vmem:[#allocation91_spill] sm:$0xff]  ;;  %v9719_v14 = vld [vmem:[#allocation92_spill] sm:$0xff] }
 0x606   :  { %5643 = vmatprep.subr.bf16.mxu0 %v9709_v31  ;;  %5707 = vmatprep.subr.bf16.mxu1 %v9710_v47  ;;  %v9720_v31 = vld [vmem:[#allocation93_spill] sm:$0xff]  ;;  %v9721_v47 = vld [vmem:[#allocation94_spill] sm:$0xff] }
 0x609   :  { %5645 = vmatpush1.bf16.msra.mxu0 %v9711_v4  ;;  %5709 = vmatpush1.bf16.msra.mxu1 %v9712_v6  ;;  %v9722_v4 = vld [vmem:[#allocation95_spill] sm:$0xff]  ;;  %v9723_v6 = vld [vmem:[#allocation96_spill] sm:$0xff] }
 0x60a   :  { %5647 = vmatprep.subr.bf16.mxu0 %v9713_v62  ;;  %5711 = vmatprep.subr.bf16.mxu1 %v9714_v9  ;;  %v9724_v62 = vld [vmem:[#allocation97_spill] sm:$0xff]  ;;  %v9725_v9 = vld [vmem:[#allocation98_spill] sm:$0xff] }
 0x60d   :  { %5649 = vmatpush1.bf16.msra.mxu0 %v9715_v11  ;;  %5713 = vmatpush1.bf16.msra.mxu1 %v9716_v48  ;;  %v9726_v11 = vld [vmem:[#allocation99_spill] sm:$0xff] }
 0x60e   :  { %5651 = vmatprep.subr.bf16.mxu0 %v9717_v2  ;;  %5715 = vmatprep.subr.bf16.mxu1 %v9718_v50 }
 0x611   :  { %5653 = vmatpush1.bf16.msra.mxu0 %v9719_v14  ;;  %5717 = vmatpush1.bf16.msra.mxu1 %v9720_v31 }
 0x612   :  { %5655 = vmatprep.subr.bf16.mxu0 %v9721_v47  ;;  %5719 = vmatprep.subr.bf16.mxu1 %v9722_v4 }
 0x615   :  { %5657 = vmatpush1.bf16.msra.mxu0 %v9723_v6  ;;  %5721 = vmatpush1.bf16.msra.mxu1 %v9724_v62 }
 0x616   :  { %5723 = vmatprep.subr.bf16.mxu0 %v9725_v9  ;;  %5787 = vmatprep.subr.bf16.mxu1 %v9726_v11 }
 0x66b   :  { %v2402_v48 = vpop.f32.mrb[8].mxu0  ;;  %v2473_v2 = vpop.f32.mrb[8].mxu1 }
 0x66c   :  { %v2404_v3 = vpop.f32.mrb[9].mxu0  ;;  %v2475_v50 = vpop.f32.mrb[9].mxu1  ;;  %v6498_v14 = vadd.f32 %v2402_v48, %v9727_v24  ;;  %v6514_v31 = vadd.f32 %v2473_v2, %v9348_v43 }
 0x66d   :  { %v6499_v47 = vadd.f32 %v2404_v3, %v9443_v13  ;;  %v6515_v4 = vadd.f32 %v2475_v50, %v9539_v55 }
 0x66e   :  { %v4272_v30 = vmul.f32 -1.442695, %v6498_v14  ;;  %v4274_v6 = vmul.f32 -1.442695, %v6514_v31  ;;  %v9728_v31 = vld [vmem:[#allocation32_spill] sm:$0xff] }
 0x66f   :  { %v4273_v21 = vmul.f32 -1.442695, %v6499_v47  ;;  %v4275_v62 = vmul.f32 -1.442695, %v6515_v4  ;;  %v9729_v4 = vld [vmem:[#allocation31_spill] sm:$0xff] }
 0x670   :  { %6757 = vpow2.f32 %v4272_v30 }
 0x671   :  { %6759 = vpow2.f32 %v4274_v6 }
 0x672   :  { %6761 = vpow2.f32 %v4273_v21 }
 0x673   :  { %6763 = vpow2.f32 %v4275_v62 }
 0x67a   :  { %v6758_v11 = vpop.eup %6757 }
 0x67b   :  { %v6760_v9 = vpop.eup %6759  ;;  %v2646_v49 = vadd.f32 1.0, %v6758_v11 }
 0x67c   :  { %v6762_v35 = vpop.eup %6761  ;;  %v2648_v48 = vadd.f32 1.0, %v6760_v9 }
 0x67d   :  { %v6764_v22 = vpop.eup %6763  ;;  %v2647_v24 = vadd.f32 1.0, %v6762_v35  ;;  %6765 = vrcp.f32 %v2646_v49 }
 0x67e   :  { %v2649_v2 = vadd.f32 1.0, %v6764_v22  ;;  %6767 = vrcp.f32 %v2648_v48 }
 0x67f   :  { %6769 = vrcp.f32 %v2647_v24 }
 0x680   :  { %6771 = vrcp.f32 %v2649_v2 }
 0x687   :  { %v6766_v49 = vpop.eup %6765 }
 0x688   :  { %v6768_v22 = vpop.eup %6767 }
 0x689   :  { %v6770_v24 = vpop.eup %6769 }
 0x68a   :  { %v6772_v9 = vpop.eup %6771 }
 0x6ab   :  { %v2544_v3 = vpop.f32.mrb[24].mxu0  ;;  %v2615_v50 = vpop.f32.mrb[24].mxu1 }
 0x6ac   :  { %v6530_v14 = vadd.f32 %v2544_v3, %v9445_v46  ;;  %v6546_v30 = vadd.f32 %v2615_v50, %v9728_v31  ;;  %v2546_v47 = vpop.f32.mrb[25].mxu0  ;;  %v2617_v21 = vpop.f32.mrb[25].mxu1  ;;  %v2666_v50 = vmul.f32 %v6768_v22, %v8185_v16 }
 0x6ad   :  { %v6531_v6 = vadd.f32 %v2546_v47, %v9729_v4  ;;  %v6547_v62 = vadd.f32 %v2617_v21, %v9354_v5  ;;  %v2667_v47 = vmul.f32 %v6772_v9, %v8187_v34  ;;  %v9735_v9 = vld [vmem:[#allocation142_spill] sm:$0xff] }
 0x6ae   :  { %v4276_v11 = vmul.f32 -1.442695, %v6530_v14  ;;  %6773 = vtanh.f32 %v6546_v30 }
 0x6af   :  { %v4277_v35 = vmul.f32 -1.442695, %v6531_v6  ;;  %6775 = vtanh.f32 %v6547_v62 }
 0x6b0   :  { %6777 = vpow2.f32 %v4276_v11 }
 0x6b1   :  { %6779 = vpow2.f32 %v4277_v35 }
 0x6b8   :  { %v6774_v48 = vpop.eup %6773 }
 0x6b9   :  { %v6776_v3 = vpop.eup %6775  ;;  %v2668_v31 = vmul.f32 %v6774_v48, %v6766_v49  ;;  %v9736_v48 = vld [vmem:[#allocation143_spill] sm:$0xff] }
 0x6ba   :  { %v6778_v2 = vpop.eup %6777  ;;  %v2669_v4 = vmul.f32 %v6776_v3, %v6770_v24  ;;  %v9734_v24 = vld [vmem:[#allocation141_spill] sm:$0xff]  ;;  %v9737_v3 = vld [vmem:[#allocation144_spill] sm:$0xff] }
 0x6bb   :  { %v6780_v21 = vpop.eup %6779  ;;  %v2650_v14 = vadd.f32 1.0, %v6778_v2  ;;  %v8341_v30 = vadd.f32 %v2668_v31, %v2666_v50  ;;  %v9732_v31 = vld [vmem:[#allocation139_spill] sm:$0xff]  ;;  %v9738_v50 = vld [vmem:[#allocation145_spill] sm:$0xff]  ;;  %v9739_v2 = vld [vmem:[#allocation146_spill] sm:$0xff] }
 0x6bc   :  { %v2651_v6 = vadd.f32 1.0, %v6780_v21  ;;  %v8343_v62 = vadd.f32 %v2669_v4, %v2667_v47  ;;  %v9733_v4 = vld [vmem:[#allocation140_spill] sm:$0xff]  ;;  %v9740_v47 = vld [vmem:[#allocation147_spill] sm:$0xff] }
 0x6bd   :  { %6781 = vrcp.f32 %v2650_v14  ;;  %v9741_v21 = vld [vmem:[#allocation148_spill] sm:$0xff]  ;;  %v9742_v14 = vld [vmem:[#allocation149_spill] sm:$0xff] }
 0x6be   :  { %6783 = vtanh.f32 %v8341_v30 }
 0x6bf   :  { %6785 = vrcp.f32 %v2651_v6  ;;  %v9743_v6 = vld [vmem:[#allocation150_spill] sm:$0xff] }
 0x6c0   :  { %6787 = vtanh.f32 %v8343_v62 }
 0x6c7   :  { %v6782_v11 = vpop.eup %6781 }
 0x6c8   :  { %v6784_v16 = vpop.eup %6783 }
 0x6c9   :  { %v6786_v35 = vpop.eup %6785  ;;  %v8349_v34 = vmul.f32 %v6784_v16, %v6782_v11  ;;  %v9744_v11 = vld [vmem:[#allocation151_spill] sm:$0xff]  ;;  %v9745_v16 = vld [vmem:[#allocation152_spill] sm:$0xff] }
 0x6ca   :  { %v6788_v49 = vpop.eup %6787 }
 0x6cb   :  { %v8347_v22 = vmul.f32 %v6788_v49, %v6786_v35  ;;  %9731 = vst [vmem:[#allocation105_spill] sm:$0xff] %v8349_v34  ;;  %v9746_v35 = vld [vmem:[#allocation153_spill] sm:$0xff]  ;;  %v9747_v49 = vld [vmem:[#allocation154_spill] sm:$0xff] }
 0x6cd   :  { %9730 = vst [vmem:[#allocation30_spill] sm:$0xff] %v8347_v22  ;;  %2750 = vmatprep.mubr.f32.mxu0 %v8347_v22  ;;  %2821 = vmatprep.mubr.f32.mxu1 %v8347_v22 }
 0x6ce   :  { %2751 = vmatmul.mubr.f32.vlgmr.msra.gmra.mrb[10].mxu0 %v8349_v34  ;;  %2822 = vmatmul.mubr.f32.vlgmr.msra.gmra.mrb[10].mxu1 %v8349_v34 }
 0x6cf   :  { %5725 = vmatpush1.bf16.msra.mxu0 %v9357_v42  ;;  %5789 = vmatpush1.bf16.msra.mxu1 %v9358_v7 }
 0x6d0   :  { %2892 = vmatprep.mubr.f32.mxu0 %v8347_v22  ;;  %2963 = vmatprep.mubr.f32.mxu1 %v8347_v22  ;;  %v9748_v22 = vld [vmem:[#allocation155_spill] sm:$0xff] }
 0x6d1   :  { %5727 = vmatprep.subr.bf16.mxu0 %v9359_v63  ;;  %5791 = vmatprep.subr.bf16.mxu1 %v9360_v20 }
 0x6d3   :  { %5729 = vmatpush1.bf16.msra.mxu0 %v9361_v17  ;;  %5793 = vmatpush1.bf16.msra.mxu1 %v9450_v57 }
 0x6d4   :  { %5731 = vmatprep.subr.bf16.mxu0 %v9451_v8  ;;  %5795 = vmatprep.subr.bf16.mxu1 %v9452_v18 }
 0x6d7   :  { %5733 = vmatpush1.bf16.msra.mxu0 %v9453_v33  ;;  %5797 = vmatpush1.bf16.msra.mxu1 %v9454_v37 }
 0x6d8   :  { %5735 = vmatprep.subr.bf16.mxu0 %v9455_v29  ;;  %5799 = vmatprep.subr.bf16.mxu1 %v9544_v10 }
 0x6db   :  { %5737 = vmatpush1.bf16.msra.mxu0 %v9545_v28  ;;  %5801 = vmatpush1.bf16.msra.mxu1 %v9546_v59 }
 0x6dc   :  { %5739 = vmatprep.subr.bf16.mxu0 %v9547_v25  ;;  %5803 = vmatprep.subr.bf16.mxu1 %v9548_v40 }
 0x6df   :  { %5741 = vmatpush1.bf16.msra.mxu0 %v9549_v60  ;;  %5805 = vmatpush1.bf16.msra.mxu1 %v9550_v26 }
 0x6e0   :  { %5743 = vmatprep.subr.bf16.mxu0 %v9638_v44  ;;  %5807 = vmatprep.subr.bf16.mxu1 %v9552_v19 }
 0x6e3   :  { %5745 = vmatpush1.bf16.msra.mxu0 %v9553_v27  ;;  %5809 = vmatpush1.bf16.msra.mxu1 %v9554_v0 }
 0x6e4   :  { %5747 = vmatprep.subr.bf16.mxu0 %v9555_v23  ;;  %5811 = vmatprep.subr.bf16.mxu1 %v9556_v36 }
 0x6e7   :  { %5749 = vmatpush1.bf16.msra.mxu0 %v9557_v61  ;;  %5813 = vmatpush1.bf16.msra.mxu1 %v9558_v32 }
 0x6e8   :  { %5751 = vmatprep.subr.bf16.mxu0 %v9559_v1  ;;  %5815 = vmatprep.subr.bf16.mxu1 %v9560_v15 }
 0x6eb   :  { %5753 = vmatpush1.bf16.msra.mxu0 %v9473_v51  ;;  %5817 = vmatpush1.bf16.msra.mxu1 %v9561_v41 }
 0x6ec   :  { %5755 = vmatprep.subr.bf16.mxu0 %v9475_v53  ;;  %5819 = vmatprep.subr.bf16.mxu1 %v9476_v45 }
 0x6ef   :  { %5757 = vmatpush1.bf16.msra.mxu0 %v9477_v52  ;;  %5821 = vmatpush1.bf16.msra.mxu1 %v9478_v39 }
 0x6f0   :  { %5759 = vmatprep.subr.bf16.mxu0 %v9479_v38  ;;  %5823 = vmatprep.subr.bf16.mxu1 %v9480_v58 }
 0x6f3   :  { %5761 = vmatpush1.bf16.msra.mxu0 %v9481_v54  ;;  %5825 = vmatpush1.bf16.msra.mxu1 %v9482_v56 }
 0x6f4   :  { %5763 = vmatprep.subr.bf16.mxu0 %v9483_v12  ;;  %5827 = vmatprep.subr.bf16.mxu1 %v9732_v31 }
 0x6f7   :  { %5765 = vmatpush1.bf16.msra.mxu0 %v9733_v4  ;;  %5829 = vmatpush1.bf16.msra.mxu1 %v9734_v24 }
 0x6f8   :  { %5767 = vmatprep.subr.bf16.mxu0 %v9735_v9  ;;  %5831 = vmatprep.subr.bf16.mxu1 %v9736_v48 }
 0x6fb   :  { %5769 = vmatpush1.bf16.msra.mxu0 %v9737_v3  ;;  %5833 = vmatpush1.bf16.msra.mxu1 %v9738_v50  ;;  %v9749_v50 = vld [vmem:[#allocation156_spill] sm:$0xff]  ;;  %v9821_v3 = vld [vmem:[#allocation26_spill] sm:$0xff] }
 0x6fc   :  { %5771 = vmatprep.subr.bf16.mxu0 %v9739_v2  ;;  %5835 = vmatprep.subr.bf16.mxu1 %v9740_v47  ;;  %v9750_v2 = vld [vmem:[#allocation157_spill] sm:$0xff]  ;;  %v9751_v47 = vld [vmem:[#allocation158_spill] sm:$0xff] }
 0x6ff   :  { %5773 = vmatpush1.bf16.msra.mxu0 %v9741_v21  ;;  %5837 = vmatpush1.bf16.msra.mxu1 %v9742_v14  ;;  %v9752_v21 = vld [vmem:[#allocation159_spill] sm:$0xff]  ;;  %v9753_v14 = vld [vmem:[#allocation160_spill] sm:$0xff] }
 0x700   :  { %5775 = vmatprep.subr.bf16.mxu0 %v9743_v6  ;;  %5839 = vmatprep.subr.bf16.mxu1 %v9744_v11  ;;  %v9754_v6 = vld [vmem:[#allocation161_spill] sm:$0xff]  ;;  %v9755_v11 = vld [vmem:[#allocation34_spill] sm:$0xff] }
 0x703   :  { %5777 = vmatpush1.bf16.msra.mxu0 %v9745_v16  ;;  %5841 = vmatpush1.bf16.msra.mxu1 %v9746_v35  ;;  %v9756_v16 = vld [vmem:[#allocation35_spill] sm:$0xff] }
 0x704   :  { %5779 = vmatprep.subr.bf16.mxu0 %v9747_v49  ;;  %5843 = vmatprep.subr.bf16.mxu1 %v9748_v22  ;;  %v9757_v22 = vld [vmem:[#allocation36_spill] sm:$0xff]  ;;  %v9766_v49 = vld [vmem:[#allocation45_spill] sm:$0xff] }
 0x707   :  { %5781 = vmatpush1.bf16.msra.mxu0 %v9749_v50  ;;  %5845 = vmatpush1.bf16.msra.mxu1 %v9750_v2  ;;  %v9758_v50 = vld [vmem:[#allocation37_spill] sm:$0xff]  ;;  %v9759_v2 = vld [vmem:[#allocation38_spill] sm:$0xff] }
 0x708   :  { %5783 = vmatprep.subr.bf16.mxu0 %v9751_v47  ;;  %5847 = vmatprep.subr.bf16.mxu1 %v9752_v21  ;;  %v9760_v47 = vld [vmem:[#allocation39_spill] sm:$0xff]  ;;  %v9761_v21 = vld [vmem:[#allocation40_spill] sm:$0xff] }
 0x70b   :  { %5785 = vmatpush1.bf16.msra.mxu0 %v9753_v14  ;;  %5849 = vmatpush1.bf16.msra.mxu1 %v9754_v6  ;;  %v9762_v14 = vld [vmem:[#allocation41_spill] sm:$0xff]  ;;  %v9763_v6 = vld [vmem:[#allocation42_spill] sm:$0xff] }
 0x70c   :  { %5851 = vmatprep.subr.bf16.mxu0 %v9755_v11  ;;  %5915 = vmatprep.subr.bf16.mxu1 %v9756_v16  ;;  %v9764_v11 = vld [vmem:[#allocation43_spill] sm:$0xff]  ;;  %v9765_v16 = vld [vmem:[#allocation44_spill] sm:$0xff] }
 0x70e   :  { %2893 = vmatmul.mubr.f32.vlgmr.msra.gmra.mrb[26].mxu0 %v8349_v34  ;;  %2964 = vmatmul.mubr.f32.vlgmr.msra.gmra.mrb[26].mxu1 %v8349_v34  ;;  %v9767_v34 = vld [vmem:[#allocation46_spill] sm:$0xff] }
 0x70f   :  { %5853 = vmatpush1.bf16.msra.mxu0 %v9757_v22  ;;  %5917 = vmatpush1.bf16.msra.mxu1 %v9758_v50  ;;  %v9768_v22 = vld [vmem:[#allocation47_spill] sm:$0xff]  ;;  %v9769_v50 = vld [vmem:[#allocation48_spill] sm:$0xff] }
 0x710   :  { %5855 = vmatprep.subr.bf16.mxu0 %v9759_v2  ;;  %5919 = vmatprep.subr.bf16.mxu1 %v9760_v47  ;;  %v9770_v2 = vld [vmem:[#allocation49_spill] sm:$0xff]  ;;  %v9771_v47 = vld [vmem:[#allocation50_spill] sm:$0xff] }
 0x713   :  { %5857 = vmatpush1.bf16.msra.mxu0 %v9761_v21  ;;  %5921 = vmatpush1.bf16.msra.mxu1 %v9762_v14  ;;  %v9772_v21 = vld [vmem:[#allocation51_spill] sm:$0xff]  ;;  %v9773_v14 = vld [vmem:[#allocation52_spill] sm:$0xff] }
 0x714   :  { %5859 = vmatprep.subr.bf16.mxu0 %v9763_v6  ;;  %5923 = vmatprep.subr.bf16.mxu1 %v9764_v11  ;;  %v9774_v6 = vld [vmem:[#allocation53_spill] sm:$0xff]  ;;  %v9775_v11 = vld [vmem:[#allocation54_spill] sm:$0xff] }
 0x717   :  { %5861 = vmatpush1.bf16.msra.mxu0 %v9765_v16  ;;  %5925 = vmatpush1.bf16.msra.mxu1 %v9766_v49  ;;  %v9776_v16 = vld [vmem:[#allocation55_spill] sm:$0xff]  ;;  %v9777_v49 = vld [vmem:[#allocation56_spill] sm:$0xff] }
 0x718   :  { %5863 = vmatprep.subr.bf16.mxu0 %v9767_v34  ;;  %5927 = vmatprep.subr.bf16.mxu1 %v9768_v22  ;;  %v9778_v34 = vld [vmem:[#allocation57_spill] sm:$0xff]  ;;  %v9779_v22 = vld [vmem:[#allocation58_spill] sm:$0xff] }
 0x71b   :  { %5865 = vmatpush1.bf16.msra.mxu0 %v9769_v50  ;;  %5929 = vmatpush1.bf16.msra.mxu1 %v9770_v2  ;;  %v9780_v50 = vld [vmem:[#allocation59_spill] sm:$0xff]  ;;  %v9781_v2 = vld [vmem:[#allocation60_spill] sm:$0xff] }
 0x71c   :  { %5867 = vmatprep.subr.bf16.mxu0 %v9771_v47  ;;  %5931 = vmatprep.subr.bf16.mxu1 %v9772_v21  ;;  %v9782_v47 = vld [vmem:[#allocation61_spill] sm:$0xff]  ;;  %v9783_v21 = vld [vmem:[#allocation62_spill] sm:$0xff] }
 0x71f   :  { %5869 = vmatpush1.bf16.msra.mxu0 %v9773_v14  ;;  %5933 = vmatpush1.bf16.msra.mxu1 %v9774_v6  ;;  %v9784_v14 = vld [vmem:[#allocation63_spill] sm:$0xff]  ;;  %v9785_v6 = vld [vmem:[#allocation64_spill] sm:$0xff] }
 0x720   :  { %5871 = vmatprep.subr.bf16.mxu0 %v9775_v11  ;;  %5935 = vmatprep.subr.bf16.mxu1 %v9776_v16  ;;  %v9786_v11 = vld [vmem:[#allocation65_spill] sm:$0xff]  ;;  %v9787_v16 = vld [vmem:[#allocation66_spill] sm:$0xff] }
 0x723   :  { %5873 = vmatpush1.bf16.msra.mxu0 %v9777_v49  ;;  %5937 = vmatpush1.bf16.msra.mxu1 %v9778_v34  ;;  %v9788_v49 = vld [vmem:[#allocation67_spill] sm:$0xff]  ;;  %v9789_v34 = vld [vmem:[#allocation68_spill] sm:$0xff] }
 0x724   :  { %5875 = vmatprep.subr.bf16.mxu0 %v9779_v22  ;;  %5939 = vmatprep.subr.bf16.mxu1 %v9780_v50  ;;  %v9790_v22 = vld [vmem:[#allocation69_spill] sm:$0xff]  ;;  %v9791_v50 = vld [vmem:[#allocation70_spill] sm:$0xff] }
 0x727   :  { %5877 = vmatpush1.bf16.msra.mxu0 %v9781_v2  ;;  %5941 = vmatpush1.bf16.msra.mxu1 %v9782_v47  ;;  %v9792_v2 = vld [vmem:[#allocation71_spill] sm:$0xff]  ;;  %v9793_v47 = vld [vmem:[#allocation72_spill] sm:$0xff] }
 0x728   :  { %5879 = vmatprep.subr.bf16.mxu0 %v9783_v21  ;;  %5943 = vmatprep.subr.bf16.mxu1 %v9784_v14  ;;  %v9794_v21 = vld [vmem:[#allocation73_spill] sm:$0xff]  ;;  %v9795_v14 = vld [vmem:[#allocation74_spill] sm:$0xff] }
 0x72b   :  { %5881 = vmatpush1.bf16.msra.mxu0 %v9785_v6  ;;  %5945 = vmatpush1.bf16.msra.mxu1 %v9786_v11  ;;  %v9796_v6 = vld [vmem:[#allocation75_spill] sm:$0xff]  ;;  %v9797_v11 = vld [vmem:[#allocation76_spill] sm:$0xff] }
 0x72c   :  { %5883 = vmatprep.subr.bf16.mxu0 %v9787_v16  ;;  %5947 = vmatprep.subr.bf16.mxu1 %v9788_v49  ;;  %v9798_v16 = vld [vmem:[#allocation77_spill] sm:$0xff]  ;;  %v9799_v49 = vld [vmem:[#allocation78_spill] sm:$0xff] }
 0x72f   :  { %5885 = vmatpush1.bf16.msra.mxu0 %v9789_v34  ;;  %5949 = vmatpush1.bf16.msra.mxu1 %v9790_v22  ;;  %v9800_v34 = vld [vmem:[#allocation79_spill] sm:$0xff]  ;;  %v9801_v22 = vld [vmem:[#allocation80_spill] sm:$0xff] }
 0x730   :  { %5887 = vmatprep.subr.bf16.mxu0 %v9791_v50  ;;  %5951 = vmatprep.subr.bf16.mxu1 %v9792_v2  ;;  %v9802_v50 = vld [vmem:[#allocation81_spill] sm:$0xff]  ;;  %v9803_v2 = vld [vmem:[#allocation82_spill] sm:$0xff] }
 0x733   :  { %5889 = vmatpush1.bf16.msra.mxu0 %v9793_v47  ;;  %5953 = vmatpush1.bf16.msra.mxu1 %v9794_v21  ;;  %v9804_v47 = vld [vmem:[#allocation83_spill] sm:$0xff]  ;;  %v9805_v21 = vld [vmem:[#allocation84_spill] sm:$0xff] }
 0x734   :  { %5891 = vmatprep.subr.bf16.mxu0 %v9795_v14  ;;  %5955 = vmatprep.subr.bf16.mxu1 %v9796_v6  ;;  %v9806_v14 = vld [vmem:[#allocation85_spill] sm:$0xff]  ;;  %v9807_v6 = vld [vmem:[#allocation86_spill] sm:$0xff] }
 0x737   :  { %5893 = vmatpush1.bf16.msra.mxu0 %v9797_v11  ;;  %5957 = vmatpush1.bf16.msra.mxu1 %v9798_v16  ;;  %v9808_v11 = vld [vmem:[#allocation87_spill] sm:$0xff]  ;;  %v9809_v16 = vld [vmem:[#allocation88_spill] sm:$0xff] }
 0x738   :  { %5895 = vmatprep.subr.bf16.mxu0 %v9799_v49  ;;  %5959 = vmatprep.subr.bf16.mxu1 %v9800_v34  ;;  %v9810_v49 = vld [vmem:[#allocation89_spill] sm:$0xff]  ;;  %v9811_v34 = vld [vmem:[#allocation90_spill] sm:$0xff] }
 0x73b   :  { %5897 = vmatpush1.bf16.msra.mxu0 %v9801_v22  ;;  %5961 = vmatpush1.bf16.msra.mxu1 %v9802_v50  ;;  %v9812_v22 = vld [vmem:[#allocation91_spill] sm:$0xff]  ;;  %v9813_v50 = vld [vmem:[#allocation92_spill] sm:$0xff] }
 0x73c   :  { %5899 = vmatprep.subr.bf16.mxu0 %v9803_v2  ;;  %5963 = vmatprep.subr.bf16.mxu1 %v9804_v47  ;;  %v9814_v2 = vld [vmem:[#allocation93_spill] sm:$0xff]  ;;  %v9815_v47 = vld [vmem:[#allocation94_spill] sm:$0xff] }
 0x73f   :  { %5901 = vmatpush1.bf16.msra.mxu0 %v9805_v21  ;;  %5965 = vmatpush1.bf16.msra.mxu1 %v9806_v14  ;;  %v9816_v21 = vld [vmem:[#allocation95_spill] sm:$0xff]  ;;  %v9817_v14 = vld [vmem:[#allocation96_spill] sm:$0xff] }
 0x740   :  { %5903 = vmatprep.subr.bf16.mxu0 %v9807_v6  ;;  %5967 = vmatprep.subr.bf16.mxu1 %v9808_v11  ;;  %v9818_v6 = vld [vmem:[#allocation97_spill] sm:$0xff]  ;;  %v9819_v11 = vld [vmem:[#allocation98_spill] sm:$0xff] }
 0x743   :  { %5905 = vmatpush1.bf16.msra.mxu0 %v9809_v16  ;;  %5969 = vmatpush1.bf16.msra.mxu1 %v9810_v49  ;;  %v9820_v16 = vld [vmem:[#allocation99_spill] sm:$0xff] }
 0x744   :  { %5907 = vmatprep.subr.bf16.mxu0 %v9811_v34  ;;  %5971 = vmatprep.subr.bf16.mxu1 %v9812_v22 }
 0x747   :  { %5909 = vmatpush1.bf16.msra.mxu0 %v9813_v50  ;;  %5973 = vmatpush1.bf16.msra.mxu1 %v9814_v2 }
 0x748   :  { %5911 = vmatprep.subr.bf16.mxu0 %v9815_v47  ;;  %5975 = vmatprep.subr.bf16.mxu1 %v9816_v21 }
 0x74b   :  { %5913 = vmatpush1.bf16.msra.mxu0 %v9817_v14  ;;  %5977 = vmatpush1.bf16.msra.mxu1 %v9818_v6 }
 0x74c   :  { %5979 = vmatprep.subr.bf16.mxu0 %v9819_v11  ;;  %6043 = vmatprep.subr.bf16.mxu1 %v9820_v16 }
 0x7a1   :  { %v2752_v49 = vpop.f32.mrb[10].mxu0  ;;  %v2823_v34 = vpop.f32.mrb[10].mxu1 }
 0x7a2   :  { %v2754_v35 = vpop.f32.mrb[11].mxu0  ;;  %v2825_v22 = vpop.f32.mrb[11].mxu1  ;;  %v6500_v50 = vadd.f32 %v2752_v49, %v9821_v3  ;;  %v6516_v2 = vadd.f32 %v2823_v34, %v9348_v43 }
 0x7a3   :  { %v6501_v47 = vadd.f32 %v2754_v35, %v9443_v13  ;;  %v6517_v21 = vadd.f32 %v2825_v22, %v9539_v55 }
 0x7a4   :  { %v4278_v48 = vmul.f32 -1.442695, %v6500_v50  ;;  %v4280_v14 = vmul.f32 -1.442695, %v6516_v2  ;;  %v9822_v2 = vld [vmem:[#allocation32_spill] sm:$0xff] }
 0x7a5   :  { %v4279_v9 = vmul.f32 -1.442695, %v6501_v47  ;;  %v4281_v6 = vmul.f32 -1.442695, %v6517_v21  ;;  %v9823_v21 = vld [vmem:[#allocation31_spill] sm:$0xff] }
 0x7a6   :  { %6789 = vpow2.f32 %v4278_v48 }
 0x7a7   :  { %6791 = vpow2.f32 %v4280_v14 }
 0x7a8   :  { %6793 = vpow2.f32 %v4279_v9 }
 0x7a9   :  { %6795 = vpow2.f32 %v4281_v6 }
 0x7b0   :  { %v6790_v16 = vpop.eup %6789 }
 0x7b1   :  { %v6792_v11 = vpop.eup %6791  ;;  %v2996_v31 = vadd.f32 1.0, %v6790_v16 }
 0x7b2   :  { %v6794_v24 = vpop.eup %6793  ;;  %v2998_v49 = vadd.f32 1.0, %v6792_v11 }
 0x7b3   :  { %v6796_v4 = vpop.eup %6795  ;;  %v2997_v3 = vadd.f32 1.0, %v6794_v24  ;;  %6797 = vrcp.f32 %v2996_v31 }
 0x7b4   :  { %v2999_v34 = vadd.f32 1.0, %v6796_v4  ;;  %6799 = vrcp.f32 %v2998_v49 }
 0x7b5   :  { %6801 = vrcp.f32 %v2997_v3 }
 0x7b6   :  { %6803 = vrcp.f32 %v2999_v34 }
 0x7bd   :  { %v6798_v31 = vpop.eup %6797 }
 0x7be   :  { %v6800_v4 = vpop.eup %6799 }
 0x7bf   :  { %v6802_v3 = vpop.eup %6801 }
 0x7c0   :  { %v6804_v11 = vpop.eup %6803 }
 0x7e1   :  { %v2894_v35 = vpop.f32.mrb[26].mxu0  ;;  %v2965_v22 = vpop.f32.mrb[26].mxu1 }
 0x7e2   :  { %v6532_v50 = vadd.f32 %v2894_v35, %v9445_v46  ;;  %v6548_v48 = vadd.f32 %v2965_v22, %v9822_v2  ;;  %v2896_v47 = vpop.f32.mrb[27].mxu0  ;;  %v2967_v9 = vpop.f32.mrb[27].mxu1  ;;  %v3016_v22 = vmul.f32 %v6800_v4, %v8341_v30 }
 0x7e3   :  { %v6533_v14 = vadd.f32 %v2896_v47, %v9823_v21  ;;  %v6549_v6 = vadd.f32 %v2967_v9, %v9354_v5  ;;  %v3017_v47 = vmul.f32 %v6804_v11, %v8343_v62  ;;  %v9829_v11 = vld [vmem:[#allocation142_spill] sm:$0xff] }
 0x7e4   :  { %v4282_v16 = vmul.f32 -1.442695, %v6532_v50  ;;  %6805 = vtanh.f32 %v6548_v48 }
 0x7e5   :  { %v4283_v24 = vmul.f32 -1.442695, %v6533_v14  ;;  %6807 = vtanh.f32 %v6549_v6 }
 0x7e6   :  { %6809 = vpow2.f32 %v4282_v16 }
 0x7e7   :  { %6811 = vpow2.f32 %v4283_v24 }
 0x7ee   :  { %v6806_v49 = vpop.eup %6805 }
 0x7ef   :  { %v6808_v35 = vpop.eup %6807  ;;  %v3018_v2 = vmul.f32 %v6806_v49, %v6798_v31  ;;  %v9830_v49 = vld [vmem:[#allocation143_spill] sm:$0xff] }
 0x7f0   :  { %v6810_v34 = vpop.eup %6809  ;;  %v3019_v21 = vmul.f32 %v6808_v35, %v6802_v3  ;;  %v9828_v3 = vld [vmem:[#allocation141_spill] sm:$0xff]  ;;  %v9831_v35 = vld [vmem:[#allocation144_spill] sm:$0xff] }
 0x7f1   :  { %v6812_v9 = vpop.eup %6811  ;;  %v3000_v50 = vadd.f32 1.0, %v6810_v34  ;;  %v8497_v48 = vadd.f32 %v3018_v2, %v3016_v22  ;;  %v9826_v2 = vld [vmem:[#allocation139_spill] sm:$0xff]  ;;  %v9832_v22 = vld [vmem:[#allocation145_spill] sm:$0xff]  ;;  %v9833_v34 = vld [vmem:[#allocation146_spill] sm:$0xff] }
 0x7f2   :  { %v3001_v14 = vadd.f32 1.0, %v6812_v9  ;;  %v8499_v6 = vadd.f32 %v3019_v21, %v3017_v47  ;;  %v9827_v21 = vld [vmem:[#allocation140_spill] sm:$0xff]  ;;  %v9834_v47 = vld [vmem:[#allocation147_spill] sm:$0xff] }
 0x7f3   :  { %6813 = vrcp.f32 %v3000_v50  ;;  %v9835_v9 = vld [vmem:[#allocation148_spill] sm:$0xff]  ;;  %v9836_v50 = vld [vmem:[#allocation149_spill] sm:$0xff] }
 0x7f4   :  { %6815 = vtanh.f32 %v8497_v48 }
 0x7f5   :  { %6817 = vrcp.f32 %v3001_v14  ;;  %v9837_v14 = vld [vmem:[#allocation150_spill] sm:$0xff] }
 0x7f6   :  { %6819 = vtanh.f32 %v8499_v6 }
 0x7fd   :  { %v6814_v16 = vpop.eup %6813 }
 0x7fe   :  { %v6816_v30 = vpop.eup %6815 }
 0x7ff   :  { %v6818_v24 = vpop.eup %6817  ;;  %v8505_v62 = vmul.f32 %v6816_v30, %v6814_v16  ;;  %v9838_v16 = vld [vmem:[#allocation151_spill] sm:$0xff]  ;;  %v9839_v30 = vld [vmem:[#allocation152_spill] sm:$0xff] }
 0x800   :  { %v6820_v31 = vpop.eup %6819 }
 0x801   :  { %v8503_v4 = vmul.f32 %v6820_v31, %v6818_v24  ;;  %9825 = vst [vmem:[#allocation107_spill] sm:$0xff] %v8505_v62  ;;  %v9840_v24 = vld [vmem:[#allocation153_spill] sm:$0xff]  ;;  %v9841_v31 = vld [vmem:[#allocation154_spill] sm:$0xff] }
 0x803   :  { %9824 = vst [vmem:[#allocation106_spill] sm:$0xff] %v8503_v4  ;;  %3100 = vmatprep.mubr.f32.mxu0 %v8503_v4  ;;  %3171 = vmatprep.mubr.f32.mxu1 %v8503_v4 }
 0x804   :  { %3101 = vmatmul.mubr.f32.vlgmr.msra.gmra.mrb[12].mxu0 %v8505_v62  ;;  %3172 = vmatmul.mubr.f32.vlgmr.msra.gmra.mrb[12].mxu1 %v8505_v62 }
 0x805   :  { %5981 = vmatpush1.bf16.msra.mxu0 %v9357_v42  ;;  %6045 = vmatpush1.bf16.msra.mxu1 %v9358_v7 }
 0x806   :  { %3242 = vmatprep.mubr.f32.mxu0 %v8503_v4  ;;  %3313 = vmatprep.mubr.f32.mxu1 %v8503_v4  ;;  %v9842_v4 = vld [vmem:[#allocation155_spill] sm:$0xff] }
 0x807   :  { %5983 = vmatprep.subr.bf16.mxu0 %v9359_v63  ;;  %6047 = vmatprep.subr.bf16.mxu1 %v9360_v20 }
 0x809   :  { %5985 = vmatpush1.bf16.msra.mxu0 %v9361_v17  ;;  %6049 = vmatpush1.bf16.msra.mxu1 %v9450_v57 }
 0x80a   :  { %5987 = vmatprep.subr.bf16.mxu0 %v9451_v8  ;;  %6051 = vmatprep.subr.bf16.mxu1 %v9452_v18 }
 0x80d   :  { %5989 = vmatpush1.bf16.msra.mxu0 %v9453_v33  ;;  %6053 = vmatpush1.bf16.msra.mxu1 %v9454_v37 }
 0x80e   :  { %5991 = vmatprep.subr.bf16.mxu0 %v9455_v29  ;;  %6055 = vmatprep.subr.bf16.mxu1 %v9544_v10 }
 0x811   :  { %5993 = vmatpush1.bf16.msra.mxu0 %v9545_v28  ;;  %6057 = vmatpush1.bf16.msra.mxu1 %v9546_v59 }
 0x812   :  { %5995 = vmatprep.subr.bf16.mxu0 %v9547_v25  ;;  %6059 = vmatprep.subr.bf16.mxu1 %v9548_v40 }
 0x815   :  { %5997 = vmatpush1.bf16.msra.mxu0 %v9549_v60  ;;  %6061 = vmatpush1.bf16.msra.mxu1 %v9550_v26 }
 0x816   :  { %5999 = vmatprep.subr.bf16.mxu0 %v9638_v44  ;;  %6063 = vmatprep.subr.bf16.mxu1 %v9552_v19 }
 0x819   :  { %6001 = vmatpush1.bf16.msra.mxu0 %v9553_v27  ;;  %6065 = vmatpush1.bf16.msra.mxu1 %v9554_v0 }
 0x81a   :  { %6003 = vmatprep.subr.bf16.mxu0 %v9555_v23  ;;  %6067 = vmatprep.subr.bf16.mxu1 %v9556_v36 }
 0x81d   :  { %6005 = vmatpush1.bf16.msra.mxu0 %v9557_v61  ;;  %6069 = vmatpush1.bf16.msra.mxu1 %v9558_v32 }
 0x81e   :  { %6007 = vmatprep.subr.bf16.mxu0 %v9559_v1  ;;  %6071 = vmatprep.subr.bf16.mxu1 %v9560_v15 }
 0x821   :  { %6009 = vmatpush1.bf16.msra.mxu0 %v9473_v51  ;;  %6073 = vmatpush1.bf16.msra.mxu1 %v9561_v41 }
 0x822   :  { %6011 = vmatprep.subr.bf16.mxu0 %v9475_v53  ;;  %6075 = vmatprep.subr.bf16.mxu1 %v9476_v45 }
 0x825   :  { %6013 = vmatpush1.bf16.msra.mxu0 %v9477_v52  ;;  %6077 = vmatpush1.bf16.msra.mxu1 %v9478_v39 }
 0x826   :  { %6015 = vmatprep.subr.bf16.mxu0 %v9479_v38  ;;  %6079 = vmatprep.subr.bf16.mxu1 %v9480_v58 }
 0x829   :  { %6017 = vmatpush1.bf16.msra.mxu0 %v9481_v54  ;;  %6081 = vmatpush1.bf16.msra.mxu1 %v9482_v56 }
 0x82a   :  { %6019 = vmatprep.subr.bf16.mxu0 %v9483_v12  ;;  %6083 = vmatprep.subr.bf16.mxu1 %v9826_v2 }
 0x82d   :  { %6021 = vmatpush1.bf16.msra.mxu0 %v9827_v21  ;;  %6085 = vmatpush1.bf16.msra.mxu1 %v9828_v3 }
 0x82e   :  { %6023 = vmatprep.subr.bf16.mxu0 %v9829_v11  ;;  %6087 = vmatprep.subr.bf16.mxu1 %v9830_v49 }
 0x831   :  { %6025 = vmatpush1.bf16.msra.mxu0 %v9831_v35  ;;  %6089 = vmatpush1.bf16.msra.mxu1 %v9832_v22  ;;  %v9843_v22 = vld [vmem:[#allocation156_spill] sm:$0xff]  ;;  %v9915_v35 = vld [vmem:[#allocation26_spill] sm:$0xff] }
 0x832   :  { %6027 = vmatprep.subr.bf16.mxu0 %v9833_v34  ;;  %6091 = vmatprep.subr.bf16.mxu1 %v9834_v47  ;;  %v9844_v34 = vld [vmem:[#allocation157_spill] sm:$0xff]  ;;  %v9845_v47 = vld [vmem:[#allocation158_spill] sm:$0xff] }
 0x835   :  { %6029 = vmatpush1.bf16.msra.mxu0 %v9835_v9  ;;  %6093 = vmatpush1.bf16.msra.mxu1 %v9836_v50  ;;  %v9846_v9 = vld [vmem:[#allocation159_spill] sm:$0xff]  ;;  %v9847_v50 = vld [vmem:[#allocation160_spill] sm:$0xff] }
 0x836   :  { %6031 = vmatprep.subr.bf16.mxu0 %v9837_v14  ;;  %6095 = vmatprep.subr.bf16.mxu1 %v9838_v16  ;;  %v9848_v14 = vld [vmem:[#allocation161_spill] sm:$0xff]  ;;  %v9849_v16 = vld [vmem:[#allocation34_spill] sm:$0xff] }
 0x839   :  { %6033 = vmatpush1.bf16.msra.mxu0 %v9839_v30  ;;  %6097 = vmatpush1.bf16.msra.mxu1 %v9840_v24  ;;  %v9850_v30 = vld [vmem:[#allocation35_spill] sm:$0xff] }
 0x83a   :  { %6035 = vmatprep.subr.bf16.mxu0 %v9841_v31  ;;  %6099 = vmatprep.subr.bf16.mxu1 %v9842_v4  ;;  %v9851_v4 = vld [vmem:[#allocation36_spill] sm:$0xff]  ;;  %v9860_v31 = vld [vmem:[#allocation45_spill] sm:$0xff] }
 0x83d   :  { %6037 = vmatpush1.bf16.msra.mxu0 %v9843_v22  ;;  %6101 = vmatpush1.bf16.msra.mxu1 %v9844_v34  ;;  %v9852_v22 = vld [vmem:[#allocation37_spill] sm:$0xff]  ;;  %v9853_v34 = vld [vmem:[#allocation38_spill] sm:$0xff] }
 0x83e   :  { %6039 = vmatprep.subr.bf16.mxu0 %v9845_v47  ;;  %6103 = vmatprep.subr.bf16.mxu1 %v9846_v9  ;;  %v9854_v47 = vld [vmem:[#allocation39_spill] sm:$0xff]  ;;  %v9855_v9 = vld [vmem:[#allocation40_spill] sm:$0xff] }
 0x841   :  { %6041 = vmatpush1.bf16.msra.mxu0 %v9847_v50  ;;  %6105 = vmatpush1.bf16.msra.mxu1 %v9848_v14  ;;  %v9856_v50 = vld [vmem:[#allocation41_spill] sm:$0xff]  ;;  %v9857_v14 = vld [vmem:[#allocation42_spill] sm:$0xff] }
 0x842   :  { %6107 = vmatprep.subr.bf16.mxu0 %v9849_v16  ;;  %6171 = vmatprep.subr.bf16.mxu1 %v9850_v30  ;;  %v9858_v16 = vld [vmem:[#allocation43_spill] sm:$0xff]  ;;  %v9859_v30 = vld [vmem:[#allocation44_spill] sm:$0xff] }
 0x844   :  { %3243 = vmatmul.mubr.f32.vlgmr.msra.gmra.mrb[28].mxu0 %v8505_v62  ;;  %3314 = vmatmul.mubr.f32.vlgmr.msra.gmra.mrb[28].mxu1 %v8505_v62  ;;  %v9861_v62 = vld [vmem:[#allocation46_spill] sm:$0xff] }
 0x845   :  { %6109 = vmatpush1.bf16.msra.mxu0 %v9851_v4  ;;  %6173 = vmatpush1.bf16.msra.mxu1 %v9852_v22  ;;  %v9862_v4 = vld [vmem:[#allocation47_spill] sm:$0xff]  ;;  %v9863_v22 = vld [vmem:[#allocation48_spill] sm:$0xff] }
 0x846   :  { %6111 = vmatprep.subr.bf16.mxu0 %v9853_v34  ;;  %6175 = vmatprep.subr.bf16.mxu1 %v9854_v47  ;;  %v9864_v34 = vld [vmem:[#allocation49_spill] sm:$0xff]  ;;  %v9865_v47 = vld [vmem:[#allocation50_spill] sm:$0xff] }
 0x849   :  { %6113 = vmatpush1.bf16.msra.mxu0 %v9855_v9  ;;  %6177 = vmatpush1.bf16.msra.mxu1 %v9856_v50  ;;  %v9866_v9 = vld [vmem:[#allocation51_spill] sm:$0xff]  ;;  %v9867_v50 = vld [vmem:[#allocation52_spill] sm:$0xff] }
 0x84a   :  { %6115 = vmatprep.subr.bf16.mxu0 %v9857_v14  ;;  %6179 = vmatprep.subr.bf16.mxu1 %v9858_v16  ;;  %v9868_v14 = vld [vmem:[#allocation53_spill] sm:$0xff]  ;;  %v9869_v16 = vld [vmem:[#allocation54_spill] sm:$0xff] }
 0x84d   :  { %6117 = vmatpush1.bf16.msra.mxu0 %v9859_v30  ;;  %6181 = vmatpush1.bf16.msra.mxu1 %v9860_v31  ;;  %v9870_v30 = vld [vmem:[#allocation55_spill] sm:$0xff]  ;;  %v9871_v31 = vld [vmem:[#allocation56_spill] sm:$0xff] }
 0x84e   :  { %6119 = vmatprep.subr.bf16.mxu0 %v9861_v62  ;;  %6183 = vmatprep.subr.bf16.mxu1 %v9862_v4  ;;  %v9872_v62 = vld [vmem:[#allocation57_spill] sm:$0xff]  ;;  %v9873_v4 = vld [vmem:[#allocation58_spill] sm:$0xff] }
 0x851   :  { %6121 = vmatpush1.bf16.msra.mxu0 %v9863_v22  ;;  %6185 = vmatpush1.bf16.msra.mxu1 %v9864_v34  ;;  %v9874_v22 = vld [vmem:[#allocation59_spill] sm:$0xff]  ;;  %v9875_v34 = vld [vmem:[#allocation60_spill] sm:$0xff] }
 0x852   :  { %6123 = vmatprep.subr.bf16.mxu0 %v9865_v47  ;;  %6187 = vmatprep.subr.bf16.mxu1 %v9866_v9  ;;  %v9876_v47 = vld [vmem:[#allocation61_spill] sm:$0xff]  ;;  %v9877_v9 = vld [vmem:[#allocation62_spill] sm:$0xff] }
 0x855   :  { %6125 = vmatpush1.bf16.msra.mxu0 %v9867_v50  ;;  %6189 = vmatpush1.bf16.msra.mxu1 %v9868_v14  ;;  %v9878_v50 = vld [vmem:[#allocation63_spill] sm:$0xff]  ;;  %v9879_v14 = vld [vmem:[#allocation64_spill] sm:$0xff] }
 0x856   :  { %6127 = vmatprep.subr.bf16.mxu0 %v9869_v16  ;;  %6191 = vmatprep.subr.bf16.mxu1 %v9870_v30  ;;  %v9880_v16 = vld [vmem:[#allocation65_spill] sm:$0xff]  ;;  %v9881_v30 = vld [vmem:[#allocation66_spill] sm:$0xff] }
 0x859   :  { %6129 = vmatpush1.bf16.msra.mxu0 %v9871_v31  ;;  %6193 = vmatpush1.bf16.msra.mxu1 %v9872_v62  ;;  %v9882_v31 = vld [vmem:[#allocation67_spill] sm:$0xff]  ;;  %v9883_v62 = vld [vmem:[#allocation68_spill] sm:$0xff] }
 0x85a   :  { %6131 = vmatprep.subr.bf16.mxu0 %v9873_v4  ;;  %6195 = vmatprep.subr.bf16.mxu1 %v9874_v22  ;;  %v9884_v4 = vld [vmem:[#allocation69_spill] sm:$0xff]  ;;  %v9885_v22 = vld [vmem:[#allocation70_spill] sm:$0xff] }
 0x85d   :  { %6133 = vmatpush1.bf16.msra.mxu0 %v9875_v34  ;;  %6197 = vmatpush1.bf16.msra.mxu1 %v9876_v47  ;;  %v9886_v34 = vld [vmem:[#allocation71_spill] sm:$0xff]  ;;  %v9887_v47 = vld [vmem:[#allocation72_spill] sm:$0xff] }
 0x85e   :  { %6135 = vmatprep.subr.bf16.mxu0 %v9877_v9  ;;  %6199 = vmatprep.subr.bf16.mxu1 %v9878_v50  ;;  %v9888_v9 = vld [vmem:[#allocation73_spill] sm:$0xff]  ;;  %v9889_v50 = vld [vmem:[#allocation74_spill] sm:$0xff] }
 0x861   :  { %6137 = vmatpush1.bf16.msra.mxu0 %v9879_v14  ;;  %6201 = vmatpush1.bf16.msra.mxu1 %v9880_v16  ;;  %v9890_v14 = vld [vmem:[#allocation75_spill] sm:$0xff]  ;;  %v9891_v16 = vld [vmem:[#allocation76_spill] sm:$0xff] }
 0x862   :  { %6139 = vmatprep.subr.bf16.mxu0 %v9881_v30  ;;  %6203 = vmatprep.subr.bf16.mxu1 %v9882_v31  ;;  %v9892_v30 = vld [vmem:[#allocation77_spill] sm:$0xff]  ;;  %v9893_v31 = vld [vmem:[#allocation78_spill] sm:$0xff] }
 0x865   :  { %6141 = vmatpush1.bf16.msra.mxu0 %v9883_v62  ;;  %6205 = vmatpush1.bf16.msra.mxu1 %v9884_v4  ;;  %v9894_v62 = vld [vmem:[#allocation79_spill] sm:$0xff]  ;;  %v9895_v4 = vld [vmem:[#allocation80_spill] sm:$0xff] }
 0x866   :  { %6143 = vmatprep.subr.bf16.mxu0 %v9885_v22  ;;  %6207 = vmatprep.subr.bf16.mxu1 %v9886_v34  ;;  %v9896_v22 = vld [vmem:[#allocation81_spill] sm:$0xff]  ;;  %v9897_v34 = vld [vmem:[#allocation82_spill] sm:$0xff] }
 0x869   :  { %6145 = vmatpush1.bf16.msra.mxu0 %v9887_v47  ;;  %6209 = vmatpush1.bf16.msra.mxu1 %v9888_v9  ;;  %v9898_v47 = vld [vmem:[#allocation83_spill] sm:$0xff]  ;;  %v9899_v9 = vld [vmem:[#allocation84_spill] sm:$0xff] }
 0x86a   :  { %6147 = vmatprep.subr.bf16.mxu0 %v9889_v50  ;;  %6211 = vmatprep.subr.bf16.mxu1 %v9890_v14  ;;  %v9900_v50 = vld [vmem:[#allocation85_spill] sm:$0xff]  ;;  %v9901_v14 = vld [vmem:[#allocation86_spill] sm:$0xff] }
 0x86d   :  { %6149 = vmatpush1.bf16.msra.mxu0 %v9891_v16  ;;  %6213 = vmatpush1.bf16.msra.mxu1 %v9892_v30  ;;  %v9902_v16 = vld [vmem:[#allocation87_spill] sm:$0xff]  ;;  %v9903_v30 = vld [vmem:[#allocation88_spill] sm:$0xff] }
 0x86e   :  { %6151 = vmatprep.subr.bf16.mxu0 %v9893_v31  ;;  %6215 = vmatprep.subr.bf16.mxu1 %v9894_v62  ;;  %v9904_v31 = vld [vmem:[#allocation89_spill] sm:$0xff]  ;;  %v9905_v62 = vld [vmem:[#allocation90_spill] sm:$0xff] }
 0x871   :  { %6153 = vmatpush1.bf16.msra.mxu0 %v9895_v4  ;;  %6217 = vmatpush1.bf16.msra.mxu1 %v9896_v22  ;;  %v9906_v4 = vld [vmem:[#allocation91_spill] sm:$0xff]  ;;  %v9907_v22 = vld [vmem:[#allocation92_spill] sm:$0xff] }
 0x872   :  { %6155 = vmatprep.subr.bf16.mxu0 %v9897_v34  ;;  %6219 = vmatprep.subr.bf16.mxu1 %v9898_v47  ;;  %v9908_v34 = vld [vmem:[#allocation93_spill] sm:$0xff]  ;;  %v9909_v47 = vld [vmem:[#allocation94_spill] sm:$0xff] }
 0x875   :  { %6157 = vmatpush1.bf16.msra.mxu0 %v9899_v9  ;;  %6221 = vmatpush1.bf16.msra.mxu1 %v9900_v50  ;;  %v9910_v9 = vld [vmem:[#allocation95_spill] sm:$0xff]  ;;  %v9911_v50 = vld [vmem:[#allocation96_spill] sm:$0xff] }
 0x876   :  { %6159 = vmatprep.subr.bf16.mxu0 %v9901_v14  ;;  %6223 = vmatprep.subr.bf16.mxu1 %v9902_v16  ;;  %v9912_v14 = vld [vmem:[#allocation97_spill] sm:$0xff]  ;;  %v9913_v16 = vld [vmem:[#allocation98_spill] sm:$0xff] }
 0x879   :  { %6161 = vmatpush1.bf16.msra.mxu0 %v9903_v30  ;;  %6225 = vmatpush1.bf16.msra.mxu1 %v9904_v31  ;;  %v9914_v30 = vld [vmem:[#allocation99_spill] sm:$0xff] }
 0x87a   :  { %6163 = vmatprep.subr.bf16.mxu0 %v9905_v62  ;;  %6227 = vmatprep.subr.bf16.mxu1 %v9906_v4 }
 0x87d   :  { %6165 = vmatpush1.bf16.msra.mxu0 %v9907_v22  ;;  %6229 = vmatpush1.bf16.msra.mxu1 %v9908_v34 }
 0x87e   :  { %6167 = vmatprep.subr.bf16.mxu0 %v9909_v47  ;;  %6231 = vmatprep.subr.bf16.mxu1 %v9910_v9 }
 0x881   :  { %6169 = vmatpush1.bf16.msra.mxu0 %v9911_v50  ;;  %6233 = vmatpush1.bf16.msra.mxu1 %v9912_v14 }
 0x882   :  { %6235 = vmatprep.subr.bf16.mxu0 %v9913_v16  ;;  %6299 = vmatprep.subr.bf16.mxu1 %v9914_v30 }
 0x8d7   :  { %v3102_v31 = vpop.f32.mrb[12].mxu0  ;;  %v3173_v62 = vpop.f32.mrb[12].mxu1 }
 0x8d8   :  { %v3104_v24 = vpop.f32.mrb[13].mxu0  ;;  %v3175_v4 = vpop.f32.mrb[13].mxu1  ;;  %v6502_v22 = vadd.f32 %v3102_v31, %v9915_v35  ;;  %v6518_v34 = vadd.f32 %v3173_v62, %v9348_v43 }
 0x8d9   :  { %v6503_v47 = vadd.f32 %v3104_v24, %v9443_v13  ;;  %v6519_v9 = vadd.f32 %v3175_v4, %v9539_v55 }
 0x8da   :  { %v4284_v49 = vmul.f32 -1.442695, %v6502_v22  ;;  %v4286_v50 = vmul.f32 -1.442695, %v6518_v34  ;;  %v9916_v34 = vld [vmem:[#allocation32_spill] sm:$0xff] }
 0x8db   :  { %v4285_v11 = vmul.f32 -1.442695, %v6503_v47  ;;  %v4287_v14 = vmul.f32 -1.442695, %v6519_v9  ;;  %v9917_v9 = vld [vmem:[#allocation31_spill] sm:$0xff] }
 0x8dc   :  { %6821 = vpow2.f32 %v4284_v49 }
 0x8dd   :  { %6823 = vpow2.f32 %v4286_v50 }
 0x8de   :  { %6825 = vpow2.f32 %v4285_v11 }
 0x8df   :  { %6827 = vpow2.f32 %v4287_v14 }
 0x8e6   :  { %v6822_v16 = vpop.eup %6821 }
 0x8e7   :  { %v6824_v30 = vpop.eup %6823  ;;  %v3346_v2 = vadd.f32 1.0, %v6822_v16 }
 0x8e8   :  { %v6826_v3 = vpop.eup %6825  ;;  %v3348_v31 = vadd.f32 1.0, %v6824_v30 }
 0x8e9   :  { %v6828_v21 = vpop.eup %6827  ;;  %v3347_v35 = vadd.f32 1.0, %v6826_v3  ;;  %6829 = vrcp.f32 %v3346_v2 }
 0x8ea   :  { %v3349_v62 = vadd.f32 1.0, %v6828_v21  ;;  %6831 = vrcp.f32 %v3348_v31 }
 0x8eb   :  { %6833 = vrcp.f32 %v3347_v35 }
 0x8ec   :  { %6835 = vrcp.f32 %v3349_v62 }
 0x8f3   :  { %v6830_v2 = vpop.eup %6829 }
 0x8f4   :  { %v6832_v21 = vpop.eup %6831 }
 0x8f5   :  { %v6834_v35 = vpop.eup %6833 }
 0x8f6   :  { %v6836_v30 = vpop.eup %6835 }
 0x917   :  { %v3244_v24 = vpop.f32.mrb[28].mxu0  ;;  %v3315_v4 = vpop.f32.mrb[28].mxu1 }
 0x918   :  { %v6534_v22 = vadd.f32 %v3244_v24, %v9445_v46  ;;  %v6550_v49 = vadd.f32 %v3315_v4, %v9916_v34  ;;  %v3246_v47 = vpop.f32.mrb[29].mxu0  ;;  %v3317_v11 = vpop.f32.mrb[29].mxu1  ;;  %v3366_v4 = vmul.f32 %v6832_v21, %v8497_v48 }
 0x919   :  { %v6535_v50 = vadd.f32 %v3246_v47, %v9917_v9  ;;  %v6551_v14 = vadd.f32 %v3317_v11, %v9354_v5  ;;  %v3367_v47 = vmul.f32 %v6836_v30, %v8499_v6 }
 0x91a   :  { %v4288_v16 = vmul.f32 -1.442695, %v6534_v22  ;;  %6837 = vtanh.f32 %v6550_v49 }
 0x91b   :  { %v4289_v3 = vmul.f32 -1.442695, %v6535_v50  ;;  %6839 = vtanh.f32 %v6551_v14 }
 0x91c   :  { %6841 = vpow2.f32 %v4288_v16 }
 0x91d   :  { %6843 = vpow2.f32 %v4289_v3 }
 0x924   :  { %v6838_v31 = vpop.eup %6837 }
 0x925   :  { %v6840_v24 = vpop.eup %6839  ;;  %v3368_v34 = vmul.f32 %v6838_v31, %v6830_v2 }
 0x926   :  { %v6842_v62 = vpop.eup %6841  ;;  %v3369_v9 = vmul.f32 %v6840_v24, %v6834_v35  ;;  %v9942_v24 = vld [vmem:[#allocation32_spill] sm:$0xff] }
 0x927   :  { %v6844_v11 = vpop.eup %6843  ;;  %v3350_v22 = vadd.f32 1.0, %v6842_v62  ;;  %v8653_v49 = vadd.f32 %v3368_v34, %v3366_v4 }
 0x928   :  { %v3351_v50 = vadd.f32 1.0, %v6844_v11  ;;  %v8655_v14 = vadd.f32 %v3369_v9, %v3367_v47  ;;  %v9943_v11 = vld [vmem:[#allocation31_spill] sm:$0xff] }
 0x929   :  { %6845 = vrcp.f32 %v3350_v22 }
 0x92a   :  { %6847 = vtanh.f32 %v8653_v49 }
 0x92b   :  { %6849 = vrcp.f32 %v3351_v50 }
 0x92c   :  { %6851 = vtanh.f32 %v8655_v14 }
 0x933   :  { %v6846_v16 = vpop.eup %6845 }
 0x934   :  { %v6848_v48 = vpop.eup %6847 }
 0x935   :  { %v6850_v3 = vpop.eup %6849  ;;  %v8661_v6 = vmul.f32 %v6848_v48, %v6846_v16 }
 0x936   :  { %v6852_v2 = vpop.eup %6851 }
 0x937   :  { %v8659_v21 = vmul.f32 %v6852_v2, %v6850_v3 }
 0x939   :  { %3450 = vmatprep.mubr.f32.mxu0 %v8659_v21  ;;  %3521 = vmatprep.mubr.f32.mxu1 %v8659_v21 }
 0x93a   :  { %3451 = vmatmul.mubr.f32.vlgmr.msra.gmra.mrb[14].mxu0 %v8661_v6  ;;  %3522 = vmatmul.mubr.f32.vlgmr.msra.gmra.mrb[14].mxu1 %v8661_v6 }
 0x93b   :  { %6237 = vmatpush1.bf16.msra.mxu0 %v9357_v42  ;;  %6301 = vmatpush1.bf16.msra.mxu1 %v9358_v7  ;;  %v9918_v42 = vld [vmem:[#allocation139_spill] sm:$0xff]  ;;  %v9919_v7 = vld [vmem:[#allocation140_spill] sm:$0xff] }
 0x93c   :  { %3592 = vmatprep.mubr.f32.mxu0 %v8659_v21  ;;  %3663 = vmatprep.mubr.f32.mxu1 %v8659_v21 }
 0x93d   :  { %6239 = vmatprep.subr.bf16.mxu0 %v9359_v63  ;;  %6303 = vmatprep.subr.bf16.mxu1 %v9360_v20  ;;  %v9920_v63 = vld [vmem:[#allocation141_spill] sm:$0xff]  ;;  %v9921_v20 = vld [vmem:[#allocation142_spill] sm:$0xff] }
 0x93f   :  { %6241 = vmatpush1.bf16.msra.mxu0 %v9361_v17  ;;  %6305 = vmatpush1.bf16.msra.mxu1 %v9450_v57  ;;  %v9922_v17 = vld [vmem:[#allocation143_spill] sm:$0xff]  ;;  %v9924_v57 = vld [vmem:[#allocation145_spill] sm:$0xff] }
 0x940   :  { %6243 = vmatprep.subr.bf16.mxu0 %v9451_v8  ;;  %6307 = vmatprep.subr.bf16.mxu1 %v9452_v18  ;;  %v9925_v8 = vld [vmem:[#allocation146_spill] sm:$0xff]  ;;  %v9926_v18 = vld [vmem:[#allocation147_spill] sm:$0xff] }
 0x943   :  { %6245 = vmatpush1.bf16.msra.mxu0 %v9453_v33  ;;  %6309 = vmatpush1.bf16.msra.mxu1 %v9454_v37  ;;  %v9927_v33 = vld [vmem:[#allocation148_spill] sm:$0xff]  ;;  %v9928_v37 = vld [vmem:[#allocation149_spill] sm:$0xff] }
 0x944   :  { %6247 = vmatprep.subr.bf16.mxu0 %v9455_v29  ;;  %6311 = vmatprep.subr.bf16.mxu1 %v9544_v10  ;;  %v9929_v29 = vld [vmem:[#allocation150_spill] sm:$0xff]  ;;  %v9940_v10 = vld [vmem:[#allocation161_spill] sm:$0xff] }
 0x947   :  { %6249 = vmatpush1.bf16.msra.mxu0 %v9545_v28  ;;  %6313 = vmatpush1.bf16.msra.mxu1 %v9546_v59 }
 0x948   :  { %6251 = vmatprep.subr.bf16.mxu0 %v9547_v25  ;;  %6315 = vmatprep.subr.bf16.mxu1 %v9548_v40 }
 0x94b   :  { %6253 = vmatpush1.bf16.msra.mxu0 %v9549_v60  ;;  %6317 = vmatpush1.bf16.msra.mxu1 %v9550_v26  ;;  %v9941_v60 = vld [vmem:[#allocation26_spill] sm:$0xff] }
 0x94c   :  { %6255 = vmatprep.subr.bf16.mxu0 %v9638_v44  ;;  %6319 = vmatprep.subr.bf16.mxu1 %v9552_v19 }
 0x94f   :  { %6257 = vmatpush1.bf16.msra.mxu0 %v9553_v27  ;;  %6321 = vmatpush1.bf16.msra.mxu1 %v9554_v0 }
 0x950   :  { %6259 = vmatprep.subr.bf16.mxu0 %v9555_v23  ;;  %6323 = vmatprep.subr.bf16.mxu1 %v9556_v36 }
 0x953   :  { %6261 = vmatpush1.bf16.msra.mxu0 %v9557_v61  ;;  %6325 = vmatpush1.bf16.msra.mxu1 %v9558_v32 }
 0x954   :  { %6263 = vmatprep.subr.bf16.mxu0 %v9559_v1  ;;  %6327 = vmatprep.subr.bf16.mxu1 %v9560_v15  ;;  %v9939_v15 = vld [vmem:[#allocation160_spill] sm:$0xff] }
 0x957   :  { %6265 = vmatpush1.bf16.msra.mxu0 %v9473_v51  ;;  %6329 = vmatpush1.bf16.msra.mxu1 %v9561_v41  ;;  %v9936_v51 = vld [vmem:[#allocation157_spill] sm:$0xff] }
 0x958   :  { %6267 = vmatprep.subr.bf16.mxu0 %v9475_v53  ;;  %6331 = vmatprep.subr.bf16.mxu1 %v9476_v45  ;;  %v9937_v53 = vld [vmem:[#allocation158_spill] sm:$0xff]  ;;  %v9938_v45 = vld [vmem:[#allocation159_spill] sm:$0xff] }
 0x95b   :  { %6269 = vmatpush1.bf16.msra.mxu0 %v9477_v52  ;;  %6333 = vmatpush1.bf16.msra.mxu1 %v9478_v39  ;;  %v9923_v52 = vld [vmem:[#allocation144_spill] sm:$0xff]  ;;  %v9930_v39 = vld [vmem:[#allocation151_spill] sm:$0xff] }
 0x95c   :  { %6271 = vmatprep.subr.bf16.mxu0 %v9479_v38  ;;  %6335 = vmatprep.subr.bf16.mxu1 %v9480_v58  ;;  %v9931_v38 = vld [vmem:[#allocation152_spill] sm:$0xff]  ;;  %v9932_v58 = vld [vmem:[#allocation153_spill] sm:$0xff] }
 0x95f   :  { %6273 = vmatpush1.bf16.msra.mxu0 %v9481_v54  ;;  %6337 = vmatpush1.bf16.msra.mxu1 %v9482_v56  ;;  %v9933_v54 = vld [vmem:[#allocation154_spill] sm:$0xff]  ;;  %v9934_v56 = vld [vmem:[#allocation155_spill] sm:$0xff] }
 0x960   :  { %6275 = vmatprep.subr.bf16.mxu0 %v9483_v12  ;;  %6339 = vmatprep.subr.bf16.mxu1 %v9918_v42  ;;  %v9935_v12 = vld [vmem:[#allocation156_spill] sm:$0xff] }
 0x963   :  { %6277 = vmatpush1.bf16.msra.mxu0 %v9919_v7  ;;  %6341 = vmatpush1.bf16.msra.mxu1 %v9920_v63 }
 0x964   :  { %6279 = vmatprep.subr.bf16.mxu0 %v9921_v20  ;;  %6343 = vmatprep.subr.bf16.mxu1 %v9922_v17 }
 0x967   :  { %6281 = vmatpush1.bf16.msra.mxu0 %v9923_v52  ;;  %6345 = vmatpush1.bf16.msra.mxu1 %v9924_v57 }
 0x968   :  { %6283 = vmatprep.subr.bf16.mxu0 %v9925_v8  ;;  %6347 = vmatprep.subr.bf16.mxu1 %v9926_v18 }
 0x96b   :  { %6285 = vmatpush1.bf16.msra.mxu0 %v9927_v33  ;;  %6349 = vmatpush1.bf16.msra.mxu1 %v9928_v37 }
 0x96c   :  { %6287 = vmatprep.subr.bf16.mxu0 %v9929_v29  ;;  %6351 = vmatprep.subr.bf16.mxu1 %v9930_v39 }
 0x96f   :  { %6289 = vmatpush1.bf16.msra.mxu0 %v9931_v38  ;;  %6353 = vmatpush1.bf16.msra.mxu1 %v9932_v58 }
 0x970   :  { %6291 = vmatprep.subr.bf16.mxu0 %v9933_v54  ;;  %6355 = vmatprep.subr.bf16.mxu1 %v9934_v56 }
 0x973   :  { %6293 = vmatpush1.bf16.msra.mxu0 %v9935_v12  ;;  %6357 = vmatpush1.bf16.msra.mxu1 %v9936_v51 }
 0x974   :  { %6295 = vmatprep.subr.bf16.mxu0 %v9937_v53  ;;  %6359 = vmatprep.subr.bf16.mxu1 %v9938_v45 }
 0x977   :  { %6297 = vmatpush1.bf16.msra.mxu0 %v9939_v15  ;;  %6361 = vmatpush1.bf16.msra.mxu1 %v9940_v10 }
 0x97a   :  { %3593 = vmatmul.mubr.f32.vlgmr.msra.gmra.mrb[30].mxu0 %v8661_v6  ;;  %3664 = vmatmul.mubr.f32.vlgmr.msra.gmra.mrb[30].mxu1 %v8661_v6 }
 0xa0d   :  { %v3452_v28 = vpop.f32.mrb[14].mxu0  ;;  %v3523_v59 = vpop.f32.mrb[14].mxu1 }
 0xa0e   :  { %v3454_v25 = vpop.f32.mrb[15].mxu0  ;;  %v3525_v40 = vpop.f32.mrb[15].mxu1  ;;  %v6504_v26 = vadd.f32 %v3452_v28, %v9941_v60  ;;  %v6520_v41 = vadd.f32 %v3523_v59, %v9348_v43 }
 0xa0f   :  { %v6505_v19 = vadd.f32 %v3454_v25, %v9443_v13  ;;  %v6521_v27 = vadd.f32 %v3525_v40, %v9539_v55 }
 0xa10   :  { %v4290_v0 = vmul.f32 -1.442695, %v6504_v26  ;;  %v4292_v23 = vmul.f32 -1.442695, %v6520_v41 }
 0xa11   :  { %v4291_v36 = vmul.f32 -1.442695, %v6505_v19  ;;  %v4293_v61 = vmul.f32 -1.442695, %v6521_v27 }
 0xa12   :  { %6853 = vpow2.f32 %v4290_v0 }
 0xa13   :  { %6855 = vpow2.f32 %v4292_v23 }
 0xa14   :  { %6857 = vpow2.f32 %v4291_v36 }
 0xa15   :  { %6859 = vpow2.f32 %v4293_v61 }
 0xa1c   :  { %v6854_v32 = vpop.eup %6853 }
 0xa1d   :  { %v6856_v1 = vpop.eup %6855  ;;  %v3696_v9 = vadd.f32 1.0, %v6854_v32 }
 0xa1e   :  { %v6858_v44 = vpop.eup %6857  ;;  %v3698_v35 = vadd.f32 1.0, %v6856_v1 }
 0xa1f   :  { %v6860_v34 = vpop.eup %6859  ;;  %v3697_v30 = vadd.f32 1.0, %v6858_v44  ;;  %6861 = vrcp.f32 %v3696_v9 }
 0xa20   :  { %v3699_v43 = vadd.f32 1.0, %v6860_v34  ;;  %6863 = vrcp.f32 %v3698_v35 }
 0xa21   :  { %6865 = vrcp.f32 %v3697_v30 }
 0xa22   :  { %6867 = vrcp.f32 %v3699_v43 }
 0xa29   :  { %v6862_v3 = vpop.eup %6861 }
 0xa2a   :  { %v6864_v2 = vpop.eup %6863 }
 0xa2b   :  { %v6866_v42 = vpop.eup %6865  ;;  %v3716_v20 = vmul.f32 %v6864_v2, %v8653_v49 }
 0xa2c   :  { %v6868_v7 = vpop.eup %6867 }
 0xa2d   :  { %v3717_v57 = vmul.f32 %v6868_v7, %v8655_v14 }
 0xa4d   :  { %v3594_v13 = vpop.f32.mrb[30].mxu0  ;;  %v3665_v55 = vpop.f32.mrb[30].mxu1 }
 0xa4e   :  { %v6536_v31 = vadd.f32 %v3594_v13, %v9445_v46  ;;  %v6552_v4 = vadd.f32 %v3665_v55, %v9942_v24  ;;  %v3596_v62 = vpop.f32.mrb[31].mxu0  ;;  %v3667_v47 = vpop.f32.mrb[31].mxu1 }
 0xa4f   :  { %v6537_v22 = vadd.f32 %v3596_v62, %v9943_v11  ;;  %v6553_v50 = vadd.f32 %v3667_v47, %v9354_v5 }
 0xa50   :  { %v4294_v16 = vmul.f32 -1.442695, %v6536_v31  ;;  %6869 = vtanh.f32 %v6552_v4 }
 0xa51   :  { %v4295_v48 = vmul.f32 -1.442695, %v6537_v22  ;;  %6871 = vtanh.f32 %v6553_v50 }
 0xa52   :  { %6873 = vpow2.f32 %v4294_v16 }
 0xa53   :  { %6875 = vpow2.f32 %v4295_v48 }
 0xa5a   :  { %v6870_v46 = vpop.eup %6869 }
 0xa5b   :  { %v6872_v63 = vpop.eup %6871  ;;  %v3718_v17 = vmul.f32 %v6870_v46, %v6862_v3 }
 0xa5c   :  { %v6874_v52 = vpop.eup %6873  ;;  %v3719_v8 = vmul.f32 %v6872_v63, %v6866_v42 }
 0xa5d   :  { %v6876_v5 = vpop.eup %6875  ;;  %v3700_v18 = vadd.f32 1.0, %v6874_v52  ;;  %v3720_v33 = vadd.f32 %v3718_v17, %v3716_v20 }
 0xa5e   :  { %v3701_v37 = vadd.f32 1.0, %v6876_v5  ;;  %v3721_v29 = vadd.f32 %v3719_v8, %v3717_v57 }
 0xa5f   :  { %6877 = vrcp.f32 %v3700_v18  ;;  %3730 = vst [vmem:[#allocation13] sm:$0xff] %v3720_v33 }
 0xa60   :  { %6879 = vtanh.f32 %v3720_v33  ;;  %3731 = vst [vmem:[#allocation13 + $0x8] sm:$0xff] %v3721_v29 }
 0xa61   :  { %6881 = vrcp.f32 %v3701_v37 }
 0xa62   :  { %6883 = vtanh.f32 %v3721_v29 }
 0xa69   :  { %v6878_v39 = vpop.eup %6877 }
 0xa6a   :  { %v6880_v38 = vpop.eup %6879 }
 0xa6b   :  { %v6882_v58 = vpop.eup %6881  ;;  %v8743_v49 = vmul.f32 %v6880_v38, %v6878_v39 }
 0xa6c   :  { %v6884_v54 = vpop.eup %6883 }
 0xa6d   :  { %3728 = vst [vmem:[#allocation11] sm:$0xff] %v8743_v49  ;;  %v8746_v14 = vmul.f32 %v6884_v54, %v6882_v58 }
 0xa6f   :  { %3729 = vst [vmem:[#allocation11 + $0x8] sm:$0xff] %v8746_v14 }
 0xa70   :  { %7021 = dma.done.wait [#allocation6 + $0x1], 16384 }
 0xa71   :  { %7022 = vsyncadd [#allocation6 + $0x1], 4294950912  ;;  %v9944_v56 = vld [vmem:[#allocation28_spill] sm:$0xff]  ;;  %v3752_v12 = vld [vmem:[#allocation5 + $0x8] sm:$0xff]  ;;  %s7033_s0 = smov [#allocation11]  }
 0xa72   :  { %3965 = vmatprep.mubr.f32.mxu0 %v9944_v56  ;;  %4078 = vmatprep.mubr.f32.mxu1 %v9944_v56  ;;  %v3756_v51 = vld [vmem:[#allocation5 + $0x28] sm:$0xff]  ;;  %v3754_v53 = vld [vmem:[#allocation5 + $0x18] sm:$0xff]  ;;  %v3751_v10 = vld [vmem:[#allocation5] sm:$0xff]  ;;  %s4177_s12 = sshll.u32 %s7033_s0, 4  ;;  %s4178_s12 = int_to_ptr.vmem [resolvable:$true] %s4177_s12 }
 0xa73   :  { %v6362_v45 = vpack.c.bf16 %v3756_v51, %v3752_v12  ;;  %v3758_v15 = vld [vmem:[#allocation5 + $0x38] sm:$0xff]  ;;  %v3755_v28 = vld [vmem:[#allocation5 + $0x20] sm:$0xff]  ;;  %v3753_v40 = vld [vmem:[#allocation5 + $0x10] sm:$0xff]  ;;  %s6951_s13 = scalar_lea.vmem %s4178_s12, 256  ;;  %p6956_p11 = scmp.lt.s32.totalorder %s4178_s12, %s4178_s12 }
 0xa74   :  { %v6426_v59 = vpack.c.bf16 %v3758_v15, %v3754_v53  ;;  %v6364_v25 = vpack.c.bf16 %v3755_v28, %v3751_v10  ;;  %v3757_v60 = vld [vmem:[#allocation5 + $0x30] sm:$0xff]  ;;  %v3760_v26 = vld [vmem:[#allocation5 + $0x48] sm:$0xff]  ;;  %v3762_v27 = vld [vmem:[#allocation5 + $0x58] sm:$0xff]  ;;  %p6952_p10 = scmp.ne.s32.totalorder %s4178_s12, %s6951_s13  ;;  %p6957_p12 = scmp.lt.s32.totalorder %s6951_s13, %s6951_s13 }
 0xa75   :  { %6363 = vmatprep.subr.bf16.mxu0 %v6362_v45  ;;  %v6428_v41 = vpack.c.bf16 %v3757_v60, %v3753_v40  ;;  %v3764_v19 = vld [vmem:[#allocation5 + $0x68] sm:$0xff]  ;;  %v3766_v0 = vld [vmem:[#allocation5 + $0x78] sm:$0xff]  ;;  %v3759_v61 = vld [vmem:[#allocation5 + $0x40] sm:$0xff] }
 0xa76   :  { %6427 = vmatprep.subr.bf16.mxu1 %v6426_v59  ;;  %6365 = vmatpush1.bf16.msra.mxu0 %v6364_v25  ;;  %v6366_v23 = vpack.c.bf16 %v3764_v19, %v3760_v26  ;;  %v6430_v36 = vpack.c.bf16 %v3766_v0, %v3762_v27  ;;  %v3763_v32 = vld [vmem:[#allocation5 + $0x60] sm:$0xff]  ;;  %v3761_v1 = vld [vmem:[#allocation5 + $0x50] sm:$0xff]  ;;  %v3768_v9 = vld [vmem:[#allocation5 + $0x88] sm:$0xff]  ;;  %p6958_p13 = por %p6957_p12, %p6956_p11 }
 0xa77   :  { %6429 = vmatpush1.bf16.msra.mxu1 %v6428_v41  ;;  %v6368_v44 = vpack.c.bf16 %v3763_v32, %v3759_v61  ;;  %v3765_v34 = vld [vmem:[#allocation5 + $0x70] sm:$0xff]  ;;  %v3772_v35 = vld [vmem:[#allocation5 + $0xa8] sm:$0xff]  ;;  %v3770_v13 = vld [vmem:[#allocation5 + $0x98] sm:$0xff] }
 0xa78   :  { %6367 = vmatprep.subr.bf16.mxu0 %v6366_v23  ;;  %6431 = vmatprep.subr.bf16.mxu1 %v6430_v36  ;;  %v6432_v30 = vpack.c.bf16 %v3765_v34, %v3761_v1  ;;  %v6370_v43 = vpack.c.bf16 %v3772_v35, %v3768_v9  ;;  %v3774_v55 = vld [vmem:[#allocation5 + $0xb8] sm:$0xff]  ;;  %v3767_v31 = vld [vmem:[#allocation5 + $0x80] sm:$0xff]  ;;  %v3769_v62 = vld [vmem:[#allocation5 + $0x90] sm:$0xff]  ;;  %p6959_p0 = pnand %p6958_p13, %p6952_p10 }
 0xa79   :  { %v6434_v24 = vpack.c.bf16 %v3774_v55, %v3770_v13  ;;  %v3771_v4 = vld [vmem:[#allocation5 + $0xa0] sm:$0xff]  ;;  %v3773_v47 = vld [vmem:[#allocation5 + $0xb0] sm:$0xff]  ;;  %v3776_v22 = vld [vmem:[#allocation5 + $0xc8] sm:$0xff] }
 0xa7a   :  { %6369 = vmatpush1.bf16.msra.mxu0 %v6368_v44  ;;  %v6372_v11 = vpack.c.bf16 %v3771_v4, %v3767_v31  ;;  %v3780_v50 = vld [vmem:[#allocation5 + $0xe8] sm:$0xff]  ;;  %v3778_v16 = vld [vmem:[#allocation5 + $0xd8] sm:$0xff]  ;;  %v6436_v48 = vpack.c.bf16 %v3773_v47, %v3769_v62  ;;  %v3775_v42 = vld [vmem:[#allocation5 + $0xc0] sm:$0xff] }
 0xa7b   :  { %6433 = vmatpush1.bf16.msra.mxu1 %v6432_v30  ;;  %6371 = vmatprep.subr.bf16.mxu0 %v6370_v43  ;;  %v6374_v3 = vpack.c.bf16 %v3780_v50, %v3776_v22  ;;  %v3782_v2 = vld [vmem:[#allocation5 + $0xf8] sm:$0xff]  ;;  %v3779_v7 = vld [vmem:[#allocation5 + $0xe0] sm:$0xff]  ;;  %v3777_v63 = vld [vmem:[#allocation5 + $0xd0] sm:$0xff] }
 0xa7c   :  { %6435 = vmatprep.subr.bf16.mxu1 %v6434_v24  ;;  %v6438_v46 = vpack.c.bf16 %v3782_v2, %v3778_v16  ;;  %v3781_v20 = vld [vmem:[#allocation5 + $0xf0] sm:$0xff]  ;;  %v3784_v17 = vld [vmem:[#allocation5 + $0x108] sm:$0xff]  ;;  %v3786_v57 = vld [vmem:[#allocation5 + $0x118] sm:$0xff]  ;;  %v6376_v5 = vpack.c.bf16 %v3779_v7, %v3775_v42 }
 0xa7d   :  { %v3788_v52 = vld [vmem:[#allocation5 + $0x128] sm:$0xff]  ;;  %v3790_v8 = vld [vmem:[#allocation5 + $0x138] sm:$0xff]  ;;  %v6440_v18 = vpack.c.bf16 %v3781_v20, %v3777_v63  ;;  %v3783_v37 = vld [vmem:[#allocation5 + $0x100] sm:$0xff] }
 0xa7e   :  { %6373 = vmatpush1.bf16.msra.mxu0 %v6372_v11  ;;  %v6378_v33 = vpack.c.bf16 %v3788_v52, %v3784_v17  ;;  %v3787_v29 = vld [vmem:[#allocation5 + $0x120] sm:$0xff]  ;;  %v3785_v39 = vld [vmem:[#allocation5 + $0x110] sm:$0xff]  ;;  %v6442_v38 = vpack.c.bf16 %v3790_v8, %v3786_v57  ;;  %v3792_v54 = vld [vmem:[#allocation5 + $0x148] sm:$0xff] }
 0xa7f   :  { %6437 = vmatpush1.bf16.msra.mxu1 %v6436_v48  ;;  %6375 = vmatprep.subr.bf16.mxu0 %v6374_v3  ;;  %v3789_v58 = vld [vmem:[#allocation5 + $0x130] sm:$0xff]  ;;  %v3796_v56 = vld [vmem:[#allocation5 + $0x168] sm:$0xff]  ;;  %v3794_v12 = vld [vmem:[#allocation5 + $0x158] sm:$0xff]  ;;  %v6380_v53 = vpack.c.bf16 %v3787_v29, %v3783_v37 }
 0xa80   :  { %6439 = vmatprep.subr.bf16.mxu1 %v6438_v46  ;;  %v3798_v51 = vld [vmem:[#allocation5 + $0x178] sm:$0xff]  ;;  %v6444_v45 = vpack.c.bf16 %v3789_v58, %v3785_v39  ;;  %v6382_v15 = vpack.c.bf16 %v3796_v56, %v3792_v54  ;;  %v3791_v10 = vld [vmem:[#allocation5 + $0x140] sm:$0xff]  ;;  %v3793_v59 = vld [vmem:[#allocation5 + $0x150] sm:$0xff] }
 0xa81   :  { %v3795_v28 = vld [vmem:[#allocation5 + $0x160] sm:$0xff]  ;;  %v6446_v25 = vpack.c.bf16 %v3798_v51, %v3794_v12  ;;  %v3797_v40 = vld [vmem:[#allocation5 + $0x170] sm:$0xff]  ;;  %v3800_v60 = vld [vmem:[#allocation5 + $0x188] sm:$0xff] }
 0xa82   :  { %6377 = vmatpush1.bf16.msra.mxu0 %v6376_v5  ;;  %v3804_v26 = vld [vmem:[#allocation5 + $0x1a8] sm:$0xff]  ;;  %v3802_v41 = vld [vmem:[#allocation5 + $0x198] sm:$0xff]  ;;  %v6384_v27 = vpack.c.bf16 %v3795_v28, %v3791_v10  ;;  %v6448_v0 = vpack.c.bf16 %v3797_v40, %v3793_v59  ;;  %v3799_v36 = vld [vmem:[#allocation5 + $0x180] sm:$0xff] }
 0xa83   :  { %6441 = vmatpush1.bf16.msra.mxu1 %v6440_v18  ;;  %6379 = vmatprep.subr.bf16.mxu0 %v6378_v33  ;;  %v3806_v19 = vld [vmem:[#allocation5 + $0x1b8] sm:$0xff]  ;;  %v6386_v23 = vpack.c.bf16 %v3804_v26, %v3800_v60  ;;  %v3803_v61 = vld [vmem:[#allocation5 + $0x1a0] sm:$0xff]  ;;  %v3801_v32 = vld [vmem:[#allocation5 + $0x190] sm:$0xff] }
 0xa84   :  { %6443 = vmatprep.subr.bf16.mxu1 %v6442_v38  ;;  %v6450_v1 = vpack.c.bf16 %v3806_v19, %v3802_v41  ;;  %v3805_v44 = vld [vmem:[#allocation5 + $0x1b0] sm:$0xff]  ;;  %v3808_v34 = vld [vmem:[#allocation5 + $0x1c8] sm:$0xff]  ;;  %v3810_v35 = vld [vmem:[#allocation5 + $0x1d8] sm:$0xff]  ;;  %v6388_v43 = vpack.c.bf16 %v3803_v61, %v3799_v36 }
 0xa85   :  { %v3812_v9 = vld [vmem:[#allocation5 + $0x1e8] sm:$0xff]  ;;  %v3814_v30 = vld [vmem:[#allocation5 + $0x1f8] sm:$0xff]  ;;  %v6452_v13 = vpack.c.bf16 %v3805_v44, %v3801_v32  ;;  %v3807_v31 = vld [vmem:[#allocation5 + $0x1c0] sm:$0xff] }
 0xa86   :  { %6381 = vmatpush1.bf16.msra.mxu0 %v6380_v53  ;;  %v6390_v55 = vpack.c.bf16 %v3812_v9, %v3808_v34  ;;  %v3811_v24 = vld [vmem:[#allocation5 + $0x1e0] sm:$0xff]  ;;  %v3809_v4 = vld [vmem:[#allocation5 + $0x1d0] sm:$0xff]  ;;  %v6454_v62 = vpack.c.bf16 %v3814_v30, %v3810_v35  ;;  %v3816_v11 = vld [vmem:[#allocation5 + $0x208] sm:$0xff] }
 0xa87   :  { %6445 = vmatpush1.bf16.msra.mxu1 %v6444_v45  ;;  %6383 = vmatprep.subr.bf16.mxu0 %v6382_v15  ;;  %v3813_v47 = vld [vmem:[#allocation5 + $0x1f0] sm:$0xff]  ;;  %v3820_v22 = vld [vmem:[#allocation5 + $0x228] sm:$0xff]  ;;  %v3818_v50 = vld [vmem:[#allocation5 + $0x218] sm:$0xff]  ;;  %v6392_v48 = vpack.c.bf16 %v3811_v24, %v3807_v31 }
 0xa88   :  { %6447 = vmatprep.subr.bf16.mxu1 %v6446_v25  ;;  %v3822_v16 = vld [vmem:[#allocation5 + $0x238] sm:$0xff]  ;;  %v6456_v3 = vpack.c.bf16 %v3813_v47, %v3809_v4  ;;  %v6394_v2 = vpack.c.bf16 %v3820_v22, %v3816_v11  ;;  %v3815_v42 = vld [vmem:[#allocation5 + $0x200] sm:$0xff]  ;;  %v3817_v46 = vld [vmem:[#allocation5 + $0x210] sm:$0xff] }
 0xa89   :  { %v3819_v7 = vld [vmem:[#allocation5 + $0x220] sm:$0xff]  ;;  %v6458_v63 = vpack.c.bf16 %v3822_v16, %v3818_v50  ;;  %v3821_v20 = vld [vmem:[#allocation5 + $0x230] sm:$0xff]  ;;  %v3824_v17 = vld [vmem:[#allocation5 + $0x248] sm:$0xff] }
 0xa8a   :  { %6385 = vmatpush1.bf16.msra.mxu0 %v6384_v27  ;;  %v3828_v52 = vld [vmem:[#allocation5 + $0x268] sm:$0xff]  ;;  %v3826_v57 = vld [vmem:[#allocation5 + $0x258] sm:$0xff]  ;;  %v6396_v5 = vpack.c.bf16 %v3819_v7, %v3815_v42  ;;  %v6460_v18 = vpack.c.bf16 %v3821_v20, %v3817_v46  ;;  %v3823_v37 = vld [vmem:[#allocation5 + $0x240] sm:$0xff] }
 0xa8b   :  { %6449 = vmatpush1.bf16.msra.mxu1 %v6448_v0  ;;  %6387 = vmatprep.subr.bf16.mxu0 %v6386_v23  ;;  %v3830_v8 = vld [vmem:[#allocation5 + $0x278] sm:$0xff]  ;;  %v6398_v33 = vpack.c.bf16 %v3828_v52, %v3824_v17  ;;  %v3827_v29 = vld [vmem:[#allocation5 + $0x260] sm:$0xff]  ;;  %v3825_v39 = vld [vmem:[#allocation5 + $0x250] sm:$0xff] }
 0xa8c   :  { %6451 = vmatprep.subr.bf16.mxu1 %v6450_v1  ;;  %v6462_v38 = vpack.c.bf16 %v3830_v8, %v3826_v57  ;;  %v3829_v58 = vld [vmem:[#allocation5 + $0x270] sm:$0xff]  ;;  %v3832_v54 = vld [vmem:[#allocation5 + $0x288] sm:$0xff]  ;;  %v3834_v12 = vld [vmem:[#allocation5 + $0x298] sm:$0xff]  ;;  %v6400_v53 = vpack.c.bf16 %v3827_v29, %v3823_v37 }
 0xa8d   :  { %v3836_v56 = vld [vmem:[#allocation5 + $0x2a8] sm:$0xff]  ;;  %v3838_v51 = vld [vmem:[#allocation5 + $0x2b8] sm:$0xff]  ;;  %v6464_v45 = vpack.c.bf16 %v3829_v58, %v3825_v39  ;;  %v3831_v10 = vld [vmem:[#allocation5 + $0x280] sm:$0xff] }
 0xa8e   :  { %6389 = vmatpush1.bf16.msra.mxu0 %v6388_v43  ;;  %v6402_v15 = vpack.c.bf16 %v3836_v56, %v3832_v54  ;;  %v3835_v28 = vld [vmem:[#allocation5 + $0x2a0] sm:$0xff]  ;;  %v3833_v59 = vld [vmem:[#allocation5 + $0x290] sm:$0xff]  ;;  %v6466_v25 = vpack.c.bf16 %v3838_v51, %v3834_v12  ;;  %v3840_v60 = vld [vmem:[#allocation5 + $0x2c8] sm:$0xff] }
 0xa8f   :  { %6453 = vmatpush1.bf16.msra.mxu1 %v6452_v13  ;;  %6391 = vmatprep.subr.bf16.mxu0 %v6390_v55  ;;  %v3837_v40 = vld [vmem:[#allocation5 + $0x2b0] sm:$0xff]  ;;  %v3844_v26 = vld [vmem:[#allocation5 + $0x2e8] sm:$0xff]  ;;  %v3842_v41 = vld [vmem:[#allocation5 + $0x2d8] sm:$0xff]  ;;  %v6404_v27 = vpack.c.bf16 %v3835_v28, %v3831_v10 }
 0xa90   :  { %6455 = vmatprep.subr.bf16.mxu1 %v6454_v62  ;;  %v3846_v19 = vld [vmem:[#allocation5 + $0x2f8] sm:$0xff]  ;;  %v6468_v0 = vpack.c.bf16 %v3837_v40, %v3833_v59  ;;  %v6406_v23 = vpack.c.bf16 %v3844_v26, %v3840_v60  ;;  %v3839_v36 = vld [vmem:[#allocation5 + $0x2c0] sm:$0xff]  ;;  %v3841_v32 = vld [vmem:[#allocation5 + $0x2d0] sm:$0xff] }
 0xa91   :  { %v3843_v61 = vld [vmem:[#allocation5 + $0x2e0] sm:$0xff]  ;;  %v6470_v1 = vpack.c.bf16 %v3846_v19, %v3842_v41  ;;  %v3845_v44 = vld [vmem:[#allocation5 + $0x2f0] sm:$0xff]  ;;  %v3848_v34 = vld [vmem:[#allocation5 + $0x308] sm:$0xff] }
 0xa92   :  { %6393 = vmatpush1.bf16.msra.mxu0 %v6392_v48  ;;  %v3852_v9 = vld [vmem:[#allocation5 + $0x328] sm:$0xff]  ;;  %v3850_v35 = vld [vmem:[#allocation5 + $0x318] sm:$0xff]  ;;  %v6408_v43 = vpack.c.bf16 %v3843_v61, %v3839_v36  ;;  %v6472_v13 = vpack.c.bf16 %v3845_v44, %v3841_v32  ;;  %v3847_v31 = vld [vmem:[#allocation5 + $0x300] sm:$0xff] }
 0xa93   :  { %6457 = vmatpush1.bf16.msra.mxu1 %v6456_v3  ;;  %6395 = vmatprep.subr.bf16.mxu0 %v6394_v2  ;;  %v3854_v30 = vld [vmem:[#allocation5 + $0x338] sm:$0xff]  ;;  %v6410_v55 = vpack.c.bf16 %v3852_v9, %v3848_v34  ;;  %v3851_v24 = vld [vmem:[#allocation5 + $0x320] sm:$0xff]  ;;  %v3849_v4 = vld [vmem:[#allocation5 + $0x310] sm:$0xff] }
 0xa94   :  { %6459 = vmatprep.subr.bf16.mxu1 %v6458_v63  ;;  %v6474_v62 = vpack.c.bf16 %v3854_v30, %v3850_v35  ;;  %v3853_v47 = vld [vmem:[#allocation5 + $0x330] sm:$0xff]  ;;  %v3856_v11 = vld [vmem:[#allocation5 + $0x348] sm:$0xff]  ;;  %v3858_v50 = vld [vmem:[#allocation5 + $0x358] sm:$0xff]  ;;  %v6412_v48 = vpack.c.bf16 %v3851_v24, %v3847_v31 }
 0xa95   :  { %v3860_v22 = vld [vmem:[#allocation5 + $0x368] sm:$0xff]  ;;  %v3862_v16 = vld [vmem:[#allocation5 + $0x378] sm:$0xff]  ;;  %v6476_v3 = vpack.c.bf16 %v3853_v47, %v3849_v4  ;;  %v3855_v42 = vld [vmem:[#allocation5 + $0x340] sm:$0xff] }
 0xa96   :  { %6397 = vmatpush1.bf16.msra.mxu0 %v6396_v5  ;;  %v6414_v2 = vpack.c.bf16 %v3860_v22, %v3856_v11  ;;  %v3859_v7 = vld [vmem:[#allocation5 + $0x360] sm:$0xff]  ;;  %v3857_v46 = vld [vmem:[#allocation5 + $0x350] sm:$0xff]  ;;  %v6478_v63 = vpack.c.bf16 %v3862_v16, %v3858_v50  ;;  %v3864_v17 = vld [vmem:[#allocation5 + $0x388] sm:$0xff] }
 0xa97   :  { %6461 = vmatpush1.bf16.msra.mxu1 %v6460_v18  ;;  %6399 = vmatprep.subr.bf16.mxu0 %v6398_v33  ;;  %v3861_v20 = vld [vmem:[#allocation5 + $0x370] sm:$0xff]  ;;  %v3868_v52 = vld [vmem:[#allocation5 + $0x3a8] sm:$0xff]  ;;  %v3866_v57 = vld [vmem:[#allocation5 + $0x398] sm:$0xff]  ;;  %v6416_v5 = vpack.c.bf16 %v3859_v7, %v3855_v42 }
 0xa98   :  { %6463 = vmatprep.subr.bf16.mxu1 %v6462_v38  ;;  %v3870_v8 = vld [vmem:[#allocation5 + $0x3b8] sm:$0xff]  ;;  %v6480_v18 = vpack.c.bf16 %v3861_v20, %v3857_v46  ;;  %v6418_v33 = vpack.c.bf16 %v3868_v52, %v3864_v17  ;;  %v3863_v37 = vld [vmem:[#allocation5 + $0x380] sm:$0xff]  ;;  %v3865_v39 = vld [vmem:[#allocation5 + $0x390] sm:$0xff] }
 0xa99   :  { %v3867_v29 = vld [vmem:[#allocation5 + $0x3a0] sm:$0xff]  ;;  %v6482_v38 = vpack.c.bf16 %v3870_v8, %v3866_v57  ;;  %v3869_v58 = vld [vmem:[#allocation5 + $0x3b0] sm:$0xff]  ;;  %v3872_v54 = vld [vmem:[#allocation5 + $0x3c8] sm:$0xff] }
 0xa9a   :  { %6401 = vmatpush1.bf16.msra.mxu0 %v6400_v53  ;;  %v3876_v56 = vld [vmem:[#allocation5 + $0x3e8] sm:$0xff]  ;;  %v3874_v12 = vld [vmem:[#allocation5 + $0x3d8] sm:$0xff]  ;;  %v6420_v53 = vpack.c.bf16 %v3867_v29, %v3863_v37  ;;  %v3871_v10 = vld [vmem:[#allocation5 + $0x3c0] sm:$0xff] }
 0xa9b   :  { %6465 = vmatpush1.bf16.msra.mxu1 %v6464_v45  ;;  %6403 = vmatprep.subr.bf16.mxu0 %v6402_v15  ;;  %v3878_v51 = vld [vmem:[#allocation5 + $0x3f8] sm:$0xff]  ;;  %v6484_v45 = vpack.c.bf16 %v3869_v58, %v3865_v39  ;;  %v6422_v15 = vpack.c.bf16 %v3876_v56, %v3872_v54  ;;  %v3875_v28 = vld [vmem:[#allocation5 + $0x3e0] sm:$0xff]  ;;  %v3877_v40 = vld [vmem:[#allocation5 + $0x3f0] sm:$0xff] }
 0xa9c   :  { %6467 = vmatprep.subr.bf16.mxu1 %v6466_v25  ;;  %v6486_v59 = vpack.c.bf16 %v3878_v51, %v3874_v12  ;;  %v3873_v25 = vld [vmem:[#allocation5 + $0x3d0] sm:$0xff]  ;;  %v6424_v60 = vpack.c.bf16 %v3875_v28, %v3871_v10  ;;  %v9945_v41 = vld [vmem:[#allocation33_spill] sm:$0xff]  ;;  %v9946_v19 = vld [vmem:[#allocation100_spill] sm:$0xff] }
 0xa9d   :  { %v6488_v26 = vpack.c.bf16 %v3877_v40, %v3873_v25  ;;  %v9950_v36 = vld [vmem:[#allocation104_spill] sm:$0xff]  ;;  %v9951_v61 = vld [vmem:[#allocation27_spill] sm:$0xff]  ;;  %v9952_v32 = vld [vmem:[#allocation30_spill] sm:$0xff] }
 0xa9e   :  { %6405 = vmatpush1.bf16.msra.mxu0 %v6404_v27  ;;  %v9947_v27 = vld [vmem:[#allocation101_spill] sm:$0xff]  ;;  %v9954_v44 = vld [vmem:[#allocation106_spill] sm:$0xff]  ;;  %v9955_v34 = vld [vmem:[#allocation107_spill] sm:$0xff] }
 0xa9f   :  { %6469 = vmatpush1.bf16.msra.mxu1 %v6468_v0  ;;  %6407 = vmatprep.subr.bf16.mxu0 %v6406_v23  ;;  %v9948_v0 = vld [vmem:[#allocation102_spill] sm:$0xff]  ;;  %v9949_v23 = vld [vmem:[#allocation103_spill] sm:$0xff] }
 0xaa0   :  { %6471 = vmatprep.subr.bf16.mxu1 %v6470_v1  ;;  %v9953_v1 = vld [vmem:[#allocation105_spill] sm:$0xff] }
 0xaa2   :  { %6409 = vmatpush1.bf16.msra.mxu0 %v6408_v43 }
 0xaa3   :  { %6473 = vmatpush1.bf16.msra.mxu1 %v6472_v13  ;;  %6411 = vmatprep.subr.bf16.mxu0 %v6410_v55 }
 0xaa4   :  { %6475 = vmatprep.subr.bf16.mxu1 %v6474_v62 }
 0xaa6   :  { %6413 = vmatpush1.bf16.msra.mxu0 %v6412_v48 }
 0xaa7   :  { %6477 = vmatpush1.bf16.msra.mxu1 %v6476_v3  ;;  %6415 = vmatprep.subr.bf16.mxu0 %v6414_v2 }
 0xaa8   :  { %6479 = vmatprep.subr.bf16.mxu1 %v6478_v63 }
 0xaaa   :  { %6417 = vmatpush1.bf16.msra.mxu0 %v6416_v5 }
 0xaab   :  { %6481 = vmatpush1.bf16.msra.mxu1 %v6480_v18  ;;  %6419 = vmatprep.subr.bf16.mxu0 %v6418_v33 }
 0xaac   :  { %6483 = vmatprep.subr.bf16.mxu1 %v6482_v38 }
 0xaae   :  { %6421 = vmatpush1.bf16.msra.mxu0 %v6420_v53 }
 0xaaf   :  { %6485 = vmatpush1.bf16.msra.mxu1 %v6484_v45  ;;  %6423 = vmatprep.subr.bf16.mxu0 %v6422_v15 }
 0xab0   :  { %6487 = vmatprep.subr.bf16.mxu1 %v6486_v59 }
 0xab2   :  { %6425 = vmatpush1.bf16.msra.mxu0 %v6424_v60 }
 0xab3   :  { %6489 = vmatpush1.bf16.msra.mxu1 %v6488_v26 }
 0xab5   :  { %3966 = vmatmul.mubr.f32.vlgmr.msra.gmra.mrb[32].mxu0 %v9945_v41 }
 0xab6   :  { %4079 = vmatmul.mubr.f32.vlgmr.msra.gmra.mrb[32].mxu1 %v9945_v41  ;;  %3971 = vmatprep.mubr.f32.mxu0 %v9946_v19 }
 0xab7   :  { %4084 = vmatprep.mubr.f32.mxu1 %v9946_v19 }
 0xab9   :  { %3972 = vmatmul.mubr.f32.gmra.mrb[34].mxu0 %v9947_v27 }
 0xaba   :  { %4085 = vmatmul.mubr.f32.gmra.mrb[34].mxu1 %v9947_v27  ;;  %3977 = vmatprep.mubr.f32.mxu0 %v9948_v0 }
 0xabb   :  { %4090 = vmatprep.mubr.f32.mxu1 %v9948_v0 }
 0xabd   :  { %3978 = vmatmul.mubr.f32.gmra.mrb[36].mxu0 %v9949_v23 }
 0xabe   :  { %4091 = vmatmul.mubr.f32.gmra.mrb[36].mxu1 %v9949_v23  ;;  %3983 = vmatprep.mubr.f32.mxu0 %v9950_v36 }
 0xabf   :  { %4096 = vmatprep.mubr.f32.mxu1 %v9950_v36 }
 0xac1   :  { %3984 = vmatmul.mubr.f32.gmra.mrb[38].mxu0 %v9951_v61 }
 0xac2   :  { %4097 = vmatmul.mubr.f32.gmra.mrb[38].mxu1 %v9951_v61  ;;  %3989 = vmatprep.mubr.f32.mxu0 %v9952_v32 }
 0xac3   :  { %4102 = vmatprep.mubr.f32.mxu1 %v9952_v32 }
 0xac5   :  { %3990 = vmatmul.mubr.f32.gmra.mrb[40].mxu0 %v9953_v1 }
 0xac6   :  { %4103 = vmatmul.mubr.f32.gmra.mrb[40].mxu1 %v9953_v1  ;;  %3995 = vmatprep.mubr.f32.mxu0 %v9954_v44 }
 0xac7   :  { %4108 = vmatprep.mubr.f32.mxu1 %v9954_v44 }
 0xac9   :  { %3996 = vmatmul.mubr.f32.gmra.mrb[42].mxu0 %v9955_v34 }
 0xaca   :  { %4109 = vmatmul.mubr.f32.gmra.mrb[42].mxu1 %v9955_v34  ;;  %4001 = vmatprep.mubr.f32.mxu0 %v8659_v21 }
 0xacb   :  { %4114 = vmatprep.mubr.f32.mxu1 %v8659_v21 }
 0xacd   :  { %4002 = vmatmul.mubr.f32.gmra.mrb[44].mxu0 %v8661_v6 }
 0xace   :  { %4115 = vmatmul.mubr.f32.gmra.mrb[44].mxu1 %v8661_v6  ;;  %4007 = vmatprep.mubr.f32.mxu0 %v8746_v14 }
 0xacf   :  { %4120 = vmatprep.mubr.f32.mxu1 %v8746_v14 }
 0xad1   :  { %4008 = vmatmul.mubr.f32.gmra.mrb[46].mxu0 %v8743_v49 }
 0xad2   :  { %4121 = vmatmul.mubr.f32.gmra.mrb[46].mxu1 %v8743_v49 }
 0xad3   :  { %6962 = shalt.err (!%p6959_p0)
}
 0xad4   :  { %s6963_s16 = scalar_lea.hbm %s8875_s7, 256 }
 0xad5   :  { %p6964_p1 = scmp.ne.s32.totalorder %s8875_s7, %s6963_s16  ;;  %p6967_p2 = scmp.lt.u32.totalorder %s6963_s16, %s8875_s7 }
 0xad7   :  { %p6969_p3 = pnand %p6967_p2, %p6964_p1 }
 0xad9   :  { %6972 = shalt.err (!%p6969_p3)
}
 0xada   :  { %4180 = dma.vmem_to_hbm [thread:$0]  %s4178_s12, 256, %s8875_s7, [#allocation12]  }
 0xadb   :  { %s7034_s5 = smov [#allocation13]  }
 0xadc   :  { %s4187_s21 = sshll.u32 %s7034_s5, 4  ;;  %s4188_s21 = int_to_ptr.vmem [resolvable:$true] %s4187_s21 }
 0xadd   :  { %s6973_s22 = scalar_lea.vmem %s4188_s21, 256  ;;  %p6978_p5 = scmp.lt.s32.totalorder %s4188_s21, %s4188_s21 }
 0xade   :  { %p6974_p4 = scmp.ne.s32.totalorder %s4188_s21, %s6973_s22  ;;  %p6979_p6 = scmp.lt.s32.totalorder %s6973_s22, %s6973_s22 }
 0xae0   :  { %p6980_p7 = por %p6979_p6, %p6978_p5 }
 0xae2   :  { %p6981_p8 = pnand %p6980_p7, %p6974_p4 }
 0xae4   :  { %6984 = shalt.err (!%p6981_p8)
}
 0xae5   :  { %s6985_s1 = scalar_lea.hbm %s8876_s8, 256 }
 0xae6   :  { %p6986_p9 = scmp.ne.s32.totalorder %s8876_s8, %s6985_s1  ;;  %p6989_p10 = scmp.lt.u32.totalorder %s6985_s1, %s8876_s8 }
 0xae8   :  { %p6991_p11 = pnand %p6989_p10, %p6986_p9 }
 0xaea   :  { %6994 = shalt.err (!%p6991_p11)
}
 0xaeb   :  { %4190 = dma.vmem_to_hbm [thread:$0]  %s4188_s21, 256, %s8876_s8, [#allocation12]   ;;  %v3879_v21 = vld [vmem:[%s8871_s3] sm:$0xf] }
 0xaec   :  { %v9956_v6 = vld [vmem:[#allocation25_spill] sm:$0xff]  ;;  %s7035_s3 = smov [#allocation10]  }
 0xaed   :  { %v9957_v49 = vsub.s32 0, %v9956_v6  ;;  %v9958_v9 = vsub.s32 2, %v9956_v6  ;;  %v9959_v30 = vsub.s32 1, %v9956_v6  ;;  %v9960_v13 = vsub.s32 3, %v9956_v6  ;;  %s4164_s8 = sshll.u32 %s7035_s3, 4  ;;  %s4165_s8 = int_to_ptr.vmem [resolvable:$true] %s4164_s8 }
 0xaee   :  { %s6995_s10 = scalar_lea.vmem %s4165_s8, 4096  ;;  %p7000_p13 = scmp.lt.s32.totalorder %s4165_s8, %s4165_s8 }
 0xaef   :  { %v8810_v14 = vrot.slane %v3879_v21, %v9957_v49  ;;  %v8814_v35 = vrot.slane %v3879_v21, %v9958_v9  ;;  %v8818_v43 = vrot.slane %v3879_v21, %v9959_v30  ;;  %v8822_v55 = vrot.slane %v3879_v21, %v9960_v13  ;;  %p6996_p12 = scmp.ne.s32.totalorder %s4165_s8, %s6995_s10  ;;  %p7001_p0 = scmp.lt.s32.totalorder %s6995_s10, %s6995_s10 }
 0xaf1   :  { %p7002_p1 = por %p7001_p0, %p7000_p13 }
 0xaf3   :  { %p7003_p2 = pnand %p7002_p1, %p6996_p12 }
 0xb88   :  { %v3967_v31 = vpop.f32.mrb[32].mxu0 }
 0xb89   :  { %v3968_v24 = vadd.f32 %v3967_v31, %v8810_v14  ;;  %v4080_v4 = vpop.f32.mrb[32].mxu1  ;;  %v3969_v62 = vpop.f32.mrb[33].mxu0 }
 0xb8a   :  { %v4081_v47 = vadd.f32 %v4080_v4, %v8814_v35  ;;  %v3970_v11 = vadd.f32 %v3969_v62, %v8818_v43  ;;  %v4082_v22 = vpop.f32.mrb[33].mxu1 }
 0xb8b   :  { %4127 = vst [vmem:[#allocation10] sm:$0xff] %v3968_v24  ;;  %v4083_v50 = vadd.f32 %v4082_v22, %v8822_v55 }
 0xb8c   :  { %4129 = vst [vmem:[#allocation10 + $0x10] sm:$0xff] %v4081_v47  ;;  %4128 = vst [vmem:[#allocation10 + $0x8] sm:$0xff] %v3970_v11  ;;  %v3973_v16 = vpop.f32.mrb[34].mxu0 }
 0xb8d   :  { %4130 = vst [vmem:[#allocation10 + $0x18] sm:$0xff] %v4083_v50  ;;  %v3974_v48 = vadd.f32 %v3973_v16, %v8810_v14  ;;  %v4086_v3 = vpop.f32.mrb[34].mxu1  ;;  %v3975_v2 = vpop.f32.mrb[35].mxu0 }
 0xb8e   :  { %v4087_v42 = vadd.f32 %v4086_v3, %v8814_v35  ;;  %v3976_v7 = vadd.f32 %v3975_v2, %v8818_v43  ;;  %v4088_v46 = vpop.f32.mrb[35].mxu1 }
 0xb8f   :  { %4131 = vst [vmem:[#allocation10 + $0x20] sm:$0xff] %v3974_v48  ;;  %v4089_v63 = vadd.f32 %v4088_v46, %v8822_v55 }
 0xb90   :  { %4133 = vst [vmem:[#allocation10 + $0x30] sm:$0xff] %v4087_v42  ;;  %4132 = vst [vmem:[#allocation10 + $0x28] sm:$0xff] %v3976_v7  ;;  %v3979_v20 = vpop.f32.mrb[36].mxu0 }
 0xb91   :  { %4134 = vst [vmem:[#allocation10 + $0x38] sm:$0xff] %v4089_v63  ;;  %v3980_v17 = vadd.f32 %v3979_v20, %v8810_v14  ;;  %v4092_v52 = vpop.f32.mrb[36].mxu1  ;;  %v3981_v57 = vpop.f32.mrb[37].mxu0 }
 0xb92   :  { %v4093_v8 = vadd.f32 %v4092_v52, %v8814_v35  ;;  %v3982_v5 = vadd.f32 %v3981_v57, %v8818_v43  ;;  %v4094_v18 = vpop.f32.mrb[37].mxu1 }
 0xb93   :  { %4135 = vst [vmem:[#allocation10 + $0x40] sm:$0xff] %v3980_v17  ;;  %v4095_v33 = vadd.f32 %v4094_v18, %v8822_v55 }
 0xb94   :  { %4137 = vst [vmem:[#allocation10 + $0x50] sm:$0xff] %v4093_v8  ;;  %4136 = vst [vmem:[#allocation10 + $0x48] sm:$0xff] %v3982_v5  ;;  %v3985_v37 = vpop.f32.mrb[38].mxu0 }
 0xb95   :  { %4138 = vst [vmem:[#allocation10 + $0x58] sm:$0xff] %v4095_v33  ;;  %v3986_v29 = vadd.f32 %v3985_v37, %v8810_v14  ;;  %v4098_v39 = vpop.f32.mrb[38].mxu1  ;;  %v3987_v38 = vpop.f32.mrb[39].mxu0 }
 0xb96   :  { %v4099_v58 = vadd.f32 %v4098_v39, %v8814_v35  ;;  %v3988_v54 = vadd.f32 %v3987_v38, %v8818_v43  ;;  %v4100_v56 = vpop.f32.mrb[39].mxu1 }
 0xb97   :  { %4139 = vst [vmem:[#allocation10 + $0x60] sm:$0xff] %v3986_v29  ;;  %v4101_v12 = vadd.f32 %v4100_v56, %v8822_v55 }
 0xb98   :  { %4141 = vst [vmem:[#allocation10 + $0x70] sm:$0xff] %v4099_v58  ;;  %4140 = vst [vmem:[#allocation10 + $0x68] sm:$0xff] %v3988_v54  ;;  %v3991_v51 = vpop.f32.mrb[40].mxu0 }
 0xb99   :  { %4142 = vst [vmem:[#allocation10 + $0x78] sm:$0xff] %v4101_v12  ;;  %v3992_v53 = vadd.f32 %v3991_v51, %v8810_v14  ;;  %v4104_v45 = vpop.f32.mrb[40].mxu1  ;;  %v3993_v15 = vpop.f32.mrb[41].mxu0 }
 0xb9a   :  { %v4105_v10 = vadd.f32 %v4104_v45, %v8814_v35  ;;  %v3994_v28 = vadd.f32 %v3993_v15, %v8818_v43  ;;  %v4106_v59 = vpop.f32.mrb[41].mxu1 }
 0xb9b   :  { %4143 = vst [vmem:[#allocation10 + $0x80] sm:$0xff] %v3992_v53  ;;  %v4107_v25 = vadd.f32 %v4106_v59, %v8822_v55 }
 0xb9c   :  { %4145 = vst [vmem:[#allocation10 + $0x90] sm:$0xff] %v4105_v10  ;;  %4144 = vst [vmem:[#allocation10 + $0x88] sm:$0xff] %v3994_v28  ;;  %v3997_v40 = vpop.f32.mrb[42].mxu0 }
 0xb9d   :  { %4146 = vst [vmem:[#allocation10 + $0x98] sm:$0xff] %v4107_v25  ;;  %v3998_v60 = vadd.f32 %v3997_v40, %v8810_v14  ;;  %v4110_v26 = vpop.f32.mrb[42].mxu1  ;;  %v3999_v41 = vpop.f32.mrb[43].mxu0 }
 0xb9e   :  { %v4111_v19 = vadd.f32 %v4110_v26, %v8814_v35  ;;  %v4000_v27 = vadd.f32 %v3999_v41, %v8818_v43  ;;  %v4112_v0 = vpop.f32.mrb[43].mxu1 }
 0xb9f   :  { %4147 = vst [vmem:[#allocation10 + $0xa0] sm:$0xff] %v3998_v60  ;;  %v4113_v23 = vadd.f32 %v4112_v0, %v8822_v55 }
 0xba0   :  { %4149 = vst [vmem:[#allocation10 + $0xb0] sm:$0xff] %v4111_v19  ;;  %4148 = vst [vmem:[#allocation10 + $0xa8] sm:$0xff] %v4000_v27  ;;  %v4003_v36 = vpop.f32.mrb[44].mxu0 }
 0xba1   :  { %4150 = vst [vmem:[#allocation10 + $0xb8] sm:$0xff] %v4113_v23  ;;  %v4004_v61 = vadd.f32 %v4003_v36, %v8810_v14  ;;  %v4116_v32 = vpop.f32.mrb[44].mxu1  ;;  %v4005_v1 = vpop.f32.mrb[45].mxu0 }
 0xba2   :  { %v4117_v44 = vadd.f32 %v4116_v32, %v8814_v35  ;;  %v4006_v34 = vadd.f32 %v4005_v1, %v8818_v43  ;;  %v4118_v21 = vpop.f32.mrb[45].mxu1 }
 0xba3   :  { %4151 = vst [vmem:[#allocation10 + $0xc0] sm:$0xff] %v4004_v61  ;;  %v4119_v6 = vadd.f32 %v4118_v21, %v8822_v55 }
 0xba4   :  { %4153 = vst [vmem:[#allocation10 + $0xd0] sm:$0xff] %v4117_v44  ;;  %4152 = vst [vmem:[#allocation10 + $0xc8] sm:$0xff] %v4006_v34  ;;  %v4009_v49 = vpop.f32.mrb[46].mxu0 }
 0xba5   :  { %4154 = vst [vmem:[#allocation10 + $0xd8] sm:$0xff] %v4119_v6  ;;  %v4010_v9 = vadd.f32 %v4009_v49, %v8810_v14  ;;  %v4122_v30 = vpop.f32.mrb[46].mxu1  ;;  %v4011_v13 = vpop.f32.mrb[47].mxu0 }
 0xba6   :  { %v4123_v31 = vadd.f32 %v4122_v30, %v8814_v35  ;;  %v4012_v24 = vadd.f32 %v4011_v13, %v8818_v43  ;;  %v4124_v4 = vpop.f32.mrb[47].mxu1 }
 0xba7   :  { %4155 = vst [vmem:[#allocation10 + $0xe0] sm:$0xff] %v4010_v9  ;;  %v4125_v62 = vadd.f32 %v4124_v4, %v8822_v55 }
 0xba8   :  { %4157 = vst [vmem:[#allocation10 + $0xf0] sm:$0xff] %v4123_v31  ;;  %4156 = vst [vmem:[#allocation10 + $0xe8] sm:$0xff] %v4012_v24 }
 0xba9   :  { %4158 = vst [vmem:[#allocation10 + $0xf8] sm:$0xff] %v4125_v62 }
 0xbaa   :  { %7006 = shalt.err (!%p7003_p2)
}
 0xbab   :  { %s7007_s12 = scalar_lea.hbm %s8874_s6, 4096 }
 0xbac   :  { %p7008_p3 = scmp.ne.s32.totalorder %s8874_s6, %s7007_s12  ;;  %p7011_p4 = scmp.lt.u32.totalorder %s7007_s12, %s8874_s6 }
 0xbae   :  { %p7013_p5 = pnand %p7011_p4, %p7008_p3 }
 0xbb0   :  { %7016 = shalt.err (!%p7013_p5)
}
 0xbb1   :  { %s7036_s4 = smov 512   ;;  %s7037_s17 = smov 32  }
 0xbb2   :  { %4170 = dma.vmem_to_hbm [thread:$0]  %s4165_s8, 4096, %s8874_s6, [#allocation9], %s7036_s4, %s7036_s4, %s7037_s17  }
 0xbb3   :  { %7023 = dma.done.wait [#allocation9], 4096  }
 0xbb4   :  { %7024 = vsyncadd [#allocation9], 4294963200 }
 0xbb5   :  { %7025 = dma.done.wait [#allocation12], 512  }
 0xbb6   :  { %7026 = vsyncadd [#allocation12], 4294966784 }
 0xbb7   :  { %4200 = vsyncpa [#allocation8], 1 }
 0xbb8   :  { %4201 = vsyncpa [#allocation9], 1 }
 0xbb9   :  { %4202 = vsyncpa [#allocation12], 1 }
 0xbba   :  { %4203 = vsyncmov [#allocation6] }
 0xbbd   :  { %s4204_s20 = vpop.sfrf %4203 }
 0xbbe   :  { %p4296_p6 = scmp.ne.s32.totalorder %s4204_s20, 0 }
 0xbc0   :  { %4208 = shalt.err (%p4296_p6)  }
 0xbc1   :  { %4210 = vsyncmov [#allocation6 + $0x1] }
 0xbc4   :  { %s4211_s2 = vpop.sfrf %4210 }
 0xbc5   :  { %p4297_p7 = scmp.ne.s32.totalorder %s4211_s2, 0 }
 0xbc7   :  { %4215 = shalt.err (%p4297_p7)  }

</bundles_post_ra>
